<compile_context>
chip_gen: v5e
topology: v5e:2x2
jax: 0.10.0
libtpu: 0.0.40
codegen_flags: <defaults>
</compile_context>

<pallas_src>
import jax
import jax.numpy as jnp
import numpy as np
from jax import lax
from jax.experimental import pallas as pl
from jax.experimental.pallas import tpu as pltpu

BN_EPS = 1e-5
_TAPS = ((0, 0), (0, 1), (1, 0), (1, 1))   # (kh, kw) for the 2x2 kernels


# ---------------------------------------------------------------------------
# Single fused kernel
# ---------------------------------------------------------------------------
def fused_net_kernel(x_ref, w1_ref, g1_ref, be1_ref,
                     w2_ref, g2_ref, be2_ref, wfc_ref, bfc_ref, o_ref):
    """Whole Net forward; all intermediates live in VMEM/vregs.

    x_ref   : (B, H, W, 1)  NHWC input (cin = 1)
    w1_ref  : (4, 32)       conv1 weight, row = kh*2 + kw
    g1_ref, be1_ref : (1, 32)
    w2_ref  : (128, 64)     conv2 weight, row = (kh*2 + kw)*32 + cin
    g2_ref, be2_ref : (1, 64)
    wfc_ref : (64, 10)      fc weight (transposed)
    bfc_ref : (1, 10)
    o_ref   : (B, 10)
    """
    x = x_ref[...]                                       # (B, H, W, 1)
    B, H, W, _ = x.shape
    H1, W1 = H - 1, W - 1                                # conv1 output spatial

    # ---- conv1 (2x2, cin=1) as 4 VPU FMAs; output channels (32) on lanes ----
    # (conv bias omitted: a constant per-channel bias is exactly cancelled by
    #  the train-mode BatchNorm mean subtraction that follows.)
    y1 = None
    for k, (ki, kj) in enumerate(_TAPS):
        tap = x[:, ki:ki + H1, kj:kj + W1, :]            # (B, H1, W1, 1)
        term = tap * w1_ref[k:k + 1, :]                  # -> (B, H1, W1, 32)
        y1 = term if y1 is None else y1 + term

    # ---- BatchNorm1 (training mode, batch stats) + ReLU, single pass --------
    n1 = float(B * H1 * W1)
    s = jnp.sum(jnp.sum(y1, axis=0), axis=0)                         # (W1, 32)
    mean1 = jnp.sum(s, axis=0, keepdims=True) / n1                   # (1, 32)
    sq = jnp.sum(jnp.sum(y1 * y1, axis=0), axis=0)                   # (W1, 32)
    ex2 = jnp.sum(sq, axis=0, keepdims=True) / n1                    # (1, 32)
    var1 = ex2 - mean1 * mean1
    scale1 = g1_ref[...] * lax.rsqrt(var1 + BN_EPS)                  # (1, 32)
    shift1 = be1_ref[...] - mean1 * scale1                           # (1, 32)
    y1 = jnp.maximum(y1 * scale1 + shift1, 0.0)                      # (B, H1, W1, 32)

    # ---- MaxPool2d(2) (floor mode), fully in-register ------------------------
    Hp, Wp = H1 // 2, W1 // 2
    ph = jnp.concatenate(
        [jnp.max(y1[:, 2 * i:2 * i + 2, :2 * Wp, :], axis=1, keepdims=True)
         for i in range(Hp)], axis=1)                                # (B, Hp, 2*Wp, 32)
    p = jnp.concatenate(
        [jnp.max(ph[:, :, 2 * j:2 * j + 2, :], axis=2, keepdims=True)
         for j in range(Wp)], axis=2)                                # (B, Hp, Wp, 32)

    # ---- conv2 (2x2, 32->64): in-VMEM im2col + one MXU matmul (K=128) --------
    H2, W2 = Hp - 1, Wp - 1
    xcol = jnp.concatenate(
        [p[:, ki:ki + H2, kj:kj + W2, :] for (ki, kj) in _TAPS], axis=-1)  # (B,H2,W2,128)
    lhs = jnp.concatenate(
        [xcol[b, i] for b in range(B) for i in range(H2)], axis=0)         # (B*H2*W2, 128)
    y2 = jnp.dot(lhs, w2_ref[...], preferred_element_type=jnp.float32)     # (R2, 64)

    # ---- BatchNorm2 (training mode) + ReLU, single pass ----------------------
    n2 = float(B * H2 * W2)
    mean2 = jnp.sum(y2, axis=0, keepdims=True) / n2                  # (1, 64)
    ex2b = jnp.sum(y2 * y2, axis=0, keepdims=True) / n2              # (1, 64)
    var2 = ex2b - mean2 * mean2
    scale2 = g2_ref[...] * lax.rsqrt(var2 + BN_EPS)
    shift2 = be2_ref[...] - mean2 * scale2
    y2 = jnp.maximum(y2 * scale2 + shift2, 0.0)                      # (R2, 64)

    # ---- AdaptiveMaxPool2d((1,1)) + flatten + Linear, whole batch at once ----
    S2 = H2 * W2
    feats = jnp.concatenate(
        [jnp.max(y2[b * S2:(b + 1) * S2, :], axis=0, keepdims=True)
         for b in range(B)], axis=0)                                 # (B, 64)
    o_ref[...] = (jnp.dot(feats, wfc_ref[...], preferred_element_type=jnp.float32)
                  + bfc_ref[...])                                    # (B, 10)


# ---------------------------------------------------------------------------
# Wrapper: one pallas_call, everything resident in VMEM (no grid, no tiling)
# ---------------------------------------------------------------------------
_VMEM_SPEC = pl.BlockSpec(memory_space=pltpu.MemorySpace.VMEM)


def net_forward_pallas(x_nchw, params):
    (w1col, g1, be1, w2col, g2, be2, wfc_t, bfc) = params
    B, _, H, W = x_nchw.shape
    x_nhwc = x_nchw.reshape(B, H, W, 1)      # cin == 1: NCHW -> NHWC is a pure reshape
    return pl.pallas_call(
        fused_net_kernel,
        out_shape=jax.ShapeDtypeStruct((B, 10), jnp.float32),
        in_specs=[_VMEM_SPEC] * 9,
        out_specs=_VMEM_SPEC,
    )(x_nhwc, w1col, g1, be1, w2col, g2, be2, wfc_t, bfc)


net_forward_pallas = jax.jit(net_forward_pallas)


# ---------------------------------------------------------------------------
# Pure-JAX reference (PyTorch train-mode semantics, biases included) for check
# ---------------------------------------------------------------------------
def net_forward_reference(x_nchw, raw):
    w1, b1, g1, be1, w2, b2, g2, be2, wfc, bfc = raw

    def bn(y, gamma, beta):
        mean = y.mean(axis=(0, 2, 3), keepdims=True)
        var = jnp.square(y - mean).mean(axis=(0, 2, 3), keepdims=True)
        y = (y - mean) * lax.rsqrt(var + BN_EPS)
        return y * gamma[None, :, None, None] + beta[None, :, None, None]

    dn = ("NCHW", "OIHW", "NCHW")
    y = lax.conv_general_dilated(x_nchw, w1, (1, 1), "VALID", dimension_numbers=dn)
    y = y + b1[None, :, None, None]
    y = jnp.maximum(bn(y, g1, be1), 0.0)
    y = lax.reduce_window(y, -jnp.inf, lax.max, (1, 1, 2, 2), (1, 1, 2, 2), "VALID")
    y = lax.conv_general_dilated(y, w2, (1, 1), "VALID", dimension_numbers=dn)
    y = y + b2[None, :, None, None]
    y = jnp.maximum(bn(y, g2, be2), 0.0)
    y = jnp.max(y, axis=(2, 3))                         # global max pool + flatten
    return y @ wfc.T + bfc


# ---------------------------------------------------------------------------
# Main
# ---------------------------------------------------------------------------
if __name__ == "__main__":
    key = jax.random.PRNGKey(0)
    ks = jax.random.split(key, 11)

    B, H, W = 2, 16, 16
    x = jax.random.normal(ks[0], (B, 1, H, W), dtype=jnp.float32)   # NCHW, like torch

    # Deterministic parameters (shapes follow the nn.Module __init__).
    w1 = 0.30 * jax.random.normal(ks[1], (32, 1, 2, 2), dtype=jnp.float32)
    b1 = 0.10 * jax.random.normal(ks[2], (32,), dtype=jnp.float32)
    g1 = 1.0 + 0.10 * jax.random.normal(ks[3], (32,), dtype=jnp.float32)
    be1 = 0.10 * jax.random.normal(ks[4], (32,), dtype=jnp.float32)
    w2 = 0.10 * jax.random.normal(ks[5], (64, 32, 2, 2), dtype=jnp.float32)
    b2 = 0.10 * jax.random.normal(ks[6], (64,), dtype=jnp.float32)
    g2 = 1.0 + 0.10 * jax.random.normal(ks[7], (64,), dtype=jnp.float32)
    be2 = 0.10 * jax.random.normal(ks[8], (64,), dtype=jnp.float32)
    wfc = 0.10 * jax.random.normal(ks[9], (10, 64), dtype=jnp.float32)
    bfc = 0.10 * jax.random.normal(ks[10], (10,), dtype=jnp.float32)

    # Repack conv weights for the in-kernel im2col layout: (kh, kw, cin, cout).
    w1col = jnp.transpose(w1, (2, 3, 1, 0)).reshape(4, 32)
    w2col = jnp.transpose(w2, (2, 3, 1, 0)).reshape(4 * 32, 64)
    # Conv biases b1/b2 are not passed to the kernel: under train-mode BN they
    # are exactly cancelled by the batch-mean subtraction (the reference keeps
    # them, demonstrating the equivalence).
    params = (
        w1col, g1.reshape(1, 32), be1.reshape(1, 32),
        w2col, g2.reshape(1, 64), be2.reshape(1, 64),
        wfc.T, bfc.reshape(1, 10),
    )

    out = jax.block_until_ready(net_forward_pallas(x, params))
    assert out.shape == (B, 10), out.shape

    ref = jax.block_until_ready(
        net_forward_reference(x, (w1, b1, g1, be1, w2, b2, g2, be2, wfc, bfc))
    )
    np.testing.assert_allclose(np.asarray(out), np.asarray(ref), rtol=1e-4, atol=1e-4)

    print("KERNEL_OK")
</pallas_src>

<mosaic_0001>
module attributes {stable_mosaic.version = 11 : i64} {
  func.func @fused_net_kernel(%arg0: memref<2x16x16x1xf32, #tpu.memory_space<vmem>>, %arg1: memref<4x32xf32, #tpu.memory_space<vmem>>, %arg2: memref<1x32xf32, #tpu.memory_space<vmem>>, %arg3: memref<1x32xf32, #tpu.memory_space<vmem>>, %arg4: memref<128x64xf32, #tpu.memory_space<vmem>>, %arg5: memref<1x64xf32, #tpu.memory_space<vmem>>, %arg6: memref<1x64xf32, #tpu.memory_space<vmem>>, %arg7: memref<64x10xf32, #tpu.memory_space<vmem>>, %arg8: memref<1x10xf32, #tpu.memory_space<vmem>>, %arg9: memref<2x10xf32, #tpu.memory_space<vmem>>) attributes {dimension_semantics = [], scalar_prefetch = 0 : i64, scratch_operands = 0 : i64, tpu.core_type = #tpu.core_type<tc>} {
    %c0 = arith.constant 0 : index
    %c0_0 = arith.constant 0 : index
    %c0_1 = arith.constant 0 : index
    %c0_2 = arith.constant 0 : index
    %0 = vector.load %arg0[%c0, %c0_0, %c0_1, %c0_2] : memref<2x16x16x1xf32, #tpu.memory_space<vmem>>, vector<2x16x16x1xf32>
    %1 = vector.extract_strided_slice %0 {offsets = [0, 0, 0, 0], sizes = [2, 15, 15, 1], strides = [1, 1, 1, 1]} : vector<2x16x16x1xf32> to vector<2x15x15x1xf32>
    %c0_3 = arith.constant 0 : index
    %c0_4 = arith.constant 0 : index
    %2 = vector.load %arg1[%c0_3, %c0_4] : memref<4x32xf32, #tpu.memory_space<vmem>>, vector<1x32xf32>
    %3 = vector.shape_cast %2 : vector<1x32xf32> to vector<1x1x1x32xf32>
    %4 = vector.broadcast %1 : vector<2x15x15x1xf32> to vector<2x15x15x32xf32>
    %5 = vector.broadcast %3 : vector<1x1x1x32xf32> to vector<2x15x15x32xf32>
    %6 = arith.mulf %4, %5 : vector<2x15x15x32xf32>
    %7 = vector.extract_strided_slice %0 {offsets = [0, 0, 1, 0], sizes = [2, 15, 15, 1], strides = [1, 1, 1, 1]} : vector<2x16x16x1xf32> to vector<2x15x15x1xf32>
    %c1 = arith.constant 1 : index
    %c0_5 = arith.constant 0 : index
    %8 = vector.load %arg1[%c1, %c0_5] : memref<4x32xf32, #tpu.memory_space<vmem>>, vector<1x32xf32>
    %9 = vector.shape_cast %8 : vector<1x32xf32> to vector<1x1x1x32xf32>
    %10 = vector.broadcast %7 : vector<2x15x15x1xf32> to vector<2x15x15x32xf32>
    %11 = vector.broadcast %9 : vector<1x1x1x32xf32> to vector<2x15x15x32xf32>
    %12 = arith.mulf %10, %11 : vector<2x15x15x32xf32>
    %13 = arith.addf %6, %12 : vector<2x15x15x32xf32>
    %14 = vector.extract_strided_slice %0 {offsets = [0, 1, 0, 0], sizes = [2, 15, 15, 1], strides = [1, 1, 1, 1]} : vector<2x16x16x1xf32> to vector<2x15x15x1xf32>
    %c2 = arith.constant 2 : index
    %c0_6 = arith.constant 0 : index
    %15 = vector.load %arg1[%c2, %c0_6] : memref<4x32xf32, #tpu.memory_space<vmem>>, vector<1x32xf32>
    %16 = vector.shape_cast %15 : vector<1x32xf32> to vector<1x1x1x32xf32>
    %17 = vector.broadcast %14 : vector<2x15x15x1xf32> to vector<2x15x15x32xf32>
    %18 = vector.broadcast %16 : vector<1x1x1x32xf32> to vector<2x15x15x32xf32>
    %19 = arith.mulf %17, %18 : vector<2x15x15x32xf32>
    %20 = arith.addf %13, %19 : vector<2x15x15x32xf32>
    %21 = vector.extract_strided_slice %0 {offsets = [0, 1, 1, 0], sizes = [2, 15, 15, 1], strides = [1, 1, 1, 1]} : vector<2x16x16x1xf32> to vector<2x15x15x1xf32>
    %c3 = arith.constant 3 : index
    %c0_7 = arith.constant 0 : index
    %22 = vector.load %arg1[%c3, %c0_7] : memref<4x32xf32, #tpu.memory_space<vmem>>, vector<1x32xf32>
    %23 = vector.shape_cast %22 : vector<1x32xf32> to vector<1x1x1x32xf32>
    %24 = vector.broadcast %21 : vector<2x15x15x1xf32> to vector<2x15x15x32xf32>
    %25 = vector.broadcast %23 : vector<1x1x1x32xf32> to vector<2x15x15x32xf32>
    %26 = arith.mulf %24, %25 : vector<2x15x15x32xf32>
    %27 = arith.addf %20, %26 : vector<2x15x15x32xf32>
    %cst = arith.constant dense<0.000000e+00> : vector<15x15x32xf32>
    %28 = vector.multi_reduction <add>, %27, %cst [0] : vector<2x15x15x32xf32> to vector<15x15x32xf32>
    %cst_8 = arith.constant dense<0.000000e+00> : vector<15x32xf32>
    %29 = vector.multi_reduction <add>, %28, %cst_8 [0] : vector<15x15x32xf32> to vector<15x32xf32>
    %cst_9 = arith.constant dense<0.000000e+00> : vector<32xf32>
    %30 = vector.multi_reduction <add>, %29, %cst_9 [0] : vector<15x32xf32> to vector<32xf32>
    %31 = vector.shape_cast %30 : vector<32xf32> to vector<1x32xf32>
    %cst_10 = arith.constant 4.500000e+02 : f32
    %32 = vector.broadcast %cst_10 : f32 to vector<1x32xf32>
    %33 = arith.divf %31, %32 : vector<1x32xf32>
    %34 = arith.mulf %27, %27 : vector<2x15x15x32xf32>
    %cst_11 = arith.constant dense<0.000000e+00> : vector<15x15x32xf32>
    %35 = vector.multi_reduction <add>, %34, %cst_11 [0] : vector<2x15x15x32xf32> to vector<15x15x32xf32>
    %cst_12 = arith.constant dense<0.000000e+00> : vector<15x32xf32>
    %36 = vector.multi_reduction <add>, %35, %cst_12 [0] : vector<15x15x32xf32> to vector<15x32xf32>
    %cst_13 = arith.constant dense<0.000000e+00> : vector<32xf32>
    %37 = vector.multi_reduction <add>, %36, %cst_13 [0] : vector<15x32xf32> to vector<32xf32>
    %38 = vector.shape_cast %37 : vector<32xf32> to vector<1x32xf32>
    %cst_14 = arith.constant 4.500000e+02 : f32
    %39 = vector.broadcast %cst_14 : f32 to vector<1x32xf32>
    %40 = arith.divf %38, %39 : vector<1x32xf32>
    %41 = arith.mulf %33, %33 : vector<1x32xf32>
    %42 = arith.subf %40, %41 : vector<1x32xf32>
    %c0_15 = arith.constant 0 : index
    %c0_16 = arith.constant 0 : index
    %43 = vector.load %arg2[%c0_15, %c0_16] : memref<1x32xf32, #tpu.memory_space<vmem>>, vector<1x32xf32>
    %cst_17 = arith.constant 9.99999974E-6 : f32
    %44 = vector.broadcast %cst_17 : f32 to vector<1x32xf32>
    %45 = arith.addf %42, %44 : vector<1x32xf32>
    %46 = math.rsqrt %45 : vector<1x32xf32>
    %47 = arith.mulf %43, %46 : vector<1x32xf32>
    %c0_18 = arith.constant 0 : index
    %c0_19 = arith.constant 0 : index
    %48 = vector.load %arg3[%c0_18, %c0_19] : memref<1x32xf32, #tpu.memory_space<vmem>>, vector<1x32xf32>
    %49 = arith.mulf %33, %47 : vector<1x32xf32>
    %50 = arith.subf %48, %49 : vector<1x32xf32>
    %51 = vector.shape_cast %47 : vector<1x32xf32> to vector<1x1x1x32xf32>
    %52 = vector.broadcast %51 : vector<1x1x1x32xf32> to vector<2x15x15x32xf32>
    %53 = arith.mulf %27, %52 : vector<2x15x15x32xf32>
    %54 = vector.shape_cast %50 : vector<1x32xf32> to vector<1x1x1x32xf32>
    %55 = vector.broadcast %54 : vector<1x1x1x32xf32> to vector<2x15x15x32xf32>
    %56 = arith.addf %53, %55 : vector<2x15x15x32xf32>
    %cst_20 = arith.constant 0.000000e+00 : f32
    %57 = vector.broadcast %cst_20 : f32 to vector<2x15x15x32xf32>
    %58 = arith.maximumf %56, %57 : vector<2x15x15x32xf32>
    %59 = vector.extract_strided_slice %58 {offsets = [0, 0, 0, 0], sizes = [2, 2, 14, 32], strides = [1, 1, 1, 1]} : vector<2x15x15x32xf32> to vector<2x2x14x32xf32>
    %cst_21 = arith.constant dense<0xFF800000> : vector<2x14x32xf32>
    %60 = vector.multi_reduction <maximumf>, %59, %cst_21 [1] : vector<2x2x14x32xf32> to vector<2x14x32xf32>
    %61 = vector.shape_cast %60 : vector<2x14x32xf32> to vector<2x1x14x32xf32>
    %62 = vector.extract_strided_slice %58 {offsets = [0, 2, 0, 0], sizes = [2, 2, 14, 32], strides = [1, 1, 1, 1]} : vector<2x15x15x32xf32> to vector<2x2x14x32xf32>
    %cst_22 = arith.constant dense<0xFF800000> : vector<2x14x32xf32>
    %63 = vector.multi_reduction <maximumf>, %62, %cst_22 [1] : vector<2x2x14x32xf32> to vector<2x14x32xf32>
    %64 = vector.shape_cast %63 : vector<2x14x32xf32> to vector<2x1x14x32xf32>
    %65 = vector.extract_strided_slice %58 {offsets = [0, 4, 0, 0], sizes = [2, 2, 14, 32], strides = [1, 1, 1, 1]} : vector<2x15x15x32xf32> to vector<2x2x14x32xf32>
    %cst_23 = arith.constant dense<0xFF800000> : vector<2x14x32xf32>
    %66 = vector.multi_reduction <maximumf>, %65, %cst_23 [1] : vector<2x2x14x32xf32> to vector<2x14x32xf32>
    %67 = vector.shape_cast %66 : vector<2x14x32xf32> to vector<2x1x14x32xf32>
    %68 = vector.extract_strided_slice %58 {offsets = [0, 6, 0, 0], sizes = [2, 2, 14, 32], strides = [1, 1, 1, 1]} : vector<2x15x15x32xf32> to vector<2x2x14x32xf32>
    %cst_24 = arith.constant dense<0xFF800000> : vector<2x14x32xf32>
    %69 = vector.multi_reduction <maximumf>, %68, %cst_24 [1] : vector<2x2x14x32xf32> to vector<2x14x32xf32>
    %70 = vector.shape_cast %69 : vector<2x14x32xf32> to vector<2x1x14x32xf32>
    %71 = vector.extract_strided_slice %58 {offsets = [0, 8, 0, 0], sizes = [2, 2, 14, 32], strides = [1, 1, 1, 1]} : vector<2x15x15x32xf32> to vector<2x2x14x32xf32>
    %cst_25 = arith.constant dense<0xFF800000> : vector<2x14x32xf32>
    %72 = vector.multi_reduction <maximumf>, %71, %cst_25 [1] : vector<2x2x14x32xf32> to vector<2x14x32xf32>
    %73 = vector.shape_cast %72 : vector<2x14x32xf32> to vector<2x1x14x32xf32>
    %74 = vector.extract_strided_slice %58 {offsets = [0, 10, 0, 0], sizes = [2, 2, 14, 32], strides = [1, 1, 1, 1]} : vector<2x15x15x32xf32> to vector<2x2x14x32xf32>
    %cst_26 = arith.constant dense<0xFF800000> : vector<2x14x32xf32>
    %75 = vector.multi_reduction <maximumf>, %74, %cst_26 [1] : vector<2x2x14x32xf32> to vector<2x14x32xf32>
    %76 = vector.shape_cast %75 : vector<2x14x32xf32> to vector<2x1x14x32xf32>
    %77 = vector.extract_strided_slice %58 {offsets = [0, 12, 0, 0], sizes = [2, 2, 14, 32], strides = [1, 1, 1, 1]} : vector<2x15x15x32xf32> to vector<2x2x14x32xf32>
    %cst_27 = arith.constant dense<0xFF800000> : vector<2x14x32xf32>
    %78 = vector.multi_reduction <maximumf>, %77, %cst_27 [1] : vector<2x2x14x32xf32> to vector<2x14x32xf32>
    %79 = vector.shape_cast %78 : vector<2x14x32xf32> to vector<2x1x14x32xf32>
    %80 = tpu.concatenate %61, %64, %67, %70, %73, %76, %79 in 1 : vector<2x1x14x32xf32>, vector<2x1x14x32xf32>, vector<2x1x14x32xf32>, vector<2x1x14x32xf32>, vector<2x1x14x32xf32>, vector<2x1x14x32xf32>, vector<2x1x14x32xf32> -> vector<2x7x14x32xf32>
    %81 = vector.extract_strided_slice %80 {offsets = [0, 0, 0, 0], sizes = [2, 7, 2, 32], strides = [1, 1, 1, 1]} : vector<2x7x14x32xf32> to vector<2x7x2x32xf32>
    %cst_28 = arith.constant dense<0xFF800000> : vector<2x7x32xf32>
    %82 = vector.multi_reduction <maximumf>, %81, %cst_28 [2] : vector<2x7x2x32xf32> to vector<2x7x32xf32>
    %83 = vector.shape_cast %82 : vector<2x7x32xf32> to vector<2x7x1x32xf32>
    %84 = vector.extract_strided_slice %80 {offsets = [0, 0, 2, 0], sizes = [2, 7, 2, 32], strides = [1, 1, 1, 1]} : vector<2x7x14x32xf32> to vector<2x7x2x32xf32>
    %cst_29 = arith.constant dense<0xFF800000> : vector<2x7x32xf32>
    %85 = vector.multi_reduction <maximumf>, %84, %cst_29 [2] : vector<2x7x2x32xf32> to vector<2x7x32xf32>
    %86 = vector.shape_cast %85 : vector<2x7x32xf32> to vector<2x7x1x32xf32>
    %87 = vector.extract_strided_slice %80 {offsets = [0, 0, 4, 0], sizes = [2, 7, 2, 32], strides = [1, 1, 1, 1]} : vector<2x7x14x32xf32> to vector<2x7x2x32xf32>
    %cst_30 = arith.constant dense<0xFF800000> : vector<2x7x32xf32>
    %88 = vector.multi_reduction <maximumf>, %87, %cst_30 [2] : vector<2x7x2x32xf32> to vector<2x7x32xf32>
    %89 = vector.shape_cast %88 : vector<2x7x32xf32> to vector<2x7x1x32xf32>
    %90 = vector.extract_strided_slice %80 {offsets = [0, 0, 6, 0], sizes = [2, 7, 2, 32], strides = [1, 1, 1, 1]} : vector<2x7x14x32xf32> to vector<2x7x2x32xf32>
    %cst_31 = arith.constant dense<0xFF800000> : vector<2x7x32xf32>
    %91 = vector.multi_reduction <maximumf>, %90, %cst_31 [2] : vector<2x7x2x32xf32> to vector<2x7x32xf32>
    %92 = vector.shape_cast %91 : vector<2x7x32xf32> to vector<2x7x1x32xf32>
    %93 = vector.extract_strided_slice %80 {offsets = [0, 0, 8, 0], sizes = [2, 7, 2, 32], strides = [1, 1, 1, 1]} : vector<2x7x14x32xf32> to vector<2x7x2x32xf32>
    %cst_32 = arith.constant dense<0xFF800000> : vector<2x7x32xf32>
    %94 = vector.multi_reduction <maximumf>, %93, %cst_32 [2] : vector<2x7x2x32xf32> to vector<2x7x32xf32>
    %95 = vector.shape_cast %94 : vector<2x7x32xf32> to vector<2x7x1x32xf32>
    %96 = vector.extract_strided_slice %80 {offsets = [0, 0, 10, 0], sizes = [2, 7, 2, 32], strides = [1, 1, 1, 1]} : vector<2x7x14x32xf32> to vector<2x7x2x32xf32>
    %cst_33 = arith.constant dense<0xFF800000> : vector<2x7x32xf32>
    %97 = vector.multi_reduction <maximumf>, %96, %cst_33 [2] : vector<2x7x2x32xf32> to vector<2x7x32xf32>
    %98 = vector.shape_cast %97 : vector<2x7x32xf32> to vector<2x7x1x32xf32>
    %99 = vector.extract_strided_slice %80 {offsets = [0, 0, 12, 0], sizes = [2, 7, 2, 32], strides = [1, 1, 1, 1]} : vector<2x7x14x32xf32> to vector<2x7x2x32xf32>
    %cst_34 = arith.constant dense<0xFF800000> : vector<2x7x32xf32>
    %100 = vector.multi_reduction <maximumf>, %99, %cst_34 [2] : vector<2x7x2x32xf32> to vector<2x7x32xf32>
    %101 = vector.shape_cast %100 : vector<2x7x32xf32> to vector<2x7x1x32xf32>
    %102 = tpu.concatenate %83, %86, %89, %92, %95, %98, %101 in 2 : vector<2x7x1x32xf32>, vector<2x7x1x32xf32>, vector<2x7x1x32xf32>, vector<2x7x1x32xf32>, vector<2x7x1x32xf32>, vector<2x7x1x32xf32>, vector<2x7x1x32xf32> -> vector<2x7x7x32xf32>
    %103 = vector.extract_strided_slice %102 {offsets = [0, 0, 0, 0], sizes = [2, 6, 6, 32], strides = [1, 1, 1, 1]} : vector<2x7x7x32xf32> to vector<2x6x6x32xf32>
    %104 = vector.extract_strided_slice %102 {offsets = [0, 0, 1, 0], sizes = [2, 6, 6, 32], strides = [1, 1, 1, 1]} : vector<2x7x7x32xf32> to vector<2x6x6x32xf32>
    %105 = vector.extract_strided_slice %102 {offsets = [0, 1, 0, 0], sizes = [2, 6, 6, 32], strides = [1, 1, 1, 1]} : vector<2x7x7x32xf32> to vector<2x6x6x32xf32>
    %106 = vector.extract_strided_slice %102 {offsets = [0, 1, 1, 0], sizes = [2, 6, 6, 32], strides = [1, 1, 1, 1]} : vector<2x7x7x32xf32> to vector<2x6x6x32xf32>
    %107 = tpu.concatenate %103, %104, %105, %106 in 3 : vector<2x6x6x32xf32>, vector<2x6x6x32xf32>, vector<2x6x6x32xf32>, vector<2x6x6x32xf32> -> vector<2x6x6x128xf32>
    %108 = vector.extract_strided_slice %107 {offsets = [0, 0, 0, 0], sizes = [1, 1, 6, 128], strides = [1, 1, 1, 1]} : vector<2x6x6x128xf32> to vector<1x1x6x128xf32>
    %109 = vector.shape_cast %108 : vector<1x1x6x128xf32> to vector<6x128xf32>
    %110 = vector.extract_strided_slice %107 {offsets = [0, 1, 0, 0], sizes = [1, 1, 6, 128], strides = [1, 1, 1, 1]} : vector<2x6x6x128xf32> to vector<1x1x6x128xf32>
    %111 = vector.shape_cast %110 : vector<1x1x6x128xf32> to vector<6x128xf32>
    %112 = vector.extract_strided_slice %107 {offsets = [0, 2, 0, 0], sizes = [1, 1, 6, 128], strides = [1, 1, 1, 1]} : vector<2x6x6x128xf32> to vector<1x1x6x128xf32>
    %113 = vector.shape_cast %112 : vector<1x1x6x128xf32> to vector<6x128xf32>
    %114 = vector.extract_strided_slice %107 {offsets = [0, 3, 0, 0], sizes = [1, 1, 6, 128], strides = [1, 1, 1, 1]} : vector<2x6x6x128xf32> to vector<1x1x6x128xf32>
    %115 = vector.shape_cast %114 : vector<1x1x6x128xf32> to vector<6x128xf32>
    %116 = vector.extract_strided_slice %107 {offsets = [0, 4, 0, 0], sizes = [1, 1, 6, 128], strides = [1, 1, 1, 1]} : vector<2x6x6x128xf32> to vector<1x1x6x128xf32>
    %117 = vector.shape_cast %116 : vector<1x1x6x128xf32> to vector<6x128xf32>
    %118 = vector.extract_strided_slice %107 {offsets = [0, 5, 0, 0], sizes = [1, 1, 6, 128], strides = [1, 1, 1, 1]} : vector<2x6x6x128xf32> to vector<1x1x6x128xf32>
    %119 = vector.shape_cast %118 : vector<1x1x6x128xf32> to vector<6x128xf32>
    %120 = vector.extract_strided_slice %107 {offsets = [1, 0, 0, 0], sizes = [1, 1, 6, 128], strides = [1, 1, 1, 1]} : vector<2x6x6x128xf32> to vector<1x1x6x128xf32>
    %121 = vector.shape_cast %120 : vector<1x1x6x128xf32> to vector<6x128xf32>
    %122 = vector.extract_strided_slice %107 {offsets = [1, 1, 0, 0], sizes = [1, 1, 6, 128], strides = [1, 1, 1, 1]} : vector<2x6x6x128xf32> to vector<1x1x6x128xf32>
    %123 = vector.shape_cast %122 : vector<1x1x6x128xf32> to vector<6x128xf32>
    %124 = vector.extract_strided_slice %107 {offsets = [1, 2, 0, 0], sizes = [1, 1, 6, 128], strides = [1, 1, 1, 1]} : vector<2x6x6x128xf32> to vector<1x1x6x128xf32>
    %125 = vector.shape_cast %124 : vector<1x1x6x128xf32> to vector<6x128xf32>
    %126 = vector.extract_strided_slice %107 {offsets = [1, 3, 0, 0], sizes = [1, 1, 6, 128], strides = [1, 1, 1, 1]} : vector<2x6x6x128xf32> to vector<1x1x6x128xf32>
    %127 = vector.shape_cast %126 : vector<1x1x6x128xf32> to vector<6x128xf32>
    %128 = vector.extract_strided_slice %107 {offsets = [1, 4, 0, 0], sizes = [1, 1, 6, 128], strides = [1, 1, 1, 1]} : vector<2x6x6x128xf32> to vector<1x1x6x128xf32>
    %129 = vector.shape_cast %128 : vector<1x1x6x128xf32> to vector<6x128xf32>
    %130 = vector.extract_strided_slice %107 {offsets = [1, 5, 0, 0], sizes = [1, 1, 6, 128], strides = [1, 1, 1, 1]} : vector<2x6x6x128xf32> to vector<1x1x6x128xf32>
    %131 = vector.shape_cast %130 : vector<1x1x6x128xf32> to vector<6x128xf32>
    %132 = tpu.concatenate %109, %111, %113, %115, %117, %119, %121, %123, %125, %127, %129, %131 in 0 : vector<6x128xf32>, vector<6x128xf32>, vector<6x128xf32>, vector<6x128xf32>, vector<6x128xf32>, vector<6x128xf32>, vector<6x128xf32>, vector<6x128xf32>, vector<6x128xf32>, vector<6x128xf32>, vector<6x128xf32>, vector<6x128xf32> -> vector<72x128xf32>
    %c0_35 = arith.constant 0 : index
    %c0_36 = arith.constant 0 : index
    %133 = vector.load %arg4[%c0_35, %c0_36] : memref<128x64xf32, #tpu.memory_space<vmem>>, vector<128x64xf32>
    %cst_37 = arith.constant dense<0.000000e+00> : vector<72x64xf32>
    %134 = tpu.matmul %132, %133, %cst_37 {dimension_numbers = #tpu.dot_dimension_numbers<[1], [0], [0], [1], [0, 0, 1, 1], [], []>} : vector<72x128xf32>, vector<128x64xf32>, vector<72x64xf32> -> vector<72x64xf32>
    %cst_38 = arith.constant dense<0.000000e+00> : vector<64xf32>
    %135 = vector.multi_reduction <add>, %134, %cst_38 [0] : vector<72x64xf32> to vector<64xf32>
    %136 = vector.shape_cast %135 : vector<64xf32> to vector<1x64xf32>
    %cst_39 = arith.constant 7.200000e+01 : f32
    %137 = vector.broadcast %cst_39 : f32 to vector<1x64xf32>
    %138 = arith.divf %136, %137 : vector<1x64xf32>
    %139 = arith.mulf %134, %134 : vector<72x64xf32>
    %cst_40 = arith.constant dense<0.000000e+00> : vector<64xf32>
    %140 = vector.multi_reduction <add>, %139, %cst_40 [0] : vector<72x64xf32> to vector<64xf32>
    %141 = vector.shape_cast %140 : vector<64xf32> to vector<1x64xf32>
    %cst_41 = arith.constant 7.200000e+01 : f32
    %142 = vector.broadcast %cst_41 : f32 to vector<1x64xf32>
    %143 = arith.divf %141, %142 : vector<1x64xf32>
    %144 = arith.mulf %138, %138 : vector<1x64xf32>
    %145 = arith.subf %143, %144 : vector<1x64xf32>
    %c0_42 = arith.constant 0 : index
    %c0_43 = arith.constant 0 : index
    %146 = vector.load %arg5[%c0_42, %c0_43] : memref<1x64xf32, #tpu.memory_space<vmem>>, vector<1x64xf32>
    %cst_44 = arith.constant 9.99999974E-6 : f32
    %147 = vector.broadcast %cst_44 : f32 to vector<1x64xf32>
    %148 = arith.addf %145, %147 : vector<1x64xf32>
    %149 = math.rsqrt %148 : vector<1x64xf32>
    %150 = arith.mulf %146, %149 : vector<1x64xf32>
    %c0_45 = arith.constant 0 : index
    %c0_46 = arith.constant 0 : index
    %151 = vector.load %arg6[%c0_45, %c0_46] : memref<1x64xf32, #tpu.memory_space<vmem>>, vector<1x64xf32>
    %152 = arith.mulf %138, %150 : vector<1x64xf32>
    %153 = arith.subf %151, %152 : vector<1x64xf32>
    %154 = vector.broadcast %150 : vector<1x64xf32> to vector<72x64xf32>
    %155 = arith.mulf %134, %154 : vector<72x64xf32>
    %156 = vector.broadcast %153 : vector<1x64xf32> to vector<72x64xf32>
    %157 = arith.addf %155, %156 : vector<72x64xf32>
    %cst_47 = arith.constant 0.000000e+00 : f32
    %158 = vector.broadcast %cst_47 : f32 to vector<72x64xf32>
    %159 = arith.maximumf %157, %158 : vector<72x64xf32>
    %160 = vector.extract_strided_slice %159 {offsets = [0, 0], sizes = [36, 64], strides = [1, 1]} : vector<72x64xf32> to vector<36x64xf32>
    %cst_48 = arith.constant dense<0xFF800000> : vector<64xf32>
    %161 = vector.multi_reduction <maximumf>, %160, %cst_48 [0] : vector<36x64xf32> to vector<64xf32>
    %162 = vector.shape_cast %161 : vector<64xf32> to vector<1x64xf32>
    %163 = vector.extract_strided_slice %159 {offsets = [36, 0], sizes = [36, 64], strides = [1, 1]} : vector<72x64xf32> to vector<36x64xf32>
    %cst_49 = arith.constant dense<0xFF800000> : vector<64xf32>
    %164 = vector.multi_reduction <maximumf>, %163, %cst_49 [0] : vector<36x64xf32> to vector<64xf32>
    %165 = vector.shape_cast %164 : vector<64xf32> to vector<1x64xf32>
    %166 = tpu.concatenate %162, %165 in 0 : vector<1x64xf32>, vector<1x64xf32> -> vector<2x64xf32>
    %c0_50 = arith.constant 0 : index
    %c0_51 = arith.constant 0 : index
    %167 = vector.load %arg7[%c0_50, %c0_51] : memref<64x10xf32, #tpu.memory_space<vmem>>, vector<64x10xf32>
    %cst_52 = arith.constant dense<0.000000e+00> : vector<2x10xf32>
    %168 = tpu.matmul %166, %167, %cst_52 {dimension_numbers = #tpu.dot_dimension_numbers<[1], [0], [0], [1], [0, 0, 1, 1], [], []>} : vector<2x64xf32>, vector<64x10xf32>, vector<2x10xf32> -> vector<2x10xf32>
    %c0_53 = arith.constant 0 : index
    %c0_54 = arith.constant 0 : index
    %169 = vector.load %arg8[%c0_53, %c0_54] : memref<1x10xf32, #tpu.memory_space<vmem>>, vector<1x10xf32>
    %170 = vector.broadcast %169 : vector<1x10xf32> to vector<2x10xf32>
    %171 = arith.addf %168, %170 : vector<2x10xf32>
    %c0_55 = arith.constant 0 : index
    %c0_56 = arith.constant 0 : index
    %172 = vector.load %arg9[%c0_55, %c0_56] : memref<2x10xf32, #tpu.memory_space<vmem>>, vector<2x10xf32>
    tpu.vector_store %arg9[%c0_55, %c0_56], %171 {strides = array<i32>} : memref<2x10xf32, #tpu.memory_space<vmem>>, vector<2x10xf32>,
    return
  }
}

</mosaic_0001>

<bundles_post_ra>
// kernel: net_forward_pallas.1
= control target key start
LH: loop header
LB: loop body
LE: loop exit
PB: predicated region body
PF: predicated region fallthrough
CT: control target
= control target key end

     0   :  { %v3371_v3 = vmov 0   ;;  %s6123_s0 = inlined_call_operand.vmem [shape: f32[2,16,16,1], index: 0, kind: input, shape index: {}]   ;;  %s6124_s1 = inlined_call_operand.vmem [shape: f32[4,32], index: 1, kind: input, shape index: {}]   ;;  %s6125_s2 = inlined_call_operand.vmem [shape: f32[1,32], index: 2, kind: input, shape index: {}]   ;;  %s6126_s3 = inlined_call_operand.vmem [shape: f32[1,32], index: 3, kind: input, shape index: {}]   ;;  %s6127_s4 = inlined_call_operand.vmem [shape: f32[128,64], index: 4, kind: input, shape index: {}]   ;;  %s6128_s5 = inlined_call_operand.vmem [shape: f32[1,64], index: 5, kind: input, shape index: {}]   ;;  %s6129_s6 = inlined_call_operand.vmem [shape: f32[1,64], index: 6, kind: input, shape index: {}]   ;;  %s6130_s7 = inlined_call_operand.vmem [shape: f32[64,10], index: 7, kind: input, shape index: {}]   ;;  %s6131_s8 = inlined_call_operand.vmem [shape: f32[1,10], index: 8, kind: input, shape index: {}]   ;;  %s6132_s9 = inlined_call_operand.hbm [shape: f32[2,10], index: 9, kind: output, shape index: {}]  }
   0x1   :  { %v65_v0 = vld [vmem:[%s6123_s0 + $0x100] sm:$0xff]  ;;  %v35_v1 = vld [vmem:[%s6123_s0 + $0x10] sm:$0xff]  ;;  %3237 = vset.pattern.permute.xlu2 %v3371_v3  ;;  %3236 = vset.pattern.permute.xlu1 %v3371_v3  ;;  %v66_v4 = vld [vmem:[%s6123_s0 + $0x108] sm:$0xff] }
   0x2   :  { %v33_v2 = vld [vmem:[%s6123_s0] sm:$0xff]  ;;  %3235 = vset.pattern.permute.xlu0 %v3371_v3  ;;  %250 = vperm.xlu2 %3237, %v65_v0  }
   0x3   :  { %110 = vperm.xlu1 %3236, %v35_v1   ;;  %100 = vperm.xlu0 %3235, %v33_v2  }
   0x4   :  { %14 = vsyncpa [#allocation3], 0  ;;  %v36_v5 = vld [vmem:[%s6123_s0 + $0x18] sm:$0xff]  ;;  %v34_v6 = vld [vmem:[%s6123_s0 + $0x8] sm:$0xff]  ;;  %vm581_vm0 = vcmask 1046528   ;;  %vm1270_vm1 = vcmask 260096  }
   0x5   :  { %v37_v7 = vld [vmem:[%s6123_s0 + $0x20] sm:$0xff]  ;;  %v68_v8 = vld [vmem:[%s6123_s0 + $0x118] sm:$0xff]  ;;  %v67_v9 = vld [vmem:[%s6123_s0 + $0x110] sm:$0xff]  ;;  %vm1266_vm2 = vcmask 261120   ;;  %vm1846_vm7 = vcmask 259072   ;;  %vm1928_vm8 = vcmask 254976  }
   0x6   :  { %v70_v10 = vld [vmem:[%s6123_s0 + $0x128] sm:$0xff]  ;;  %v69_v11 = vld [vmem:[%s6123_s0 + $0x120] sm:$0xff]  ;;  %v71_v13 = vld [vmem:[%s6123_s0 + $0x130] sm:$0xff]  ;;  %vm2027_vm9 = vcmask 257026   ;;  %vm2126_vm10 = vcmask 259076   ;;  %vm2225_vm11 = vcmask 261126  }
   0x7   :  { %v38_v12 = vld [vmem:[%s6123_s0 + $0x28] sm:$0xff]  ;;  %v40_v14 = vld [vmem:[%s6123_s0 + $0x38] sm:$0xff]  ;;  %v39_v15 = vld [vmem:[%s6123_s0 + $0x30] sm:$0xff]  ;;  %vm2618_vm12 = vcmask 1040384   ;;  %vm2633_vm13 = vcmask 1041408   ;;  %vm2648_vm14 = vcmask 1042432  }
   0x8   :  { %v42_v16 = vld [vmem:[%s6123_s0 + $0x48] sm:$0xff]  ;;  %v41_v17 = vld [vmem:[%s6123_s0 + $0x40] sm:$0xff]  ;;  %v72_v18 = vld [vmem:[%s6123_s0 + $0x138] sm:$0xff]  ;;  %vm2663_vm15 = vcmask 1043456   ;;  %s3375_s29 = smov 96   ;;  %s3377_s30 = smov [#allocation2]  }
   0x9   :  { %v43_v19 = vld [vmem:[%s6123_s0 + $0x50] sm:$0xff]  ;;  %v74_v20 = vld [vmem:[%s6123_s0 + $0x148] sm:$0xff]  ;;  %v73_v21 = vld [vmem:[%s6123_s0 + $0x140] sm:$0xff]  ;;  %s3168_s10 = sshll.u32 %s3377_s30, 4  ;;  %s3170_s13 = sshll.u32 %s6132_s9, 4  ;;  %s3169_s10 = int_to_ptr.vmem [resolvable:$true] %s3168_s10  ;;  %s3171_s13 = int_to_ptr.hbm [resolvable:$true] %s3170_s13 }
   0xa   :  { %255 = vperm.xlu2 %3237, %v66_v4   ;;  %v76_v22 = vld [vmem:[%s6123_s0 + $0x158] sm:$0xff]  ;;  %v75_v23 = vld [vmem:[%s6123_s0 + $0x150] sm:$0xff]  ;;  %v77_v25 = vld [vmem:[%s6123_s0 + $0x160] sm:$0xff] }
   0xb   :  { %115 = vperm.xlu1 %3236, %v36_v5   ;;  %105 = vperm.xlu0 %3235, %v34_v6   ;;  %v44_v24 = vld [vmem:[%s6123_s0 + $0x58] sm:$0xff]  ;;  %v46_v26 = vld [vmem:[%s6123_s0 + $0x68] sm:$0xff]  ;;  %v45_v27 = vld [vmem:[%s6123_s0 + $0x60] sm:$0xff] }
   0xc   :  { %v48_v28 = vld [vmem:[%s6123_s0 + $0x78] sm:$0xff]  ;;  %v47_v29 = vld [vmem:[%s6123_s0 + $0x70] sm:$0xff]  ;;  %v78_v30 = vld [vmem:[%s6123_s0 + $0x168] sm:$0xff] }
   0xd   :  { %v49_v31 = vld [vmem:[%s6123_s0 + $0x80] sm:$0xff]  ;;  %v80_v32 = vld [vmem:[%s6123_s0 + $0x178] sm:$0xff]  ;;  %v79_v33 = vld [vmem:[%s6123_s0 + $0x170] sm:$0xff] }
   0xe   :  { %v82_v34 = vld [vmem:[%s6123_s0 + $0x188] sm:$0xff]  ;;  %v81_v35 = vld [vmem:[%s6123_s0 + $0x180] sm:$0xff]  ;;  %v83_v39 = vld [vmem:[%s6123_s0 + $0x190] sm:$0xff] }
   0xf   :  { %v50_v36 = vld [vmem:[%s6123_s0 + $0x88] sm:$0xff]  ;;  %v3539_v38 = vld [vmem:[%s6124_s1 + $0x1] ss:$0 sm:$0xff]  ;;  %v52_v40 = vld [vmem:[%s6123_s0 + $0x98] sm:$0xff] }
  0x10   :  { %v51_v41 = vld [vmem:[%s6123_s0 + $0x90] sm:$0xff]  ;;  %v3554_v43 = vld [vmem:[%s6124_s1] ss:$0 sm:$0xff]  ;;  %v54_v49 = vld [vmem:[%s6123_s0 + $0xa8] sm:$0xff] }
  0x11   :  { %v53_v50 = vld [vmem:[%s6123_s0 + $0xa0] sm:$0xff]  ;;  %v84_v51 = vld [vmem:[%s6123_s0 + $0x198] sm:$0xff]  ;;  %v55_v55 = vld [vmem:[%s6123_s0 + $0xb0] sm:$0xff] }
  0x12   :  { %120 = vperm.xlu2 %3237, %v37_v7   ;;  %v86_v56 = vld [vmem:[%s6123_s0 + $0x1a8] sm:$0xff]  ;;  %v85_v57 = vld [vmem:[%s6123_s0 + $0x1a0] sm:$0xff]  ;;  %v88_v62 = vld [vmem:[%s6123_s0 + $0x1b8] sm:$0xff] }
  0x13   :  { %265 = vperm.xlu1 %3236, %v68_v8   ;;  %260 = vperm.xlu0 %3235, %v67_v9   ;;  %v3587_v60 = vld [vmem:[%s6124_s1 + $0x3] ss:$0 sm:$0xff]  ;;  %v87_v63 = vld [vmem:[%s6123_s0 + $0x1b0] sm:$0xff]  ;;  %v56_v0 = vld [vmem:[%s6123_s0 + $0xb8] sm:$0xff] }
  0x14   :  { %v3608_v6 = vld [vmem:[%s6124_s1 + $0x2] ss:$0 sm:$0xff] }
  0x1a   :  { %275 = vperm.xlu2 %3237, %v70_v10  }
  0x1b   :  { %270 = vperm.xlu1 %3236, %v69_v11   ;;  %125 = vperm.xlu0 %3235, %v38_v12   ;;  %v89_v12 = vld [vmem:[%s6123_s0 + $0x1c0] sm:$0xff] }
  0x22   :  { %280 = vperm.xlu2 %3237, %v71_v13  }
  0x23   :  { %135 = vperm.xlu1 %3236, %v40_v14   ;;  %130 = vperm.xlu0 %3235, %v39_v15  }
  0x2a   :  { %145 = vperm.xlu2 %3237, %v42_v16  }
  0x2b   :  { %140 = vperm.xlu1 %3236, %v41_v17   ;;  %285 = vperm.xlu0 %3235, %v72_v18   ;;  %v58_v17 = vld [vmem:[%s6123_s0 + $0xc8] sm:$0xff]  ;;  %v57_v18 = vld [vmem:[%s6123_s0 + $0xc0] sm:$0xff] }
  0x32   :  { %150 = vperm.xlu2 %3237, %v43_v19  }
  0x33   :  { %295 = vperm.xlu1 %3236, %v74_v20   ;;  %290 = vperm.xlu0 %3235, %v73_v21  }
  0x3a   :  { %305 = vperm.xlu2 %3237, %v76_v22  }
  0x3b   :  { %300 = vperm.xlu1 %3236, %v75_v23   ;;  %155 = vperm.xlu0 %3235, %v44_v24  }
  0x42   :  { %310 = vperm.xlu2 %3237, %v77_v25  }
  0x43   :  { %165 = vperm.xlu1 %3236, %v46_v26   ;;  %160 = vperm.xlu0 %3235, %v45_v27  }
  0x4a   :  { %175 = vperm.xlu2 %3237, %v48_v28  }
  0x4b   :  { %170 = vperm.xlu1 %3236, %v47_v29   ;;  %315 = vperm.xlu0 %3235, %v78_v30  }
  0x52   :  { %180 = vperm.xlu2 %3237, %v49_v31  }
  0x53   :  { %325 = vperm.xlu1 %3236, %v80_v32   ;;  %320 = vperm.xlu0 %3235, %v79_v33  }
  0x5a   :  { %335 = vperm.xlu2 %3237, %v82_v34  }
  0x5b   :  { %330 = vperm.xlu1 %3236, %v81_v35   ;;  %185 = vperm.xlu0 %3235, %v50_v36  }
  0x5c   :  { %v251_v37 = vpop.permute.xlu2 %250 }
  0x5d   :  { %v491_v42 = vmul.f32 %v3539_v38, %v251_v37  ;;  %v429_v47 = vmul.f32 %v3554_v43, %v251_v37 }
  0x5f   :  { %v627_v45 = vrot.slane %v491_v42, 1 }
  0x62   :  { %340 = vperm.xlu2 %3237, %v83_v39  }
  0x63   :  { %195 = vperm.xlu1 %3236, %v52_v40   ;;  %190 = vperm.xlu0 %3235, %v51_v41  }
  0x64   :  { %v256_v44 = vpop.permute.xlu2 %255 }
  0x65   :  { %v3557_v46 = vmul.f32 %v3539_v38, %v256_v44  ;;  %v430_v13 = vmul.f32 %v3554_v43, %v256_v44 }
  0x67   :  { %v628_v48 = vrot.slane %v3557_v46, 1 }
  0x69   :  { %v629_v52 = vsel %vm581_vm0, %v627_v45, %v628_v48  ;;  %v763_v32 = vadd.f32 %v628_v48, %v430_v13  ;;  %v60_v45 = vld [vmem:[%s6123_s0 + $0xd8] sm:$0xff] }
  0x6a   :  { %v3571_v53 = vadd.f32 %v629_v52, %v429_v47  ;;  %205 = vperm.xlu2 %3237, %v54_v49   ;;  %v90_v52 = vld [vmem:[%s6123_s0 + $0x1c8] sm:$0xff] }
  0x6b   :  { %200 = vperm.xlu1 %3236, %v53_v50   ;;  %345 = vperm.xlu0 %3235, %v84_v51   ;;  %v59_v51 = vld [vmem:[%s6123_s0 + $0xd0] sm:$0xff] }
  0x6c   :  { %v3573_v54 = vpop.permute.xlu2 %120 }
  0x6d   :  { %v3643_v35 = vmul.f32 %v3554_v43, %v3573_v54  ;;  %v3663_v46 = vmul.f32 %v3539_v38, %v3573_v54 }
  0x72   :  { %210 = vperm.xlu2 %3237, %v55_v55   ;;  %v816_v55 = vmul.f32 %v3608_v6, %v3573_v54 }
  0x73   :  { %355 = vperm.xlu1 %3236, %v86_v56   ;;  %350 = vperm.xlu0 %3235, %v85_v57   ;;  %v3678_v56 = vmul.f32 %v3587_v60, %v3573_v54 }
  0x74   :  { %v3589_v61 = vpop.permute.xlu2 %275 }
  0x75   :  { %v111_v58 = vpop.permute.xlu1 %110  ;;  %v101_v59 = vpop.permute.xlu0 %100  ;;  %v3647_v36 = vmul.f32 %v3539_v38, %v3589_v61  ;;  %v3652_v40 = vmul.f32 %v3587_v60, %v3589_v61  ;;  %v434_v57 = vmul.f32 %v3554_v43, %v3589_v61 }
  0x76   :  { %v463_v1 = vmul.f32 %v3539_v38, %v111_v58  ;;  %v936_v2 = vmul.f32 %v3587_v60, %v111_v58  ;;  %v461_v3 = vmul.f32 %v3539_v38, %v101_v59  ;;  %v401_v19 = vmul.f32 %v3554_v43, %v111_v58 }
  0x77   :  { %v399_v23 = vmul.f32 %v3554_v43, %v101_v59  ;;  %v814_v30 = vmul.f32 %v3608_v6, %v111_v58  ;;  %v634_v59 = vrot.slane %v3647_v36, 1 }
  0x78   :  { %v585_v7 = vrot.slane %v463_v1, 1  ;;  %v1056_v8 = vrot.slane %v936_v2, 1  ;;  %v582_v20 = vrot.slane %v461_v3, 1  ;;  %v1105_v2 = vrot.slane %v3652_v40, 1 }
  0x7a   :  { %365 = vperm.xlu2 %3237, %v88_v62   ;;  %v847_v62 = vmul.f32 %v3608_v6, %v3589_v61 }
  0x7b   :  { %360 = vperm.xlu1 %3236, %v87_v63   ;;  %215 = vperm.xlu0 %3235, %v56_v0  }
  0x7c   :  { %v3621_v14 = vpop.permute.xlu2 %280 }
  0x7d   :  { %v3603_v4 = vpop.permute.xlu1 %115  ;;  %v106_v5 = vpop.permute.xlu0 %105 }
  0x7e   :  { %v3612_v9 = vmul.f32 %v3539_v38, %v3603_v4  ;;  %v937_v10 = vmul.f32 %v3587_v60, %v3603_v4  ;;  %v462_v11 = vmul.f32 %v3539_v38, %v106_v5  ;;  %v400_v21 = vmul.f32 %v3554_v43, %v106_v5 }
  0x7f   :  { %v815_v25 = vmul.f32 %v3608_v6, %v3603_v4 }
  0x80   :  { %v586_v15 = vrot.slane %v3612_v9, 1  ;;  %v1057_v16 = vrot.slane %v937_v10, 1  ;;  %v583_v22 = vrot.slane %v462_v11, 1 }
  0x82   :  { %v587_v24 = vsel %vm581_vm0, %v585_v7, %v586_v15  ;;  %v1058_v26 = vsel %vm581_vm0, %v1056_v8, %v1057_v16  ;;  %370 = vperm.xlu2 %3237, %v89_v12   ;;  %v584_v28 = vsel %vm581_vm0, %v582_v20, %v583_v22  ;;  %v733_v29 = vadd.f32 %v583_v22, %v400_v21 }
  0x83   :  { %v734_v27 = vadd.f32 %v587_v24, %v401_v19  ;;  %225 = vperm.xlu1 %3236, %v58_v17   ;;  %220 = vperm.xlu0 %3235, %v57_v18   ;;  %v732_v31 = vadd.f32 %v584_v28, %v399_v23  ;;  %v3691_v7 = vmul.f32 %v3539_v38, %v3621_v14  ;;  %v588_v17 = vrot.slane %v3663_v46, 1 }
  0x84   :  { %v875_v33 = vadd.f32 %v815_v25, %v733_v29  ;;  %v146_v63 = vpop.permute.xlu2 %145  ;;  %v3704_v18 = vmul.f32 %v3587_v60, %v3621_v14  ;;  %v1059_v21 = vrot.slane %v3678_v56, 1  ;;  %v61_v25 = vld [vmem:[%s6123_s0 + $0xe0] sm:$0xff] }
  0x85   :  { %v266_v34 = vpop.permute.xlu1 %265  ;;  %v874_v37 = vadd.f32 %v814_v30, %v732_v31  ;;  %v261_v50 = vpop.permute.xlu0 %260  ;;  %v3695_v10 = vadd.f32 %v816_v55, %v734_v27  ;;  %v3698_v11 = vmul.f32 %v3539_v38, %v146_v63  ;;  %v3713_v22 = vmul.f32 %v3587_v60, %v146_v63  ;;  %v92_v30 = vld [vmem:[%s6123_s0 + $0x1d8] sm:$0xff]  ;;  %v91_v31 = vld [vmem:[%s6123_s0 + $0x1d0] sm:$0xff] }
  0x86   :  { %v494_v39 = vmul.f32 %v3539_v38, %v266_v34  ;;  %v3654_v41 = vadd.f32 %v1057_v16, %v875_v33  ;;  %v845_v42 = vmul.f32 %v3608_v6, %v266_v34  ;;  %v967_v44 = vmul.f32 %v3587_v60, %v266_v34 }
  0x87   :  { %v3665_v47 = vadd.f32 %v1058_v26, %v874_v37  ;;  %v432_v48 = vmul.f32 %v3554_v43, %v266_v34  ;;  %v493_v3 = vmul.f32 %v3539_v38, %v261_v50  ;;  %v844_v54 = vmul.f32 %v3608_v6, %v261_v50 }
  0x88   :  { %v631_v49 = vrot.slane %v494_v39, 1  ;;  %v905_v58 = vadd.f32 %v845_v42, %v763_v32  ;;  %v1102_v1 = vrot.slane %v967_v44, 1  ;;  %v966_v5 = vmul.f32 %v3587_v60, %v261_v50 }
  0x89   :  { %v630_v12 = vrot.slane %v493_v3, 1  ;;  %v904_v13 = vadd.f32 %v844_v54, %v3571_v53  ;;  %v431_v20 = vmul.f32 %v3554_v43, %v261_v50  ;;  %v3722_v26 = vadd.f32 %v634_v59, %v434_v57 }
  0x8a   :  { %v765_v0 = vadd.f32 %v631_v49, %v432_v48  ;;  %235 = vperm.xlu2 %3237, %v60_v45   ;;  %v3693_v8 = vadd.f32 %v1102_v1, %v905_v58  ;;  %v1101_v16 = vrot.slane %v966_v5, 1  ;;  %v402_v27 = vmul.f32 %v3554_v43, %v3603_v4 }
  0x8b   :  { %230 = vperm.xlu1 %3236, %v59_v51   ;;  %375 = vperm.xlu0 %3235, %v90_v52   ;;  %v632_v53 = vsel %vm581_vm0, %v630_v12, %v631_v49  ;;  %v3736_v32 = vmul.f32 %v3554_v43, %v3621_v14  ;;  %v848_v4 = vmul.f32 %v3608_v6, %v3621_v14  ;;  %v595_v34 = vrot.slane %v3698_v11, 1 }
  0x8c   :  { %v907_v61 = vadd.f32 %v847_v62, %v765_v0  ;;  %6198 = vst [vmem:[#allocation5_spill] sm:$0xff] %v3693_v8  ;;  %v1103_v23 = vsel %vm581_vm0, %v1101_v16, %v1102_v1  ;;  %v764_v28 = vadd.f32 %v632_v53, %v431_v20  ;;  %v735_v39 = vadd.f32 %v586_v15, %v402_v27  ;;  %v151_v58 = vpop.permute.xlu2 %150  ;;  %v94_v16 = vld [vmem:[%s6123_s0 + $0x1e8] sm:$0xff] }
  0x8d   :  { %v271_v24 = vpop.permute.xlu1 %270  ;;  %v3726_v29 = vadd.f32 %v1103_v23, %v904_v13  ;;  %v408_v42 = vmul.f32 %v3554_v43, %v146_v63  ;;  %v1271_v45 = vsel %vm1270_vm1, %v3654_v41, 0.0  ;;  %v3750_v48 = vmul.f32 %v3608_v6, %v146_v63  ;;  %v126_v50 = vpop.permute.xlu0 %125  ;;  %v93_v23 = vld [vmem:[%s6123_s0 + $0x1e0] sm:$0xff] }
  0x8e   :  { %v3708_v19 = vadd.f32 %v1105_v2, %v907_v61  ;;  %v495_v44 = vmul.f32 %v3539_v38, %v271_v24  ;;  %v1066_v14 = vrot.slane %v3713_v22, 1  ;;  %v846_v49 = vmul.f32 %v3608_v6, %v271_v24 }
  0x8f   :  { %6200 = vst [vmem:[#allocation7_spill] sm:$0xff] %v3726_v29  ;;  %v1434_v9 = vmul.f32 %v3654_v41, %v3654_v41  ;;  %v1464_v15 = vmul.f32 %v3693_v8, %v3693_v8  ;;  %v968_v52 = vmul.f32 %v3587_v60, %v271_v24  ;;  %v1433_v55 = vmul.f32 %v3665_v47, %v3665_v47 }
  0x90   :  { %6199 = vst [vmem:[#allocation6_spill] sm:$0xff] %v3708_v19  ;;  %v633_v51 = vrot.slane %v495_v44, 1  ;;  %v3763_v57 = vadd.f32 %v595_v34, %v408_v42  ;;  %v433_v62 = vmul.f32 %v3554_v43, %v271_v24  ;;  %v906_v63 = vadd.f32 %v846_v49, %v764_v28  ;;  %v62_v24 = vld [vmem:[%s6123_s0 + $0xe8] sm:$0xff] }
  0x91   :  { %v1267_v0 = vsel %vm1266_vm2, %v3665_v47, 0.0  ;;  %v1104_v3 = vrot.slane %v968_v52, 1  ;;  %v466_v54 = vmul.f32 %v3539_v38, %v126_v50  ;;  %v1272_v5 = vsel %vm1270_vm1, %v3693_v8, 0.0 }
  0x92   :  { %240 = vperm.xlu2 %3237, %v61_v25   ;;  %v635_v1 = vsel %vm581_vm0, %v633_v51, %v634_v59  ;;  %v817_v12 = vmul.f32 %v3608_v6, %v126_v50  ;;  %v939_v13 = vmul.f32 %v3587_v60, %v126_v50  ;;  %v1496_v20 = vsel %vm1270_vm1, %v1434_v9, 0.0 }
  0x93   :  { %385 = vperm.xlu1 %3236, %v92_v30   ;;  %380 = vperm.xlu0 %3235, %v91_v31   ;;  %v766_v61 = vadd.f32 %v635_v1, %v433_v62  ;;  %v1497_v36 = vsel %vm1270_vm1, %v1464_v15, 0.0  ;;  %v1463_v59 = vmul.f32 %v3726_v29, %v3726_v29  ;;  %v1106_v53 = vsel %vm581_vm0, %v1104_v3, %v1105_v2 }
  0x94   :  { %v3794_v27 = vadd.f32 %v1106_v53, %v906_v63  ;;  %v877_v28 = vadd.f32 %v817_v12, %v735_v39  ;;  %v1060_v30 = vrot.slane %v939_v13, 1  ;;  %v1273_v31 = vadd.f32 %v1272_v5, %v1271_v45  ;;  %v306_v5 = vpop.permute.xlu2 %305  ;;  %v95_v13 = vld [vmem:[%s6123_s0 + $0x1f0] sm:$0xff] }
  0x95   :  { %v3792_v25 = vadd.f32 %v848_v4, %v766_v61  ;;  %v1268_v40 = vsel %vm1266_vm2, %v3726_v29, 0.0  ;;  %v3799_v2 = vmul.f32 %v3539_v38, %v151_v58  ;;  %v589_v42 = vrot.slane %v466_v54, 1  ;;  %v136_v44 = vpop.permute.xlu1 %135  ;;  %v63_v53 = vld [vmem:[%s6123_s0 + $0xf0] sm:$0xff] }
  0x96   :  { %6201 = vst [vmem:[#allocation8_spill] sm:$0xff] %v3794_v27  ;;  %v1498_v49 = vadd.f32 %v1497_v36, %v1496_v20  ;;  %v1493_v9 = vsel %vm1266_vm2, %v1433_v55, 0.0  ;;  %v1061_v4 = vsel %vm581_vm0, %v1059_v21, %v1060_v30  ;;  %v3805_v15 = vadd.f32 %v1060_v30, %v877_v28 }
  0x97   :  { %v1494_v39 = vsel %vm1266_vm2, %v1463_v59, 0.0  ;;  %v3809_v45 = vmul.f32 %v3587_v60, %v151_v58  ;;  %v404_v51 = vmul.f32 %v3554_v43, %v126_v50  ;;  %v3813_v52 = vadd.f32 %v1061_v4, %v3695_v10  ;;  %v131_v10 = vpop.permute.xlu0 %130  ;;  %v64_v59 = vld [vmem:[%s6123_s0 + $0xf8] sm:$0xff] }
  0x98   :  { %v1466_v55 = vmul.f32 %v3708_v19, %v3708_v19  ;;  %v1269_v56 = vadd.f32 %v1268_v40, %v1267_v0  ;;  %v3818_v21 = vmul.f32 %v3554_v43, %v151_v58  ;;  %v468_v62 = vmul.f32 %v3539_v38, %v136_v44 }
  0x99   :  { %v3822_v63 = vsel %vm1270_vm1, %v1273_v31, 0.0  ;;  %v3825_v1 = vmul.f32 %v3608_v6, %v151_v58  ;;  %v737_v3 = vadd.f32 %v589_v42, %v404_v51  ;;  %v819_v50 = vmul.f32 %v3608_v6, %v136_v44 }
  0x9a   :  { %395 = vperm.xlu2 %3237, %v94_v16   ;;  %v1495_v54 = vadd.f32 %v1494_v39, %v1493_v9  ;;  %v406_v61 = vmul.f32 %v3554_v43, %v136_v44  ;;  %v592_v0 = vrot.slane %v468_v62, 1  ;;  %v941_v12 = vmul.f32 %v3587_v60, %v136_v44 }
  0x9b   :  { %390 = vperm.xlu1 %3236, %v93_v23   ;;  %245 = vperm.xlu0 %3235, %v62_v24   ;;  %v3834_v16 = vsel %vm1270_vm1, %v1498_v49, 0.0  ;;  %v879_v36 = vadd.f32 %v819_v50, %v737_v3  ;;  %v3845_v23 = vsel %vm1266_vm2, %v1269_v56, 0.0  ;;  %v1278_v24 = vsel %vm1270_vm1, %v3708_v19, 0.0 }
  0x9c   :  { %v1503_v28 = vsel %vm1270_vm1, %v1466_v55, 0.0  ;;  %v739_v30 = vadd.f32 %v592_v0, %v406_v61  ;;  %v440_v31 = vmul.f32 %v3554_v43, %v306_v5  ;;  %v3852_v40 = vmul.f32 %v3539_v38, %v306_v5 }
  0x9d   :  { %v1063_v44 = vrot.slane %v941_v12, 1  ;;  %v590_v49 = vsel %vm581_vm0, %v588_v17, %v589_v42  ;;  %v3858_v9 = vsel %vm1266_vm2, %v1495_v54, 0.0  ;;  %v1465_v4 = vmul.f32 %v3794_v27, %v3794_v27  ;;  %v141_v12 = vpop.permute.xlu1 %140 }
  0x9e   :  { %v881_v39 = vadd.f32 %v3750_v48, %v739_v30  ;;  %v736_v51 = vadd.f32 %v590_v49, %v3643_v35  ;;  %v1277_v55 = vsel %vm1270_vm1, %v3805_v15, 0.0  ;;  %v1436_v46 = vmul.f32 %v3805_v15, %v3805_v15 }
  0x9f   :  { %v3868_v17 = vadd.f32 %v1063_v44, %v879_v36  ;;  %v467_v42 = vmul.f32 %v3539_v38, %v131_v10  ;;  %v1435_v56 = vmul.f32 %v3813_v52, %v3813_v52  ;;  %v818_v35 = vmul.f32 %v3608_v6, %v131_v10  ;;  %v286_v20 = vpop.permute.xlu0 %285 }
  0xa0   :  { %v3875_v48 = vadd.f32 %v1066_v14, %v881_v39  ;;  %v940_v62 = vmul.f32 %v3587_v60, %v131_v10  ;;  %v1275_v3 = vsel %vm1266_vm2, %v3794_v27, 0.0  ;;  %v6133_v50 = vrot.slane %v3852_v40, 1 }
  0xa1   :  { %6202 = vst [vmem:[#allocation9_spill] sm:$0xff] %v3868_v17  ;;  %v3883_v54 = vmul.f32 %v3608_v6, %v306_v5  ;;  %v591_v61 = vrot.slane %v467_v42, 1  ;;  %v405_v36 = vmul.f32 %v3554_v43, %v131_v10  ;;  %v1274_v30 = vsel %vm1266_vm2, %v3813_v52, 0.0  ;;  %v96_v42 = vld [vmem:[%s6123_s0 + $0x1f8] sm:$0xff] }
  0xa2   :  { %805 = vperm.xlu2 %3237, %v95_v13   ;;  %6203 = vst [vmem:[#allocation10_spill] sm:$0xff] %v3875_v48  ;;  %v1500_v13 = vsel %vm1266_vm2, %v1465_v4, 0.0  ;;  %v1279_v49 = vadd.f32 %v1278_v24, %v1277_v55  ;;  %v1502_v39 = vsel %vm1270_vm1, %v1436_v46, 0.0  ;;  %v1499_v33 = vsel %vm1266_vm2, %v1435_v56, 0.0  ;;  %v311_v55 = vpop.permute.xlu2 %310 }
  0xa3   :  { %800 = vperm.xlu1 %3236, %v64_v59   ;;  %795 = vperm.xlu0 %3235, %v63_v53   ;;  %v878_v59 = vadd.f32 %v818_v35, %v736_v51  ;;  %v1062_v53 = vrot.slane %v940_v62, 1  ;;  %v593_v58 = vsel %vm581_vm0, %v591_v61, %v592_v0  ;;  %v469_v51 = vmul.f32 %v3539_v38, %v141_v12 }
  0xa4   :  { %v738_v4 = vadd.f32 %v593_v58, %v405_v36  ;;  %v3898_v35 = vmul.f32 %v3587_v60, %v306_v5  ;;  %v820_v0 = vmul.f32 %v3608_v6, %v141_v12  ;;  %v942_v46 = vmul.f32 %v3587_v60, %v141_v12 }
  0xa5   :  { %v1064_v10 = vsel %vm581_vm0, %v1062_v53, %v1063_v44  ;;  %v1276_v62 = vadd.f32 %v1275_v3, %v1274_v30  ;;  %v1504_v61 = vadd.f32 %v1503_v28, %v1502_v39  ;;  %v594_v37 = vrot.slane %v469_v51, 1 }
  0xa6   :  { %v3900_v24 = vadd.f32 %v1064_v10, %v878_v59  ;;  %v849_v56 = vmul.f32 %v3608_v6, %v286_v20  ;;  %v1501_v58 = vadd.f32 %v1500_v13, %v1499_v33  ;;  %v407_v44 = vmul.f32 %v3554_v43, %v141_v12 }
  0xa7   :  { %v880_v36 = vadd.f32 %v820_v0, %v738_v4  ;;  %v1065_v53 = vrot.slane %v942_v46, 1  ;;  %v1388_v5 = vsel %vm1270_vm1, %v1279_v49, 0.0  ;;  %v596_v59 = vsel %vm581_vm0, %v594_v37, %v595_v34 }
  0xa8   :  { %v909_v10 = vadd.f32 %v849_v56, %v3722_v26  ;;  %v971_v3 = vmul.f32 %v3587_v60, %v286_v20  ;;  %v3914_v28 = vadd.f32 %v6133_v50, %v440_v31  ;;  %v740_v30 = vadd.f32 %v596_v59, %v407_v44 }
  0xa9   :  { %v1067_v33 = vsel %vm581_vm0, %v1065_v53, %v1066_v14  ;;  %v498_v12 = vmul.f32 %v3539_v38, %v286_v20  ;;  %v1359_v13 = vsel %vm1266_vm2, %v1276_v62, 0.0  ;;  %v1114_v11 = vrot.slane %v3898_v35, 1  ;;  %v296_v62 = vpop.permute.xlu1 %295 }
  0xaa   :  { %v3922_v34 = vadd.f32 %v1067_v33, %v880_v36  ;;  %v1108_v26 = vrot.slane %v971_v3, 1  ;;  %v3925_v37 = vadd.f32 %v1388_v5, %v3822_v63  ;;  %v1584_v31 = vsel %vm1266_vm2, %v1501_v58, 0.0  ;;  %v176_v36 = vpop.permute.xlu2 %175 }
  0xab   :  { %810 = vperm.xlu0 %3235, %v96_v42   ;;  %v1613_v49 = vsel %vm1270_vm1, %v1504_v61, 0.0  ;;  %v3930_v22 = vadd.f32 %v3825_v1, %v740_v30  ;;  %v1438_v14 = vmul.f32 %v3868_v17, %v3868_v17  ;;  %v3935_v39 = vmul.f32 %v3539_v38, %v311_v55 }
  0xac   :  { %6204 = vst [vmem:[#allocation11_spill] sm:$0xff] %v3922_v34  ;;  %v6205_v42 = vrot.slane %v3704_v18, 1  ;;  %v3940_v51 = vadd.f32 %v1108_v26, %v909_v10  ;;  %v3943_v63 = vadd.f32 %v1359_v13, %v3845_v23  ;;  %v3946_v0 = vmul.f32 %v3587_v60, %v311_v55 }
  0xad   :  { %v637_v1 = vrot.slane %v498_v12, 1  ;;  %v3952_v61 = vadd.f32 %v1584_v31, %v3858_v9  ;;  %v3955_v18 = vadd.f32 %v1613_v49, %v3834_v16  ;;  %v1437_v56 = vmul.f32 %v3900_v24, %v3900_v24 }
  0xae   :  { %v1109_v4 = vsel %vm581_vm0, %v6205_v42, %v1108_v26  ;;  %6206 = vst [vmem:[#allocation12_spill] sm:$0xff] %v3940_v51  ;;  %v3960_v23 = vmul.f32 %v3554_v43, %v311_v55  ;;  %v1283_v58 = vsel %vm1270_vm1, %v3868_v17, 0.0  ;;  %v3967_v44 = vmul.f32 %v3608_v6, %v311_v55 }
  0xaf   :  { %v3949_v46 = vadd.f32 %v1109_v4, %v3792_v25  ;;  %v1440_v25 = vmul.f32 %v3875_v48, %v3875_v48  ;;  %v436_v9 = vmul.f32 %v3554_v43, %v286_v20  ;;  %v1508_v16 = vsel %vm1270_vm1, %v1438_v14, 0.0  ;;  %v291_v4 = vpop.permute.xlu0 %290 }
  0xb0   :  { %v500_v5 = vmul.f32 %v3539_v38, %v296_v62  ;;  %v851_v59 = vmul.f32 %v3608_v6, %v296_v62  ;;  %v1280_v10 = vsel %vm1266_vm2, %v3900_v24, 0.0  ;;  %v973_v55 = vmul.f32 %v3587_v60, %v296_v62 }
  0xb1   :  { %6207 = vst [vmem:[#allocation13_spill] sm:$0xff] %v3949_v46  ;;  %v769_v30 = vadd.f32 %v637_v1, %v436_v9  ;;  %v1505_v33 = vsel %vm1266_vm2, %v1437_v56, 0.0  ;;  %v414_v20 = vmul.f32 %v3554_v43, %v176_v36  ;;  %v438_v12 = vmul.f32 %v3554_v43, %v296_v62  ;;  %v301_v29 = vpop.permute.xlu1 %300 }
  0xb2   :  { %v640_v13 = vrot.slane %v500_v5, 1  ;;  %v3982_v26 = vmul.f32 %v3539_v38, %v176_v36  ;;  %v1111_v49 = vrot.slane %v973_v55, 1  ;;  %v6208_v14 = vrot.slane %v3691_v7, 1 }
  0xb3   :  { %v911_v31 = vadd.f32 %v851_v59, %v769_v30  ;;  %v3988_v9 = vmul.f32 %v3608_v6, %v176_v36  ;;  %v3991_v56 = vmul.f32 %v3587_v60, %v176_v36  ;;  %v1284_v5 = vsel %vm1270_vm1, %v3940_v51, 0.0 }
  0xb4   :  { %v638_v42 = vsel %vm581_vm0, %v6208_v14, %v637_v1  ;;  %v771_v53 = vadd.f32 %v640_v13, %v438_v12  ;;  %v1468_v59 = vmul.f32 %v3940_v51, %v3940_v51  ;;  %v1289_v7 = vsel %vm1270_vm1, %v3875_v48, 0.0 }
  0xb5   :  { %v768_v62 = vadd.f32 %v638_v42, %v3736_v32  ;;  %v4000_v1 = vadd.f32 %v1111_v49, %v911_v31  ;;  %v499_v55 = vmul.f32 %v3539_v38, %v291_v4  ;;  %v850_v36 = vmul.f32 %v3608_v6, %v291_v4 }
  0xb6   :  { %v913_v30 = vadd.f32 %v3883_v54, %v771_v53  ;;  %v972_v12 = vmul.f32 %v3587_v60, %v291_v4  ;;  %v4008_v32 = vsel %vm1266_vm2, %v3922_v34, 0.0  ;;  %v1439_v14 = vmul.f32 %v3922_v34, %v3922_v34 }
  0xb7   :  { %6209 = vst [vmem:[#allocation14_spill] sm:$0xff] %v4000_v1  ;;  %v1281_v42 = vsel %vm1266_vm2, %v3949_v46, 0.0  ;;  %v1467_v54 = vmul.f32 %v3949_v46, %v3949_v46  ;;  %v639_v3 = vrot.slane %v499_v55, 1  ;;  %v910_v50 = vadd.f32 %v850_v36, %v768_v62 }
  0xb8   :  { %v4019_v53 = vadd.f32 %v1114_v11, %v913_v30  ;;  %v1285_v51 = vadd.f32 %v1284_v5, %v1283_v58  ;;  %v437_v27 = vmul.f32 %v3554_v43, %v291_v4  ;;  %v1110_v8 = vrot.slane %v972_v12, 1 }
  0xb9   :  { %v1282_v48 = vadd.f32 %v1281_v42, %v1280_v10  ;;  %v1509_v34 = vsel %vm1270_vm1, %v1468_v59, 0.0  ;;  %v1470_v31 = vmul.f32 %v4000_v1, %v4000_v1  ;;  %v641_v46 = vsel %vm581_vm0, %v639_v3, %v640_v13 }
  0xba   :  { %6210 = vst [vmem:[#allocation15_spill] sm:$0xff] %v4019_v53  ;;  %v1511_v30 = vsel %vm1266_vm2, %v1439_v14, 0.0  ;;  %v1514_v55 = vsel %vm1270_vm1, %v1440_v25, 0.0  ;;  %v770_v62 = vadd.f32 %v641_v46, %v437_v27  ;;  %v1112_v58 = vsel %vm581_vm0, %v1110_v8, %v1111_v49  ;;  %v156_v46 = vpop.permute.xlu0 %155 }
  0xbb   :  { %v1506_v5 = vsel %vm1266_vm2, %v1467_v54, 0.0  ;;  %v6211_v4 = vrot.slane %v3982_v26, 1  ;;  %v4035_v10 = vadd.f32 %v1112_v58, %v910_v50  ;;  %v501_v59 = vmul.f32 %v3539_v38, %v301_v29  ;;  %v181_v58 = vpop.permute.xlu2 %180 }
  0xbc   :  { %v1510_v12 = vadd.f32 %v1509_v34, %v1508_v16  ;;  %v1290_v3 = vsel %vm1270_vm1, %v4000_v1, 0.0  ;;  %v852_v13 = vmul.f32 %v3608_v6, %v301_v29  ;;  %v974_v27 = vmul.f32 %v3587_v60, %v301_v29 }
  0xbd   :  { %v4033_v36 = vadd.f32 %v6211_v4, %v414_v20  ;;  %6212 = vst [vmem:[#allocation16_spill] sm:$0xff] %v4035_v10  ;;  %v1361_v8 = vsel %vm1266_vm2, %v1282_v48, 0.0  ;;  %v1390_v25 = vsel %vm1270_vm1, %v1285_v51, 0.0  ;;  %v1515_v20 = vsel %vm1270_vm1, %v1470_v31, 0.0 }
  0xbe   :  { %v642_v49 = vrot.slane %v501_v59, 1  ;;  %v1469_v50 = vmul.f32 %v4035_v10, %v4035_v10  ;;  %v439_v34 = vmul.f32 %v3554_v43, %v301_v29  ;;  %v912_v16 = vadd.f32 %v852_v13, %v770_v62 }
  0xbf   :  { %v1113_v14 = vrot.slane %v974_v27, 1  ;;  %v1507_v42 = vadd.f32 %v1506_v5, %v1505_v33  ;;  %v1291_v54 = vadd.f32 %v1290_v3, %v1289_v7  ;;  %v6213_v4 = vrot.slane %v3852_v40, 1 }
  0xc0   :  { %v472_v48 = vmul.f32 %v3539_v38, %v156_v46  ;;  %v1391_v51 = vadd.f32 %v1390_v25, %v3925_v37  ;;  %v1615_v31 = vsel %vm1270_vm1, %v1510_v12, 0.0  ;;  %v1516_v62 = vadd.f32 %v1515_v20, %v1514_v55  ;;  %v166_v12 = vpop.permute.xlu1 %165 }
  0xc1   :  { %v644_v19 = vsel %vm581_vm0, %v642_v49, %v6213_v4  ;;  %v1115_v29 = vsel %vm581_vm0, %v1113_v14, %v1114_v11  ;;  %v1287_v33 = vsel %vm1266_vm2, %v4035_v10, 0.0  ;;  %v823_v40 = vmul.f32 %v3608_v6, %v156_v46 }
  0xc2   :  { %v772_v59 = vadd.f32 %v644_v19, %v439_v34  ;;  %v4059_v7 = vadd.f32 %v1115_v29, %v912_v16  ;;  %v1512_v5 = vsel %vm1266_vm2, %v1469_v50, 0.0  ;;  %v598_v37 = vrot.slane %v472_v48, 1  ;;  %v161_v29 = vpop.permute.xlu0 %160 }
  0xc3   :  { %v945_v19 = vmul.f32 %v3587_v60, %v156_v46  ;;  %v1586_v35 = vsel %vm1266_vm2, %v1507_v42, 0.0  ;;  %v1616_v11 = vadd.f32 %v1615_v31, %v3955_v18  ;;  %v1392_v55 = vsel %vm1270_vm1, %v1291_v54, 0.0 }
  0xc4   :  { %6214 = vst [vmem:[#allocation17_spill] sm:$0xff] %v4059_v7  ;;  %v4064_v3 = vadd.f32 %v3967_v44, %v772_v59  ;;  %v4071_v13 = vmul.f32 %v3539_v38, %v181_v58  ;;  %v4074_v27 = vmul.f32 %v3587_v60, %v181_v58  ;;  %v410_v25 = vmul.f32 %v3554_v43, %v156_v46 }
  0xc5   :  { %v883_v44 = vadd.f32 %v823_v40, %v3763_v57  ;;  %v1069_v20 = vrot.slane %v945_v19, 1  ;;  %v1617_v49 = vsel %vm1270_vm1, %v1516_v62, 0.0  ;;  %v1288_v50 = vadd.f32 %v1287_v33, %v4008_v32  ;;  %v336_v40 = vpop.permute.xlu2 %335 }
  0xc6   :  { %v1513_v34 = vadd.f32 %v1512_v5, %v1511_v30  ;;  %v474_v18 = vmul.f32 %v3539_v38, %v166_v12  ;;  %v743_v16 = vadd.f32 %v598_v37, %v410_v25  ;;  %v6215_v14 = vrot.slane %v3809_v45, 1 }
  0xc7   :  { %v4084_v54 = vadd.f32 %v1069_v20, %v883_v44  ;;  %v825_v4 = vmul.f32 %v3608_v6, %v166_v12  ;;  %v412_v57 = vmul.f32 %v3554_v43, %v166_v12  ;;  %v947_v32 = vmul.f32 %v3587_v60, %v166_v12 }
  0xc8   :  { %v1070_v42 = vsel %vm581_vm0, %v6215_v14, %v1069_v20  ;;  %v601_v48 = vrot.slane %v474_v18, 1  ;;  %v1472_v30 = vmul.f32 %v4019_v53, %v4019_v53  ;;  %v1362_v31 = vadd.f32 %v1361_v8, %v3943_v63 }
  0xc9   :  { %6216 = vst [vmem:[#allocation18_spill] sm:$0xff] %v4084_v54  ;;  %v4088_v46 = vadd.f32 %v1070_v42, %v3930_v22  ;;  %v1587_v45 = vadd.f32 %v1586_v35, %v3952_v61  ;;  %v885_v59 = vadd.f32 %v825_v4, %v743_v16  ;;  %v4097_v62 = vmul.f32 %v3554_v43, %v181_v58 }
  0xca   :  { %v4101_v33 = vmul.f32 %v3608_v6, %v181_v58  ;;  %v745_v5 = vadd.f32 %v601_v48, %v412_v57  ;;  %v4103_v19 = vadd.f32 %v1392_v55, %v1391_v51  ;;  %v4105_v12 = vadd.f32 %v1617_v49, %v1616_v11  ;;  %v316_v44 = vpop.permute.xlu0 %315 }
  0xcb   :  { %6217 = vst [vmem:[#allocation19_spill] sm:$0xff] %v4088_v46  ;;  %v1072_v25 = vrot.slane %v947_v32, 1  ;;  %v6218_v63 = vrot.slane %v3799_v2, 1  ;;  %v1363_v8 = vsel %vm1266_vm2, %v1288_v50, 0.0  ;;  %v1588_v35 = vsel %vm1266_vm2, %v1513_v34, 0.0 }
  0xcc   :  { %v887_v58 = vadd.f32 %v3988_v9, %v745_v5  ;;  %v1296_v20 = vsel %vm1270_vm1, %v4019_v53, 0.0  ;;  %v1521_v51 = vsel %vm1270_vm1, %v1472_v30, 0.0  ;;  %v1442_v11 = vmul.f32 %v4084_v54, %v4084_v54  ;;  %v171_v30 = vpop.permute.xlu1 %170 }
  0xcd   :  { %v599_v61 = vsel %vm581_vm0, %v6218_v63, %v598_v37  ;;  %v4119_v55 = vadd.f32 %v1072_v25, %v885_v59  ;;  %v1471_v2 = vmul.f32 %v4059_v7, %v4059_v7  ;;  %v1441_v37 = vmul.f32 %v4088_v46, %v4088_v46  ;;  %v341_v1 = vpop.permute.xlu2 %340 }
  0xce   :  { %v6220_v49 = vrot.slane %v3991_v56, 1  ;;  %v742_v9 = vadd.f32 %v599_v61, %v3818_v21  ;;  %v1364_v34 = vadd.f32 %v1363_v8, %v1362_v31  ;;  %v1589_v18 = vadd.f32 %v1588_v35, %v1587_v45 }
  0xcf   :  { %6219 = vst [vmem:[#allocation20_spill] sm:$0xff] %v4119_v55  ;;  %v1295_v16 = vsel %vm1270_vm1, %v4084_v54, 0.0  ;;  %v446_v14 = vmul.f32 %v3554_v43, %v336_v40  ;;  %v1293_v42 = vsel %vm1266_vm2, %v4059_v7, 0.0  ;;  %v4136_v4 = vmul.f32 %v3539_v38, %v336_v40 }
  0xd0   :  { %v4127_v50 = vadd.f32 %v6220_v49, %v887_v58  ;;  %v4139_v57 = vmul.f32 %v3608_v6, %v336_v40  ;;  %v473_v32 = vmul.f32 %v3539_v38, %v161_v29  ;;  %v1292_v21 = vsel %vm1266_vm2, %v4088_v46, 0.0 }
  0xd1   :  { %v1520_v31 = vsel %vm1270_vm1, %v1442_v11, 0.0  ;;  %v824_v45 = vmul.f32 %v3608_v6, %v161_v29  ;;  %v946_v59 = vmul.f32 %v3587_v60, %v161_v29  ;;  %v1518_v5 = vsel %vm1266_vm2, %v1471_v2, 0.0 }
  0xd2   :  { %6221 = vst [vmem:[#allocation21_spill] sm:$0xff] %v4127_v50  ;;  %v1297_v63 = vadd.f32 %v1296_v20, %v1295_v16  ;;  %v1517_v61 = vsel %vm1266_vm2, %v1441_v37, 0.0  ;;  %v600_v8 = vrot.slane %v473_v32, 1  ;;  %v411_v35 = vmul.f32 %v3554_v43, %v161_v29 }
  0xd3   :  { %v884_v58 = vadd.f32 %v824_v45, %v742_v9  ;;  %v1071_v49 = vrot.slane %v946_v59, 1  ;;  %v475_v22 = vmul.f32 %v3539_v38, %v171_v30  ;;  %v1294_v53 = vadd.f32 %v1293_v42, %v1292_v21 }
  0xd4   :  { %v1522_v7 = vadd.f32 %v1521_v51, %v1520_v31  ;;  %v602_v11 = vsel %vm581_vm0, %v600_v8, %v601_v48  ;;  %v826_v10 = vmul.f32 %v3608_v6, %v171_v30  ;;  %v948_v37 = vmul.f32 %v3587_v60, %v171_v30 }
  0xd5   :  { %v744_v54 = vadd.f32 %v602_v11, %v411_v35  ;;  %v1073_v20 = vsel %vm581_vm0, %v1071_v49, %v1072_v25  ;;  %v603_v2 = vrot.slane %v475_v22, 1  ;;  %v1519_v16 = vadd.f32 %v1518_v5, %v1517_v61 }
  0xd6   :  { %v4155_v29 = vadd.f32 %v1073_v20, %v884_v58  ;;  %v413_v9 = vmul.f32 %v3554_v43, %v171_v30  ;;  %v855_v32 = vmul.f32 %v3608_v6, %v316_v44  ;;  %v6223_v51 = vrot.slane %v3982_v26, 1 }
  0xd7   :  { %v886_v42 = vadd.f32 %v826_v10, %v744_v54  ;;  %v1074_v21 = vrot.slane %v948_v37, 1  ;;  %v977_v31 = vmul.f32 %v3587_v60, %v316_v44  ;;  %v1394_v25 = vsel %vm1270_vm1, %v1297_v63, 0.0 }
  0xd8   :  { %6222 = vst [vmem:[#allocation22_spill] sm:$0xff] %v4155_v29  ;;  %v605_v48 = vsel %vm581_vm0, %v603_v2, %v6223_v51  ;;  %v6147_v22 = vrot.slane %v4136_v4, 1  ;;  %v4166_v45 = vmul.f32 %v3587_v60, %v336_v40  ;;  %v6224_v30 = vrot.slane %v3991_v56, 1 }
  0xd9   :  { %v746_v59 = vadd.f32 %v605_v48, %v413_v9  ;;  %v504_v26 = vmul.f32 %v3539_v38, %v316_v44  ;;  %v915_v61 = vadd.f32 %v855_v32, %v3914_v28  ;;  %v1117_v10 = vrot.slane %v977_v31, 1 }
  0xda   :  { %v1076_v5 = vsel %vm581_vm0, %v1074_v21, %v6224_v30  ;;  %v1365_v54 = vsel %vm1266_vm2, %v1294_v53, 0.0  ;;  %v1619_v8 = vsel %vm1270_vm1, %v1522_v7, 0.0  ;;  %v1590_v40 = vsel %vm1266_vm2, %v1519_v16, 0.0 }
  0xdb   :  { %v4176_v63 = vadd.f32 %v4101_v33, %v746_v59  ;;  %v4178_v35 = vadd.f32 %v1076_v5, %v886_v42  ;;  %v1444_v56 = vmul.f32 %v4119_v55, %v4119_v55  ;;  %v6226_v58 = vrot.slane %v3946_v0, 1 }
  0xdc   :  { %v4186_v28 = vadd.f32 %v1117_v10, %v915_v61  ;;  %v4190_v7 = vmul.f32 %v3539_v38, %v341_v1  ;;  %v4193_v33 = vmul.f32 %v3587_v60, %v341_v1  ;;  %v4198_v20 = vadd.f32 %v1365_v54, %v1364_v34  ;;  %v206_v34 = vpop.permute.xlu2 %205 }
  0xdd   :  { %6225 = vst [vmem:[#allocation23_spill] sm:$0xff] %v4178_v35  ;;  %v1118_v49 = vsel %vm581_vm0, %v6226_v58, %v1117_v10  ;;  %v4201_v2 = vadd.f32 %v1394_v25, %v4103_v19  ;;  %v4205_v0 = vadd.f32 %v6147_v22, %v446_v14  ;;  %v646_v37 = vrot.slane %v504_v26, 1  ;;  %v321_v10 = vpop.permute.xlu0 %320 }
  0xde   :  { %6227 = vst [vmem:[#allocation24_spill] sm:$0xff] %v4186_v28  ;;  %v4196_v11 = vadd.f32 %v1118_v49, %v4064_v3  ;;  %v4207_v16 = vadd.f32 %v1590_v40, %v1589_v18  ;;  %v4210_v38 = vadd.f32 %v1619_v8, %v4105_v12  ;;  %v1301_v9 = vsel %vm1270_vm1, %v4119_v55, 0.0  ;;  %v326_v12 = vpop.permute.xlu1 %325 }
  0xdf   :  { %v4216_v3 = vmul.f32 %v4127_v50, %v4127_v50  ;;  %v1526_v19 = vsel %vm1270_vm1, %v1444_v56, 0.0  ;;  %v1443_v14 = vmul.f32 %v4155_v29, %v4155_v29  ;;  %v4222_v32 = vmul.f32 %v3554_v43, %v341_v1 }
  0xe0   :  { %6228 = vst [vmem:[#allocation25_spill] sm:$0xff] %v4196_v11  ;;  %v442_v18 = vmul.f32 %v3554_v43, %v316_v44  ;;  %v4227_v48 = vmul.f32 %v3608_v6, %v341_v1  ;;  %v1474_v21 = vmul.f32 %v4186_v28, %v4186_v28  ;;  %v1298_v31 = vsel %vm1266_vm2, %v4155_v29, 0.0  ;;  %v4238_v44 = vld [vmem:[%s6124_s1 + $0x1] ss:$0 sm:$0xff] }
  0xe1   :  { %v420_v59 = vmul.f32 %v3554_v43, %v206_v34  ;;  %v4241_v30 = vmul.f32 %v4238_v44, %v206_v34  ;;  %v1473_v1 = vmul.f32 %v4196_v11, %v4196_v11  ;;  %v506_v5 = vmul.f32 %v4238_v44, %v326_v12 }
  0xe2   :  { %v775_v25 = vadd.f32 %v646_v37, %v442_v18  ;;  %v857_v26 = vmul.f32 %v3608_v6, %v326_v12  ;;  %v979_v61 = vmul.f32 %v3587_v60, %v326_v12  ;;  %v1523_v43 = vsel %vm1266_vm2, %v1443_v14, 0.0 }
  0xe3   :  { %v1445_v54 = vmul.f32 %v4178_v35, %v4178_v35  ;;  %v1302_v8 = vsel %vm1270_vm1, %v4186_v28, 0.0  ;;  %v6229_v40 = vrot.slane %v3935_v39, 1  ;;  %v1527_v58 = vsel %vm1270_vm1, %v1474_v21, 0.0 }
  0xe4   :  { %v917_v49 = vadd.f32 %v857_v26, %v775_v25  ;;  %v1120_v18 = vrot.slane %v979_v61, 1  ;;  %v1299_v42 = vsel %vm1266_vm2, %v4196_v11, 0.0  ;;  %v649_v14 = vrot.slane %v506_v5, 1 }
  0xe5   :  { %v647_v56 = vsel %vm581_vm0, %v6229_v40, %v646_v37  ;;  %v505_v22 = vmul.f32 %v4238_v44, %v321_v10  ;;  %v856_v53 = vmul.f32 %v3608_v6, %v321_v10  ;;  %v1524_v28 = vsel %vm1266_vm2, %v1473_v1, 0.0  ;;  %v4276_v1 = vld [vmem:[%s6124_s1 + $0x3] ss:$0 sm:$0xff] }
  0xe6   :  { %v774_v51 = vadd.f32 %v647_v56, %v3960_v23  ;;  %v6150_v39 = vrot.slane %v4241_v30, 1  ;;  %v4264_v55 = vadd.f32 %v1120_v18, %v917_v49  ;;  %v978_v37 = vmul.f32 %v3587_v60, %v321_v10  ;;  %v4270_v23 = vld [vmem:[%s6124_s1] ss:$0 sm:$0xff] }
  0xe7   :  { %v1303_v21 = vadd.f32 %v1302_v8, %v1301_v9  ;;  %v1528_v25 = vadd.f32 %v1527_v58, %v1526_v19  ;;  %v444_v5 = vmul.f32 %v4270_v23, %v326_v12  ;;  %v1300_v61 = vadd.f32 %v1299_v42, %v1298_v31  ;;  %v331_v31 = vpop.permute.xlu1 %330 }
  0xe8   :  { %6230 = vst [vmem:[#allocation26_spill] sm:$0xff] %v4264_v55  ;;  %v916_v26 = vadd.f32 %v856_v53, %v774_v51  ;;  %v4279_v40 = vmul.f32 %v4276_v1, %v206_v34  ;;  %v648_v60 = vrot.slane %v505_v22, 1  ;;  %v1119_v9 = vrot.slane %v978_v37, 1 }
  0xe9   :  { %v1304_v19 = vsel %vm1266_vm2, %v4178_v35, 0.0  ;;  %v1525_v8 = vadd.f32 %v1524_v28, %v1523_v43  ;;  %v4284_v56 = vmul.f32 %v3608_v6, %v206_v34  ;;  %v777_v12 = vadd.f32 %v649_v14, %v444_v5  ;;  %v4311_v5 = vld [vmem:[%s6124_s1 + $0x2] ss:$0 sm:$0xff] }
  0xea   :  { %v1529_v53 = vsel %vm1266_vm2, %v1445_v54, 0.0  ;;  %v4289_v51 = vadd.f32 %v6150_v39, %v420_v59  ;;  %v1307_v42 = vsel %vm1270_vm1, %v4127_v50, 0.0  ;;  %v1121_v22 = vsel %vm581_vm0, %v1119_v9, %v1120_v18 }
  0xeb   :  { %v1396_v58 = vsel %vm1270_vm1, %v1303_v21, 0.0  ;;  %v1621_v28 = vsel %vm1270_vm1, %v1528_v25, 0.0  ;;  %v1476_v6 = vmul.f32 %v4264_v55, %v4264_v55  ;;  %v4298_v34 = vadd.f32 %v1121_v22, %v916_v26  ;;  %v211_v25 = vpop.permute.xlu2 %210  ;;  %v186_v22 = vpop.permute.xlu0 %185 }
  0xec   :  { %v1367_v43 = vsel %vm1266_vm2, %v1300_v61, 0.0  ;;  %v1308_v54 = vsel %vm1270_vm1, %v4264_v55, 0.0  ;;  %v650_v49 = vsel %vm581_vm0, %v648_v60, %v649_v14  ;;  %v1592_v18 = vsel %vm1266_vm2, %v1525_v8, 0.0 }
  0xed   :  { %6231 = vst [vmem:[#allocation27_spill] sm:$0xff] %v4298_v34  ;;  %v919_v37 = vadd.f32 %v4139_v57, %v777_v12  ;;  %v443_v21 = vmul.f32 %v4270_v23, %v321_v10  ;;  %v858_v26 = vmul.f32 %v4311_v5, %v331_v31  ;;  %v1397_v61 = vadd.f32 %v1396_v58, %v4201_v2 }
  0xee   :  { %v1622_v9 = vadd.f32 %v1621_v28, %v4210_v38  ;;  %v1532_v14 = vsel %vm1270_vm1, %v4216_v3, 0.0  ;;  %v980_v60 = vmul.f32 %v4276_v1, %v331_v31  ;;  %v1309_v57 = vadd.f32 %v1308_v54, %v1307_v42 }
  0xef   :  { %v1533_v10 = vsel %vm1270_vm1, %v1476_v6, 0.0  ;;  %v1368_v8 = vadd.f32 %v1367_v43, %v4198_v20  ;;  %v776_v12 = vadd.f32 %v650_v49, %v443_v21  ;;  %v4322_v39 = vadd.f32 %v1592_v18, %v4207_v16 }
  0xf0   :  { %v4325_v59 = vmul.f32 %v4238_v44, %v211_v25  ;;  %v507_v2 = vmul.f32 %v4238_v44, %v331_v31  ;;  %v1122_v38 = vrot.slane %v980_v60, 1  ;;  %v6232_v3 = vrot.slane %v4166_v45, 1 }
  0xf1   :  { %v1305_v42 = vsel %vm1266_vm2, %v4298_v34, 0.0  ;;  %v1475_v20 = vmul.f32 %v4298_v34, %v4298_v34  ;;  %v918_v28 = vadd.f32 %v858_v26, %v776_v12  ;;  %v1534_v6 = vadd.f32 %v1533_v10, %v1532_v14  ;;  %v196_v12 = vpop.permute.xlu1 %195 }
  0xf2   :  { %v4330_v58 = vadd.f32 %v6232_v3, %v919_v37  ;;  %v6234_v16 = vmov %v6232_v3  ;;  %v829_v54 = vmul.f32 %v4311_v5, %v186_v22  ;;  %v951_v49 = vmul.f32 %v4276_v1, %v186_v22 }
  0xf3   :  { %v1124_v43 = vsel %vm581_vm0, %v1122_v38, %v6234_v16  ;;  %v1398_v18 = vsel %vm1270_vm1, %v1309_v57, 0.0  ;;  %v4343_v37 = vmul.f32 %v4270_v23, %v211_v25  ;;  %v4346_v21 = vmul.f32 %v4311_v5, %v211_v25 }
  0xf4   :  { %6233 = vst [vmem:[#allocation28_spill] sm:$0xff] %v4330_v58  ;;  %v4349_v60 = vmul.f32 %v4276_v1, %v211_v25  ;;  %v1306_v26 = vadd.f32 %v1305_v42, %v1304_v19  ;;  %v651_v14 = vrot.slane %v507_v2, 1  ;;  %v889_v45 = vadd.f32 %v829_v54, %v4033_v36 }
  0xf5   :  { %v1078_v10 = vrot.slane %v951_v49, 1  ;;  %v1478_v38 = vmul.f32 %v4330_v58, %v4330_v58  ;;  %v1530_v57 = vsel %vm1266_vm2, %v1475_v20, 0.0  ;;  %v4356_v16 = vadd.f32 %v1124_v43, %v918_v28 }
  0xf6   :  { %v1623_v55 = vsel %vm1270_vm1, %v1534_v6, 0.0  ;;  %v478_v25 = vmul.f32 %v4238_v44, %v186_v22  ;;  %v6236_v19 = vrot.slane %v4074_v27, 1  ;;  %v1399_v42 = vadd.f32 %v1398_v18, %v1397_v61 }
  0xf7   :  { %6235 = vst [vmem:[#allocation29_spill] sm:$0xff] %v4356_v16  ;;  %v4363_v36 = vadd.f32 %v1078_v10, %v889_v45  ;;  %v4370_v20 = vmul.f32 %v4238_v44, %v196_v12  ;;  %v1369_v28 = vsel %vm1266_vm2, %v1306_v26, 0.0  ;;  %v1531_v6 = vadd.f32 %v1530_v57, %v1529_v53 }
  0xf8   :  { %v1079_v2 = vsel %vm581_vm0, %v6236_v19, %v1078_v10  ;;  %v445_v43 = vmul.f32 %v4270_v23, %v331_v31  ;;  %v6239_v27 = vrot.slane %v4136_v4, 1  ;;  %v1624_v45 = vadd.f32 %v1623_v55, %v1622_v9  ;;  %v366_v10 = vpop.permute.xlu2 %365 }
  0xf9   :  { %6237 = vst [vmem:[#allocation30_spill] sm:$0xff] %v4363_v36  ;;  %v4367_v49 = vadd.f32 %v1079_v2, %v4176_v63  ;;  %v1477_v61 = vmul.f32 %v4356_v16, %v4356_v16  ;;  %v1314_v63 = vsel %vm1270_vm1, %v4330_v58, 0.0  ;;  %v1448_v18 = vmul.f32 %v4363_v36, %v4363_v36  ;;  %v191_v2 = vpop.permute.xlu0 %190 }
  0xfa   :  { %v653_v19 = vsel %vm581_vm0, %v651_v14, %v6239_v27  ;;  %v1539_v53 = vsel %vm1270_vm1, %v1478_v38, 0.0  ;;  %v607_v26 = vrot.slane %v478_v25, 1  ;;  %v1313_v4 = vsel %vm1270_vm1, %v4363_v36, 0.0 }
  0xfb   :  { %6238 = vst [vmem:[#allocation31_spill] sm:$0xff] %v4367_v49  ;;  %v1447_v55 = vmul.f32 %v4367_v49, %v4367_v49  ;;  %v1370_v31 = vadd.f32 %v1369_v28, %v1368_v8  ;;  %v778_v9 = vadd.f32 %v653_v19, %v445_v43  ;;  %v416_v14 = vmul.f32 %v4270_v23, %v186_v22 }
  0xfc   :  { %v610_v57 = vrot.slane %v4370_v20, 1  ;;  %v1594_v27 = vsel %vm1266_vm2, %v1531_v6, 0.0  ;;  %v1311_v3 = vsel %vm1266_vm2, %v4356_v16, 0.0  ;;  %v1310_v38 = vsel %vm1266_vm2, %v4367_v49, 0.0 }
  0xfd   :  { %v4396_v25 = vmul.f32 %v4238_v44, %v366_v10  ;;  %v1536_v54 = vsel %vm1266_vm2, %v1477_v61, 0.0  ;;  %v1315_v58 = vadd.f32 %v1314_v63, %v1313_v4  ;;  %v1538_v8 = vsel %vm1270_vm1, %v1448_v18, 0.0 }
  0xfe   :  { %v418_v22 = vmul.f32 %v4270_v23, %v196_v12  ;;  %v1535_v20 = vsel %vm1266_vm2, %v1447_v55, 0.0  ;;  %v831_v28 = vmul.f32 %v4311_v5, %v196_v12  ;;  %v953_v6 = vmul.f32 %v4276_v1, %v196_v12 }
  0xff   :  { %v6240_v43 = vrot.slane %v4071_v13, 1  ;;  %v1595_v16 = vadd.f32 %v1594_v27, %v4322_v39  ;;  %v1312_v34 = vadd.f32 %v1311_v3, %v1310_v38  ;;  %v749_v63 = vadd.f32 %v607_v26, %v416_v14 }
 0x100   :  { %v751_v11 = vadd.f32 %v610_v57, %v418_v22  ;;  %v1540_v18 = vadd.f32 %v1539_v53, %v1538_v8  ;;  %v6158_v4 = vrot.slane %v4396_v25, 1  ;;  %v952_v55 = vmul.f32 %v4276_v1, %v191_v2 }
 0x101   :  { %v608_v19 = vsel %vm581_vm0, %v6240_v43, %v607_v26  ;;  %v1537_v36 = vadd.f32 %v1536_v54, %v1535_v20  ;;  %v452_v49 = vmul.f32 %v4270_v23, %v366_v10  ;;  %v4413_v12 = vmul.f32 %v4276_v1, %v366_v10  ;;  %v201_v43 = vpop.permute.xlu1 %200  ;;  %v346_v38 = vpop.permute.xlu0 %345 }
 0x102   :  { %v748_v61 = vadd.f32 %v608_v19, %v4097_v62  ;;  %v479_v13 = vmul.f32 %v4238_v44, %v191_v2  ;;  %v1400_v39 = vsel %vm1270_vm1, %v1315_v58, 0.0  ;;  %v891_v3 = vadd.f32 %v831_v28, %v749_v63 }
 0x103   :  { %v1081_v27 = vrot.slane %v953_v6, 1  ;;  %v830_v62 = vmul.f32 %v4311_v5, %v191_v2  ;;  %v920_v53 = vadd.f32 %v4227_v48, %v778_v9  ;;  %v1371_v26 = vsel %vm1266_vm2, %v1312_v34, 0.0 }
 0x104   :  { %v893_v54 = vadd.f32 %v4284_v56, %v751_v11  ;;  %v1080_v14 = vrot.slane %v952_v55, 1  ;;  %v1625_v8 = vsel %vm1270_vm1, %v1540_v18, 0.0  ;;  %v4424_v22 = vadd.f32 %v6158_v4, %v452_v49  ;;  %v371_v56 = vpop.permute.xlu2 %370 }
 0x105   :  { %v4427_v58 = vmul.f32 %v4311_v5, %v366_v10  ;;  %v481_v20 = vmul.f32 %v4238_v44, %v201_v43  ;;  %v4430_v28 = vadd.f32 %v1400_v39, %v1399_v42  ;;  %v1596_v48 = vsel %vm1266_vm2, %v1537_v36, 0.0 }
 0x106   :  { %v609_v11 = vrot.slane %v479_v13, 1  ;;  %v4434_v9 = vadd.f32 %v1371_v26, %v1370_v31  ;;  %v4436_v6 = vadd.f32 %v1081_v27, %v891_v3  ;;  %v890_v19 = vadd.f32 %v830_v62, %v748_v61 }
 0x107   :  { %v861_v49 = vmul.f32 %v4311_v5, %v346_v38  ;;  %v4439_v63 = vadd.f32 %v1625_v8, %v1624_v45  ;;  %v6242_v10 = vrot.slane %v4279_v40, 1  ;;  %v1082_v42 = vsel %vm581_vm0, %v1080_v14, %v1081_v27 }
 0x108   :  { %6241 = vst [vmem:[#allocation32_spill] sm:$0xff] %v4436_v6  ;;  %v954_v36 = vmul.f32 %v4276_v1, %v201_v43  ;;  %v4447_v55 = vadd.f32 %v1596_v48, %v1595_v16  ;;  %v417_v31 = vmul.f32 %v4270_v23, %v191_v2  ;;  %v612_v13 = vrot.slane %v481_v20, 1 }
 0x109   :  { %v4443_v18 = vadd.f32 %v6242_v10, %v893_v54  ;;  %v983_v39 = vmul.f32 %v4276_v1, %v346_v38  ;;  %v611_v61 = vsel %vm581_vm0, %v609_v11, %v610_v57  ;;  %v4453_v45 = vmul.f32 %v4270_v23, %v371_v56 }
 0x10a   :  { %v510_v3 = vmul.f32 %v4238_v44, %v346_v38  ;;  %v921_v62 = vadd.f32 %v861_v49, %v4205_v0  ;;  %v1450_v27 = vmul.f32 %v4436_v6, %v4436_v6  ;;  %v4459_v26 = vadd.f32 %v1082_v42, %v890_v19 }
 0x10b   :  { %v832_v16 = vmul.f32 %v4311_v5, %v201_v43  ;;  %v1126_v2 = vrot.slane %v983_v39, 1  ;;  %v1319_v54 = vsel %vm1270_vm1, %v4436_v6, 0.0  ;;  %v4466_v57 = vmul.f32 %v4443_v18, %v4443_v18 }
 0x10c   :  { %6243 = vst [vmem:[#allocation33_spill] sm:$0xff] %v4459_v26  ;;  %v4469_v14 = vmul.f32 %v4238_v44, %v371_v56  ;;  %v1083_v8 = vrot.slane %v954_v36, 1  ;;  %v750_v0 = vadd.f32 %v611_v61, %v417_v31  ;;  %v4472_v20 = vmul.f32 %v4276_v1, %v371_v56  ;;  %v356_v36 = vpop.permute.xlu1 %355 }
 0x10d   :  { %v6244_v48 = vrot.slane %v4241_v30, 1  ;;  %v6245_v19 = vrot.slane %v4193_v33, 1  ;;  %v419_v10 = vmul.f32 %v4270_v23, %v201_v43  ;;  %v655_v42 = vrot.slane %v510_v3, 1 }
 0x10e   :  { %v4483_v4 = vadd.f32 %v1126_v2, %v921_v62  ;;  %v1544_v31 = vsel %vm1270_vm1, %v1450_v27, 0.0  ;;  %v1449_v61 = vmul.f32 %v4459_v26, %v4459_v26  ;;  %v4489_v30 = vmul.f32 %v4311_v5, %v371_v56  ;;  %v236_v62 = vpop.permute.xlu2 %235 }
 0x10f   :  { %v614_v11 = vsel %vm581_vm0, %v612_v13, %v6244_v48  ;;  %v1127_v49 = vsel %vm581_vm0, %v6245_v19, %v1126_v2  ;;  %v892_v13 = vadd.f32 %v832_v16, %v750_v0  ;;  %v6248_v43 = vrot.slane %v4279_v40, 1 }
 0x110   :  { %v4481_v39 = vadd.f32 %v1127_v49, %v920_v53  ;;  %6247 = vst [vmem:[#allocation35_spill] sm:$0xff] %v4483_v4  ;;  %v752_v48 = vadd.f32 %v614_v11, %v419_v10  ;;  %v448_v3 = vmul.f32 %v4270_v23, %v346_v38  ;;  %v1316_v27 = vsel %vm1266_vm2, %v4459_v26, 0.0 }
 0x111   :  { %v1085_v53 = vsel %vm581_vm0, %v1083_v8, %v6248_v43  ;;  %v512_v19 = vmul.f32 %v4238_v44, %v356_v36  ;;  %v863_v56 = vmul.f32 %v4311_v5, %v356_v36  ;;  %v1480_v40 = vmul.f32 %v4483_v4, %v4483_v4  ;;  %v351_v43 = vpop.permute.xlu0 %350 }
 0x112   :  { %6246 = vst [vmem:[#allocation34_spill] sm:$0xff] %v4481_v39  ;;  %v781_v16 = vadd.f32 %v655_v42, %v448_v3  ;;  %v1479_v0 = vmul.f32 %v4481_v39, %v4481_v39  ;;  %v985_v8 = vmul.f32 %v4276_v1, %v356_v36  ;;  %v1541_v38 = vsel %vm1266_vm2, %v1449_v61, 0.0 }
 0x113   :  { %v4507_v11 = vadd.f32 %v1085_v53, %v892_v13  ;;  %v426_v49 = vmul.f32 %v4270_v23, %v236_v62  ;;  %v4511_v10 = vmul.f32 %v4238_v44, %v236_v62  ;;  %v4514_v3 = vadd.f32 %v4346_v21, %v752_v48 }
 0x114   :  { %v923_v33 = vadd.f32 %v863_v56, %v781_v16  ;;  %v1129_v2 = vrot.slane %v985_v8, 1  ;;  %v6249_v34 = vrot.slane %v4190_v7, 1  ;;  %v1320_v61 = vsel %vm1270_vm1, %v4483_v4, 0.0  ;;  %v361_v46 = vpop.permute.xlu1 %360 }
 0x115   :  { %v4522_v13 = vmul.f32 %v4276_v1, %v236_v62  ;;  %v450_v53 = vmul.f32 %v4270_v23, %v356_v36  ;;  %v658_v26 = vrot.slane %v512_v19, 1  ;;  %v1317_v50 = vsel %vm1266_vm2, %v4481_v39, 0.0 }
 0x116   :  { %v656_v6 = vsel %vm581_vm0, %v6249_v34, %v655_v42  ;;  %v1542_v21 = vsel %vm1266_vm2, %v1479_v0, 0.0  ;;  %v1545_v48 = vsel %vm1270_vm1, %v1480_v40, 0.0  ;;  %v4530_v56 = vadd.f32 %v1129_v2, %v923_v33 }
 0x117   :  { %v780_v7 = vadd.f32 %v656_v6, %v4222_v32  ;;  %v511_v34 = vmul.f32 %v4238_v44, %v351_v43  ;;  %v862_v42 = vmul.f32 %v4311_v5, %v351_v43  ;;  %v984_v16 = vmul.f32 %v4276_v1, %v351_v43 }
 0x118   :  { %6250 = vst [vmem:[#allocation36_spill] sm:$0xff] %v4530_v56  ;;  %v1451_v36 = vmul.f32 %v4507_v11, %v4507_v11  ;;  %v1321_v19 = vadd.f32 %v1320_v61, %v1319_v54  ;;  %v6168_v8 = vrot.slane %v4511_v10, 1  ;;  %v4539_v0 = vmul.f32 %v4311_v5, %v236_v62 }
 0x119   :  { %v1318_v40 = vadd.f32 %v1317_v50, %v1316_v27  ;;  %v1546_v4 = vadd.f32 %v1545_v48, %v1544_v31  ;;  %v783_v32 = vadd.f32 %v658_v26, %v450_v53  ;;  %v922_v6 = vadd.f32 %v862_v42, %v780_v7  ;;  %v241_v7 = vpop.permute.xlu2 %240 }
 0x11a   :  { %v1543_v33 = vadd.f32 %v1542_v21, %v1541_v38  ;;  %v1325_v39 = vsel %vm1270_vm1, %v4443_v18, 0.0  ;;  %v657_v35 = vrot.slane %v511_v34, 1  ;;  %v1128_v29 = vrot.slane %v984_v16, 1  ;;  %v216_v34 = vpop.permute.xlu0 %215 }
 0x11b   :  { %v1322_v17 = vsel %vm1266_vm2, %v4507_v11, 0.0  ;;  %v1550_v62 = vsel %vm1270_vm1, %v4466_v57, 0.0  ;;  %v1482_v50 = vmul.f32 %v4530_v56, %v4530_v56  ;;  %v1547_v31 = vsel %vm1266_vm2, %v1451_v36, 0.0 }
 0x11c   :  { %v1402_v27 = vsel %vm1270_vm1, %v1321_v19, 0.0  ;;  %v4554_v38 = vadd.f32 %v6168_v8, %v426_v49  ;;  %v1130_v61 = vsel %vm581_vm0, %v1128_v29, %v1129_v2  ;;  %v1373_v53 = vsel %vm1266_vm2, %v1318_v40, 0.0 }
 0x11d   :  { %v1627_v21 = vsel %vm1270_vm1, %v1546_v4, 0.0  ;;  %v925_v48 = vadd.f32 %v4427_v58, %v783_v32  ;;  %v4560_v57 = vadd.f32 %v1130_v61, %v922_v6  ;;  %v1598_v42 = vsel %vm1266_vm2, %v1543_v33, 0.0 }
 0x11e   :  { %v1326_v16 = vsel %vm1270_vm1, %v4530_v56, 0.0  ;;  %v659_v49 = vsel %vm581_vm0, %v657_v35, %v658_v26  ;;  %v986_v36 = vmul.f32 %v4276_v1, %v361_v46  ;;  %v1551_v29 = vsel %vm1270_vm1, %v1482_v50, 0.0 }
 0x11f   :  { %6251 = vst [vmem:[#allocation37_spill] sm:$0xff] %v4560_v57  ;;  %v449_v2 = vmul.f32 %v4270_v23, %v351_v43  ;;  %v513_v4 = vmul.f32 %v4238_v44, %v361_v46  ;;  %v864_v58 = vmul.f32 %v4311_v5, %v361_v46  ;;  %v1403_v19 = vadd.f32 %v1402_v27, %v4430_v28 }
 0x120   :  { %v1481_v40 = vmul.f32 %v4560_v57, %v4560_v57  ;;  %v4575_v32 = vmul.f32 %v4238_v44, %v241_v7  ;;  %v1131_v6 = vrot.slane %v986_v36, 1  ;;  %v1628_v35 = vadd.f32 %v1627_v21, %v4439_v63 }
 0x121   :  { %v6252_v26 = vrot.slane %v4413_v12, 1  ;;  %v1327_v43 = vadd.f32 %v1326_v16, %v1325_v39  ;;  %v782_v50 = vadd.f32 %v659_v49, %v449_v2  ;;  %v1552_v61 = vadd.f32 %v1551_v29, %v1550_v62 }
 0x122   :  { %v1374_v8 = vadd.f32 %v1373_v53, %v4434_v9  ;;  %v1599_v28 = vadd.f32 %v1598_v42, %v4447_v55  ;;  %v4585_v27 = vmul.f32 %v4270_v23, %v241_v7  ;;  %v1323_v54 = vsel %vm1266_vm2, %v4560_v57, 0.0  ;;  %v226_v53 = vpop.permute.xlu1 %225 }
 0x123   :  { %v4580_v33 = vadd.f32 %v6252_v26, %v925_v48  ;;  %v660_v36 = vrot.slane %v513_v4, 1  ;;  %v924_v56 = vadd.f32 %v864_v58, %v782_v50  ;;  %v835_v63 = vmul.f32 %v4311_v5, %v216_v34  ;;  %v4613_v50 = vpop.permute.xlu0 %220 }
 0x124   :  { %v1548_v21 = vsel %vm1266_vm2, %v1481_v40, 0.0  ;;  %v6254_v62 = vmov %v6252_v26  ;;  %v957_v55 = vmul.f32 %v4276_v1, %v216_v34  ;;  %v1404_v48 = vsel %vm1270_vm1, %v1327_v43, 0.0 }
 0x125   :  { %6253 = vst [vmem:[#allocation38_spill] sm:$0xff] %v4580_v33  ;;  %v1133_v9 = vsel %vm581_vm0, %v1131_v6, %v6254_v62  ;;  %v1484_v42 = vmul.f32 %v4580_v33, %v4580_v33  ;;  %v4600_v16 = vmul.f32 %v4311_v5, %v241_v7  ;;  %v4603_v49 = vmul.f32 %v4276_v1, %v241_v7 }
 0x126   :  { %v1629_v29 = vsel %vm1270_vm1, %v1552_v61, 0.0  ;;  %v1324_v2 = vadd.f32 %v1323_v54, %v1322_v17  ;;  %v895_v12 = vadd.f32 %v835_v63, %v4289_v51  ;;  %v1087_v4 = vrot.slane %v957_v55, 1  ;;  %v396_v55 = vpop.permute.xlu2 %395 }
 0x127   :  { %v1549_v58 = vadd.f32 %v1548_v21, %v1547_v31  ;;  %v6255_v40 = vrot.slane %v4396_v25, 1  ;;  %v4610_v26 = vadd.f32 %v1133_v9, %v924_v56  ;;  %v484_v43 = vmul.f32 %v4238_v44, %v216_v34 }
 0x128   :  { %v451_v7 = vmul.f32 %v4270_v23, %v361_v46  ;;  %v6257_v62 = vrot.slane %v4349_v60, 1  ;;  %v4619_v54 = vadd.f32 %v1087_v4, %v895_v12  ;;  %v4622_v51 = vmul.f32 %v4238_v44, %v226_v53 }
 0x129   :  { %v662_v6 = vsel %vm581_vm0, %v660_v36, %v6255_v40  ;;  %6256 = vst [vmem:[#allocation39_spill] sm:$0xff] %v4610_v26  ;;  %v1405_v25 = vadd.f32 %v1404_v48, %v1403_v19  ;;  %v4624_v31 = vadd.f32 %v1629_v29, %v1628_v35  ;;  %v1332_v46 = vsel %vm1270_vm1, %v4580_v33, 0.0 }
 0x12a   :  { %v1088_v17 = vsel %vm581_vm0, %v6257_v62, %v1087_v4  ;;  %v784_v36 = vadd.f32 %v662_v6, %v451_v7  ;;  %v1557_v60 = vsel %vm1270_vm1, %v1484_v42, 0.0  ;;  %v422_v63 = vmul.f32 %v4270_v23, %v216_v34  ;;  %v231_v7 = vpop.permute.xlu1 %230 }
 0x12b   :  { %v4628_v61 = vadd.f32 %v1088_v17, %v4514_v3  ;;  %v1375_v21 = vsel %vm1266_vm2, %v1324_v2, 0.0  ;;  %v1600_v9 = vsel %vm1266_vm2, %v1549_v58, 0.0  ;;  %v1329_v19 = vsel %vm1266_vm2, %v4610_v26, 0.0 }
 0x12c   :  { %v616_v35 = vrot.slane %v484_v43, 1  ;;  %v1483_v3 = vmul.f32 %v4610_v26, %v4610_v26  ;;  %v1331_v48 = vsel %vm1270_vm1, %v4619_v54, 0.0  ;;  %v1454_v42 = vmul.f32 %v4619_v54, %v4619_v54 }
 0x12d   :  { %v619_v34 = vrot.slane %v4622_v51, 1  ;;  %v1328_v29 = vsel %vm1266_vm2, %v4628_v61, 0.0  ;;  %v1453_v2 = vmul.f32 %v4628_v61, %v4628_v61  ;;  %v837_v12 = vmul.f32 %v4311_v5, %v226_v53 }
 0x12e   :  { %v959_v4 = vmul.f32 %v4276_v1, %v226_v53  ;;  %v1376_v58 = vadd.f32 %v1375_v21, %v1374_v8  ;;  %v4652_v40 = vadd.f32 %v4489_v30, %v784_v36  ;;  %v4655_v6 = vmul.f32 %v4270_v23, %v396_v55 }
 0x12f   :  { %v424_v43 = vmul.f32 %v4270_v23, %v226_v53  ;;  %v1601_v62 = vadd.f32 %v1600_v9, %v1599_v28  ;;  %v755_v17 = vadd.f32 %v616_v35, %v422_v63  ;;  %v1333_v51 = vadd.f32 %v1332_v46, %v1331_v48  ;;  %v376_v28 = vpop.permute.xlu0 %375 }
 0x130   :  { %v4659_v39 = vmul.f32 %v4238_v44, %v396_v55  ;;  %v1330_v56 = vadd.f32 %v1329_v19, %v1328_v29  ;;  %v1556_v33 = vsel %vm1270_vm1, %v1454_v42, 0.0  ;;  %v6258_v8 = vrot.slane %v4325_v59, 1 }
 0x131   :  { %v757_v26 = vadd.f32 %v619_v34, %v424_v43  ;;  %v1554_v36 = vsel %vm1266_vm2, %v1483_v3, 0.0  ;;  %v1553_v21 = vsel %vm1266_vm2, %v1453_v2, 0.0  ;;  %v897_v53 = vadd.f32 %v837_v12, %v755_v17 }
 0x132   :  { %v617_v30 = vsel %vm581_vm0, %v6258_v8, %v616_v35  ;;  %v1090_v57 = vrot.slane %v959_v4, 1  ;;  %v4668_v46 = vmul.f32 %v4276_v1, %v396_v55  ;;  %v485_v63 = vmul.f32 %v4238_v44, %v4613_v50 }
 0x133   :  { %v836_v9 = vmul.f32 %v4311_v5, %v4613_v50  ;;  %v958_v59 = vmul.f32 %v4276_v1, %v4613_v50  ;;  %v1406_v19 = vsel %vm1270_vm1, %v1333_v51, 0.0  ;;  %v1558_v35 = vadd.f32 %v1557_v60, %v1556_v33 }
 0x134   :  { %v754_v3 = vadd.f32 %v617_v30, %v4343_v37  ;;  %v487_v48 = vmul.f32 %v4238_v44, %v231_v7  ;;  %v1377_v42 = vsel %vm1266_vm2, %v1330_v56, 0.0  ;;  %v1555_v29 = vadd.f32 %v1554_v36, %v1553_v21 }
 0x135   :  { %v899_v2 = vadd.f32 %v4539_v0, %v757_v26  ;;  %v1089_v12 = vrot.slane %v958_v59, 1  ;;  %v4683_v43 = vmul.f32 %v4311_v5, %v396_v55  ;;  %v4685_v17 = vadd.f32 %v1090_v57, %v897_v53  ;;  %v806_v59 = vpop.permute.xlu2 %805 }
 0x136   :  { %v618_v8 = vrot.slane %v485_v63, 1  ;;  %v4687_v51 = vadd.f32 %v1406_v19, %v1405_v25  ;;  %v896_v33 = vadd.f32 %v836_v9, %v754_v3  ;;  %v621_v60 = vrot.slane %v487_v48, 1  ;;  %v386_v63 = vpop.permute.xlu1 %385 }
 0x137   :  { %6259 = vst [vmem:[#allocation40_spill] sm:$0xff] %v4685_v17  ;;  %v4690_v30 = vadd.f32 %v1377_v42, %v1376_v58  ;;  %v1091_v56 = vsel %vm581_vm0, %v1089_v12, %v1090_v57  ;;  %v960_v0 = vmul.f32 %v4276_v1, %v231_v7  ;;  %v867_v26 = vmul.f32 %v4311_v5, %v376_v28 }
 0x138   :  { %v1602_v55 = vsel %vm1266_vm2, %v1555_v29, 0.0  ;;  %v1631_v36 = vsel %vm1270_vm1, %v1558_v35, 0.0  ;;  %v6260_v21 = vrot.slane %v4522_v13, 1  ;;  %v989_v53 = vmul.f32 %v4276_v1, %v376_v28 }
 0x139   :  { %v1456_v58 = vmul.f32 %v4685_v17, %v4685_v17  ;;  %v423_v57 = vmul.f32 %v4270_v23, %v4613_v50  ;;  %v620_v9 = vsel %vm581_vm0, %v618_v8, %v619_v34  ;;  %v516_v19 = vmul.f32 %v4238_v44, %v376_v28  ;;  %v381_v8 = vpop.permute.xlu0 %380 }
 0x13a   :  { %v4699_v25 = vadd.f32 %v6260_v21, %v899_v2  ;;  %v4708_v3 = vadd.f32 %v1091_v56, %v896_v33  ;;  %v6262_v35 = vrot.slane %v4511_v10, 1  ;;  %v838_v42 = vmul.f32 %v4311_v5, %v231_v7 }
 0x13b   :  { %v1135_v29 = vrot.slane %v989_v53, 1  ;;  %v4715_v2 = vadd.f32 %v1631_v36, %v4624_v31  ;;  %v425_v12 = vmul.f32 %v4270_v23, %v231_v7  ;;  %v1092_v50 = vrot.slane %v960_v0, 1 }
 0x13c   :  { %6261 = vst [vmem:[#allocation41_spill] sm:$0xff] %v4699_v25  ;;  %v623_v48 = vsel %vm581_vm0, %v621_v60, %v6262_v35  ;;  %v927_v34 = vadd.f32 %v867_v26, %v4424_v22  ;;  %v4719_v21 = vadd.f32 %v1602_v55, %v1601_v62  ;;  %v1337_v33 = vsel %vm1270_vm1, %v4685_v17, 0.0 }
 0x13d   :  { %v756_v10 = vadd.f32 %v620_v9, %v423_v57  ;;  %v4724_v60 = vmul.f32 %v4276_v1, %v806_v59  ;;  %v1458_v56 = vmul.f32 %v4699_v25, %v4699_v25  ;;  %v758_v31 = vadd.f32 %v623_v48, %v425_v12 }
 0x13e   :  { %v664_v36 = vrot.slane %v516_v19, 1  ;;  %v6263_v7 = vrot.slane %v4472_v20, 1  ;;  %v1562_v22 = vsel %vm1270_vm1, %v1456_v58, 0.0  ;;  %v1455_v62 = vmul.f32 %v4708_v3, %v4708_v3 }
 0x13f   :  { %v4735_v26 = vmul.f32 %v4311_v5, %v806_v59  ;;  %v898_v55 = vadd.f32 %v838_v42, %v756_v10  ;;  %v6264_v53 = vrot.slane %v4522_v13, 1  ;;  %v454_v9 = vmul.f32 %v4270_v23, %v376_v28 }
 0x140   :  { %v1136_v0 = vsel %vm581_vm0, %v6263_v7, %v1135_v29  ;;  %v4741_v19 = vadd.f32 %v1135_v29, %v927_v34  ;;  %v518_v20 = vmul.f32 %v4238_v44, %v386_v63  ;;  %v869_v48 = vmul.f32 %v4311_v5, %v386_v63  ;;  %v4768_v7 = vpop.permute.xlu1 %390 }
 0x141   :  { %v1094_v57 = vsel %vm581_vm0, %v1092_v50, %v6264_v53  ;;  %v4746_v58 = vadd.f32 %v1136_v0, %v4652_v40  ;;  %v991_v59 = vmul.f32 %v4276_v1, %v386_v63  ;;  %v1334_v13 = vsel %vm1266_vm2, %v4708_v3, 0.0  ;;  %v246_v35 = vpop.permute.xlu0 %245 }
 0x142   :  { %6265 = vst [vmem:[#allocation42_spill] sm:$0xff] %v4741_v19  ;;  %v4753_v42 = vadd.f32 %v4600_v16, %v758_v31  ;;  %v787_v28 = vadd.f32 %v664_v36, %v454_v9  ;;  %v4757_v29 = vsel %vm1270_vm1, %v4699_v25, 0.0  ;;  %v1559_v12 = vsel %vm1266_vm2, %v1455_v62, 0.0 }
 0x143   :  { %6266 = vst [vmem:[#allocation43_spill] sm:$0xff] %v4746_v58  ;;  %v4760_v50 = vadd.f32 %v1094_v57, %v898_v55  ;;  %v4763_v40 = vsel %vm1270_vm1, %v1458_v56, 0.0  ;;  %v6268_v34 = vrot.slane %v4469_v14, 1  ;;  %v1338_v16 = vsel %vm1270_vm1, %v4741_v19, 0.0 }
 0x144   :  { %v1486_v31 = vmul.f32 %v4741_v19, %v4741_v19  ;;  %v667_v0 = vrot.slane %v518_v20, 1  ;;  %v517_v62 = vmul.f32 %v4238_v44, %v381_v8  ;;  %v1335_v55 = vsel %vm1266_vm2, %v4746_v58, 0.0 }
 0x145   :  { %6267 = vst [vmem:[#allocation44_spill] sm:$0xff] %v4760_v50  ;;  %v665_v10 = vsel %vm581_vm0, %v6268_v34, %v664_v36  ;;  %v1485_v56 = vmul.f32 %v4746_v58, %v4746_v58  ;;  %v929_v14 = vadd.f32 %v869_v48, %v787_v28  ;;  %v1138_v53 = vrot.slane %v991_v59, 1 }
 0x146   :  { %v786_v36 = vadd.f32 %v665_v10, %v4453_v45  ;;  %v666_v57 = vrot.slane %v517_v62, 1  ;;  %v868_v9 = vmul.f32 %v4311_v5, %v381_v8  ;;  %v990_v34 = vmul.f32 %v4276_v1, %v381_v8 }
 0x147   :  { %v4784_v20 = vsel %vm1266_vm2, %v4760_v50, 0.0  ;;  %v1457_v4 = vmul.f32 %v4760_v50, %v4760_v50  ;;  %v1339_v37 = vadd.f32 %v1338_v16, %v1337_v33  ;;  %v456_v19 = vmul.f32 %v4270_v23, %v386_v63 }
 0x148   :  { %v1336_v48 = vadd.f32 %v1335_v55, %v1334_v13  ;;  %v1563_v59 = vsel %vm1270_vm1, %v1486_v31, 0.0  ;;  %v928_v45 = vadd.f32 %v868_v9, %v786_v36  ;;  %v1137_v28 = vrot.slane %v990_v34, 1 }
 0x149   :  { %v1560_v10 = vsel %vm1266_vm2, %v1485_v56, 0.0  ;;  %v789_v62 = vadd.f32 %v667_v0, %v456_v19  ;;  %v668_v58 = vsel %vm581_vm0, %v666_v57, %v667_v0  ;;  %v992_v25 = vmul.f32 %v4276_v1, %v4768_v7 }
 0x14a   :  { %v4794_v17 = vadd.f32 %v1138_v53, %v929_v14  ;;  %v455_v50 = vmul.f32 %v4270_v23, %v381_v8  ;;  %v1139_v33 = vsel %vm581_vm0, %v1137_v28, %v1138_v53  ;;  %v870_v63 = vmul.f32 %v4311_v5, %v4768_v7  ;;  %v796_v28 = vpop.permute.xlu0 %795 }
 0x14b   :  { %v1565_v13 = vsel %vm1266_vm2, %v1457_v4, 0.0  ;;  %v1564_v16 = vadd.f32 %v1563_v59, %v1562_v22  ;;  %v4801_v31 = vadd.f32 %v1139_v33, %v928_v45  ;;  %v1140_v19 = vrot.slane %v992_v25, 1  ;;  %v801_v22 = vpop.permute.xlu1 %800 }
 0x14c   :  { %v788_v55 = vadd.f32 %v668_v58, %v455_v50  ;;  %v490_v0 = vmul.f32 %v4238_v44, %v246_v35  ;;  %v841_v56 = vmul.f32 %v4311_v5, %v246_v35  ;;  %v963_v14 = vmul.f32 %v4276_v1, %v246_v35 }
 0x14d   :  { %v4807_v8 = vsel %vm1266_vm2, %v1336_v48, 0.0  ;;  %v4810_v53 = vsel %vm1270_vm1, %v1339_v37, 0.0  ;;  %v1561_v36 = vadd.f32 %v1560_v10, %v1559_v12  ;;  %v931_v4 = vadd.f32 %v4683_v43, %v789_v62 }
 0x14e   :  { %v1488_v25 = vmul.f32 %v4794_v17, %v4794_v17  ;;  %v930_v58 = vadd.f32 %v870_v63, %v788_v55  ;;  %v625_v50 = vrot.slane %v490_v0, 1  ;;  %v901_v57 = vadd.f32 %v841_v56, %v4554_v38 }
 0x14f   :  { %v1487_v9 = vmul.f32 %v4801_v31, %v4801_v31  ;;  %v519_v34 = vmul.f32 %v4238_v44, %v4768_v7  ;;  %v6269_v37 = vrot.slane %v4668_v46, 1  ;;  %v1096_v48 = vrot.slane %v963_v14, 1 }
 0x150   :  { %v4824_v43 = vsel %vm1270_vm1, %v1564_v16, 0.0  ;;  %v428_v59 = vmul.f32 %v4270_v23, %v246_v35  ;;  %v843_v45 = vmul.f32 %v4311_v5, %v801_v22  ;;  %v965_v38 = vmul.f32 %v4276_v1, %v801_v22 }
 0x151   :  { %v1142_v12 = vsel %vm581_vm0, %v1140_v19, %v6269_v37  ;;  %v4830_v10 = vsel %vm1266_vm2, %v1561_v36, 0.0  ;;  %v6270_v44 = vmov %v6269_v37  ;;  %v6271_v33 = vrot.slane %v4603_v49, 1 }
 0x152   :  { %v4834_v62 = vadd.f32 %v6270_v44, %v931_v4  ;;  %v4839_v16 = vadd.f32 %v1096_v48, %v901_v57  ;;  %v1344_v35 = vsel %vm1270_vm1, %v4794_v17, 0.0  ;;  %v4843_v19 = vadd.f32 %v1142_v12, %v930_v58 }
 0x153   :  { %v1097_v63 = vsel %vm581_vm0, %v6271_v33, %v1096_v48  ;;  %v761_v0 = vadd.f32 %v625_v50, %v428_v59  ;;  %v1569_v56 = vsel %vm1270_vm1, %v1488_v25, 0.0  ;;  %v1341_v46 = vsel %vm1266_vm2, %v4801_v31, 0.0 }
 0x154   :  { %v4846_v55 = vadd.f32 %v1097_v63, %v4753_v42  ;;  %v1566_v49 = vsel %vm1266_vm2, %v1487_v9, 0.0  ;;  %v669_v14 = vrot.slane %v519_v34, 1  ;;  %v1099_v4 = vrot.slane %v965_v38, 1 }
 0x155   :  { %v903_v36 = vadd.f32 %v843_v45, %v761_v0  ;;  %v6272_v22 = vrot.slane %v4575_v32, 1  ;;  %v964_v58 = vmul.f32 %v4276_v1, %v796_v28  ;;  %v1345_v42 = vadd.f32 %v1344_v35, %v4757_v29 }
 0x156   :  { %v1490_v37 = vmul.f32 %v4834_v62, %v4834_v62  ;;  %v1460_v25 = vmul.f32 %v4839_v16, %v4839_v16  ;;  %v842_v12 = vmul.f32 %v4311_v5, %v796_v28  ;;  %v457_v9 = vmul.f32 %v4270_v23, %v4768_v7 }
 0x157   :  { %v626_v57 = vsel %vm581_vm0, %v6272_v22, %v625_v50  ;;  %v1489_v32 = vmul.f32 %v4843_v19, %v4843_v19  ;;  %v1459_v50 = vmul.f32 %v4846_v55, %v4846_v55  ;;  %v1098_v34 = vrot.slane %v964_v58, 1 }
 0x158   :  { %v1570_v29 = vadd.f32 %v1569_v56, %v4763_v40  ;;  %v1342_v48 = vadd.f32 %v1341_v46, %v4784_v20  ;;  %v1567_v59 = vadd.f32 %v1566_v49, %v1565_v13  ;;  %v760_v45 = vadd.f32 %v626_v57, %v4585_v27  ;;  %v811_v56 = vpop.permute.xlu0 %810 }
 0x159   :  { %v6273_v38 = vrot.slane %v4659_v39, 1  ;;  %v1347_v23 = vsel %vm1266_vm2, %v4843_v19, 0.0  ;;  %v1350_v7 = vsel %vm1270_vm1, %v4834_v62, 0.0  ;;  %v1235_v44 = vadd.f32 %v1099_v4, %v903_v36 }
 0x15a   :  { %v1346_v33 = vsel %vm1266_vm2, %v4846_v55, 0.0  ;;  %v1349_v40 = vsel %vm1270_vm1, %v4839_v16, 0.0  ;;  %v1574_v20 = vsel %vm1270_vm1, %v1460_v25, 0.0  ;;  %v902_v27 = vadd.f32 %v842_v12, %v760_v45 }
 0x15b   :  { %v671_v28 = vsel %vm581_vm0, %v669_v14, %v6273_v38  ;;  %v1572_v13 = vsel %vm1266_vm2, %v1489_v32, 0.0  ;;  %v1575_v63 = vsel %vm1270_vm1, %v1490_v37, 0.0  ;;  %v1571_v35 = vsel %vm1266_vm2, %v1459_v50, 0.0 }
 0x15c   :  { %v1100_v0 = vsel %vm581_vm0, %v1098_v34, %v1099_v4  ;;  %v1381_v46 = vsel %vm1266_vm2, %v1342_v48, 0.0  ;;  %v1606_v49 = vsel %vm1266_vm2, %v1567_v59, 0.0  ;;  %v790_v14 = vadd.f32 %v671_v28, %v457_v9 }
 0x15d   :  { %v1348_v36 = vadd.f32 %v1347_v23, %v1346_v33  ;;  %v1351_v22 = vadd.f32 %v1350_v7, %v1349_v40  ;;  %v1576_v57 = vadd.f32 %v1575_v63, %v1574_v20  ;;  %v1462_v58 = vmul.f32 %v1235_v44, %v1235_v44 }
 0x15e   :  { %v1573_v25 = vadd.f32 %v1572_v13, %v1571_v35  ;;  %v1234_v12 = vadd.f32 %v1100_v0, %v902_v27  ;;  %v6274_v32 = vmov %v6273_v38  ;;  %v873_v50 = vmul.f32 %v4311_v5, %v811_v56 }
 0x15f   :  { %v791_v37 = vadd.f32 %v6274_v32, %v4655_v6  ;;  %v1355_v4 = vsel %vm1270_vm1, %v1235_v44, 0.0  ;;  %v1410_v34 = vsel %vm1270_vm1, %v1345_v42, 0.0  ;;  %v3372_v48 = vmov 450.0  }
 0x160   :  { %3333 = vrcp.f32 %v3372_v48  ;;  %v995_v9 = vmul.f32 %v4276_v1, %v811_v56  ;;  %v932_v59 = vadd.f32 %v4735_v26, %v790_v14  ;;  %v1380_v45 = vadd.f32 %v4807_v8, %v4690_v30 }
 0x161   :  { %v1409_v38 = vadd.f32 %v4810_v53, %v4687_v51  ;;  %v933_v39 = vadd.f32 %v873_v50, %v791_v37  ;;  %v1580_v6 = vsel %vm1270_vm1, %v1462_v58, 0.0  ;;  %v1383_v5 = vsel %vm1266_vm2, %v1348_v36, 0.0 }
 0x162   :  { %v1412_v28 = vsel %vm1270_vm1, %v1351_v22, 0.0  ;;  %v1144_v42 = vrot.slane %v995_v9, 1  ;;  %v1352_v23 = vsel %vm1266_vm2, %v1234_v12, 0.0  ;;  %v1382_v7 = vadd.f32 %v1381_v46, %v1380_v45 }
 0x163   :  { %v1411_v1 = vadd.f32 %v1410_v34, %v1409_v38  ;;  %v1605_v26 = vadd.f32 %v4830_v10, %v4719_v21  ;;  %v1461_v44 = vmul.f32 %v1234_v12, %v1234_v12  ;;  %v1608_v30 = vsel %vm1266_vm2, %v1573_v25, 0.0 }
 0x164   :  { %v6275_v51 = vrot.slane %v4724_v60, 1  ;;  %v1265_v53 = vadd.f32 %v1144_v42, %v933_v39  ;;  %v1384_v33 = vadd.f32 %v1383_v5, %v1382_v7  ;;  %v1635_v20 = vsel %vm1270_vm1, %v1570_v29, 0.0 }
 0x165   :  { %v1413_v40 = vadd.f32 %v1412_v28, %v1411_v1  ;;  %v1607_v63 = vadd.f32 %v1606_v49, %v1605_v26  ;;  %v1634_v35 = vadd.f32 %v4824_v43, %v4715_v2  ;;  %v1637_v0 = vsel %vm1270_vm1, %v1576_v57, 0.0 }
 0x166   :  { %v1145_v8 = vsel %vm581_vm0, %v6275_v51, %v1144_v42  ;;  %v3334_v13 = vpop.eup %3333  ;;  %v1356_v21 = vsel %vm1270_vm1, %v1265_v53, 0.0  ;;  %v1492_v10 = vmul.f32 %v1265_v53, %v1265_v53  ;;  %v1577_v14 = vsel %vm1266_vm2, %v1461_v44, 0.0 }
 0x167   :  { %v1264_v27 = vadd.f32 %v1145_v8, %v932_v59  ;;  %v1357_v56 = vadd.f32 %v1356_v21, %v1355_v4  ;;  %v1636_v36 = vadd.f32 %v1635_v20, %v1634_v35  ;;  %v1426_v58 = vmul.f32 450.0, %v3334_v13 }
 0x168   :  { %v1581_v29 = vsel %vm1270_vm1, %v1492_v10, 0.0  ;;  %v1609_v37 = vadd.f32 %v1608_v30, %v1607_v63  ;;  %vm1430_vm3 = vweird.f32 %v3334_v13  ;;  %vm2678_vm0 = vcmask 1044480  }
 0x169   :  { %v1353_v60 = vsel %vm1266_vm2, %v1264_v27, 0.0  ;;  %v1491_v46 = vmul.f32 %v1264_v27, %v1264_v27  ;;  %v1414_v49 = vsel %vm1270_vm1, %v1357_v56, 0.0  ;;  %v1582_v43 = vadd.f32 %v1581_v29, %v1580_v6  ;;  %v1653_v29 = vld [vmem:[%s6125_s2] sm:$0x1]  ;;  %s3373_s2 = smov 64  }
 0x16a   :  { %v1354_v22 = vadd.f32 %v1353_v60, %v1352_v23  ;;  %v1638_v25 = vadd.f32 %v1637_v0, %v1636_v36  ;;  %v1415_v57 = vadd.f32 %v1414_v49, %v1413_v40  ;;  %v1427_v59 = vsub.f32 1.0, %v1426_v58 }
 0x16b   :  { %v1578_v2 = vsel %vm1266_vm2, %v1491_v46, 0.0  ;;  %v1639_v4 = vsel %vm1270_vm1, %v1582_v43, 0.0 }
 0x16c   :  { %v1385_v12 = vsel %vm1266_vm2, %v1354_v22, 0.0  ;;  %v1579_v32 = vadd.f32 %v1578_v2, %v1577_v14  ;;  %v1417_v34 = vsel %vm1270_vm1, %v1415_v57, 0.0  ;;  %v1640_v9 = vadd.f32 %v1639_v4, %v1638_v25  ;;  %v1666_v2 = vld [vmem:[%s6126_s3] sm:$0x1]  ;;  %s3374_s3 = smov 32  }
 0x16d   :  { %v1386_v50 = vadd.f32 %v1385_v12, %v1384_v33  ;;  %v1428_v23 = vmul.f32 %v3334_v13, %v1427_v59 }
 0x16e   :  { %v1610_v48 = vsel %vm1266_vm2, %v1579_v32, 0.0  ;;  %v1642_v6 = vsel %vm1270_vm1, %v1640_v9, 0.0  ;;  %v6277_v9 = vld [vmem:[#allocation11_spill] sm:$0xff]  ;;  %vm2693_vm1 = vcmask 1045504  }
 0x16f   :  { %v1416_v45 = vsel %vm1266_vm2, %v1386_v50, 0.0  ;;  %v1611_v38 = vadd.f32 %v1610_v48, %v1609_v37  ;;  %v1429_v30 = vadd.f32 %v3334_v13, %v1428_v23 }
 0x170   :  { %v1418_v39 = vadd.f32 %v1417_v34, %v1416_v45  ;;  %v6276_v34 = vld [vmem:[#allocation9_spill] sm:$0xff]  ;;  %v6278_v45 = vld [vmem:[#allocation10_spill] sm:$0xff] }
 0x171   :  { %v1641_v5 = vsel %vm1266_vm2, %v1611_v38, 0.0  ;;  %v1431_v40 = vsel %vm1430_vm3, %v3334_v13, %v1429_v30  ;;  %v6279_v38 = vld [vmem:[#allocation19_spill] sm:$0xff]  ;;  %v6286_v30 = vld [vmem:[#allocation30_spill] sm:$0xff]  ;;  %vm2856_vm3 = vcmask 523264  }
 0x172   :  { %v1419_v28 = vrot.slane %v1418_v39, 4  ;;  %v1643_v42 = vadd.f32 %v1642_v6, %v1641_v5  ;;  %v6281_v6 = vld [vmem:[#allocation22_spill] sm:$0xff]  ;;  %v6282_v5 = vld [vmem:[#allocation20_spill] sm:$0xff] }
 0x174   :  { %v1420_v7 = vadd.f32 %v1419_v28, %v1418_v39  ;;  %v1644_v1 = vrot.slane %v1643_v42, 4  ;;  %v6280_v39 = vld [vmem:[#allocation18_spill] sm:$0xff] }
 0x176   :  { %v1421_v26 = vrot.slane %v1420_v7, 2  ;;  %v1645_v44 = vadd.f32 %v1644_v1, %v1643_v42  ;;  %v6283_v42 = vld [vmem:[#allocation23_spill] sm:$0xff] }
 0x178   :  { %v1422_v51 = vadd.f32 %v1421_v26, %v1420_v7  ;;  %v1646_v8 = vrot.slane %v1645_v44, 2  ;;  %v6284_v7 = vld [vmem:[#allocation21_spill] sm:$0xff]  ;;  %v6285_v26 = vld [vmem:[#allocation31_spill] sm:$0xff] }
 0x17a   :  { %v1423_v53 = vrot.slane %v1422_v51, 1  ;;  %v1647_v33 = vadd.f32 %v1646_v8, %v1645_v44  ;;  %v6287_v8 = vld [vmem:[#allocation33_spill] sm:$0xff] }
 0x17c   :  { %v1424_v20 = vadd.f32 %v1423_v53, %v1422_v51  ;;  %v1648_v27 = vrot.slane %v1647_v33, 1 }
 0x17e   :  { %v1432_v63 = vmul.f32 %v1431_v40, %v1424_v20  ;;  %v1649_v35 = vadd.f32 %v1648_v27, %v1647_v33  ;;  %v6288_v33 = vld [vmem:[#allocation32_spill] sm:$0xff] }
 0x180   :  { %v1650_v21 = vmul.f32 %v1649_v35, %v1431_v40  ;;  %v1651_v10 = vmul.f32 %v1432_v63, %v1432_v63 }
 0x182   :  { %v1652_v0 = vsub.f32 %v1650_v21, %v1651_v10  ;;  %v6289_v10 = vld [vmem:[#allocation40_spill] sm:$0xff] }
 0x184   :  { %v1654_v60 = vadd.f32 1e-05, %v1652_v0 }
 0x186   :  { %3335 = vrsqrt.f32 %v1654_v60  ;;  %vm1661_vm5 = vweird.f32 %v1654_v60 }
 0x18c   :  { %v3336_v56 = vpop.eup %3335 }
 0x18d   :  { %v1656_v46 = vmul.f32 %v3336_v56, %v1654_v60  ;;  %vm1662_vm4 = vweird.f32 %v3336_v56  ;;  %v6290_v60 = vld [vmem:[#allocation44_spill] sm:$0xff] }
 0x18e   :  { %vm1663_vm6 = vmor %vm1661_vm5, %vm1662_vm4  ;;  %vm2869_vm4 = vcmask 785408  }
 0x18f   :  { %v1657_v14 = vmul.f32 %v3336_v56, %v1656_v46 }
 0x191   :  { %v1658_v36 = vmul.f32 0.5, %v1657_v14 }
 0x193   :  { %v1659_v22 = vsub.f32 1.5, %v1658_v36 }
 0x195   :  { %v1660_v13 = vmul.f32 %v3336_v56, %v1659_v22  ;;  %v6297_v22 = vld [vmem:[#allocation8_spill] sm:$0xff] }
 0x197   :  { %v1664_v58 = vsel %vm1663_vm6, %v3336_v56, %v1660_v13  ;;  %v6299_v13 = vld [vmem:[#allocation6_spill] sm:$0xff] }
 0x198   :  { %v1665_v49 = vmul.f32 %v1664_v58, %v1653_v29 }
 0x19a   :  { %v1667_v43 = vmul.f32 %v1665_v49, %v1432_v63  ;;  %v1670_v25 = vperm.slane %v1665_v49, 0  ;;  %v6301_v49 = vld [vmem:[#allocation13_spill] sm:$0xff] }
 0x19c   :  { %v1668_v12 = vsub.f32 %v1666_v2, %v1667_v43  ;;  %v4935_v57 = vmul.f32 %v1670_v25, %v3665_v47  ;;  %v4938_v32 = vmul.f32 %v1670_v25, %v3654_v41  ;;  %v4941_v37 = vmul.f32 %v1670_v25, %v3813_v52  ;;  %v6302_v43 = vld [vmem:[#allocation12_spill] sm:$0xff] }
 0x19d   :  { %v4944_v50 = vmul.f32 %v1670_v25, %v3805_v15  ;;  %v4947_v4 = vmul.f32 %v1670_v25, %v3900_v24  ;;  %v4950_v48 = vmul.f32 %v1670_v25, %v6276_v34  ;;  %v4953_v59 = vmul.f32 %v1670_v25, %v6277_v9 }
 0x19e   :  { %v4955_v47 = vperm.slane %v1668_v12, 0  ;;  %v4958_v41 = vmul.f32 %v1670_v25, %v6278_v45  ;;  %v4961_v52 = vmul.f32 %v1670_v25, %v6279_v38  ;;  %v4964_v15 = vmul.f32 %v1670_v25, %v6280_v39  ;;  %v6303_v12 = vld [vmem:[#allocation16_spill] sm:$0xff]  ;;  %v6305_v45 = vld [vmem:[#allocation17_spill] sm:$0xff]  ;;  %v6307_v39 = vld [vmem:[#allocation15_spill] sm:$0xff] }
 0x19f   :  { %v4967_v24 = vmul.f32 %v1670_v25, %v6281_v6  ;;  %v4970_v28 = vmul.f32 %v1670_v25, %v6282_v5  ;;  %v4973_v23 = vmul.f32 %v1670_v25, %v6283_v42  ;;  %v4976_v1 = vmul.f32 %v1670_v25, %v6284_v7  ;;  %v6309_v5 = vld [vmem:[#allocation25_spill] sm:$0xff]  ;;  %v6311_v7 = vld [vmem:[#allocation24_spill] sm:$0xff] }
 0x1a0   :  { %v4979_v44 = vmul.f32 %v1670_v25, %v6285_v26  ;;  %v4982_v51 = vmul.f32 %v1670_v25, %v6286_v30  ;;  %v4985_v53 = vmul.f32 %v1670_v25, %v6287_v8  ;;  %v4988_v40 = vmul.f32 %v1670_v25, %v6288_v33  ;;  %v6313_v30 = vld [vmem:[#allocation27_spill] sm:$0xff]  ;;  %v6314_v33 = vld [vmem:[#allocation26_spill] sm:$0xff] }
 0x1a1   :  { %v4991_v20 = vmul.f32 %v1670_v25, %v4507_v11  ;;  %v4994_v27 = vmul.f32 %v1670_v25, %v4443_v18  ;;  %v4997_v63 = vmul.f32 %v1670_v25, %v4628_v61  ;;  %v5000_v35 = vmul.f32 %v1670_v25, %v4619_v54  ;;  %v6291_v11 = vld [vmem:[#allocation41_spill] sm:$0xff]  ;;  %v6293_v54 = vld [vmem:[#allocation7_spill] sm:$0xff] }
 0x1a2   :  { %v5003_v21 = vmul.f32 %v1670_v25, %v4708_v3  ;;  %v5006_v0 = vmul.f32 %v1670_v25, %v6289_v10  ;;  %v5009_v56 = vmul.f32 %v1670_v25, %v6290_v60  ;;  %v5012_v46 = vmul.f32 %v1670_v25, %v6291_v11  ;;  %v6295_v3 = vld [vmem:[#allocation5_spill] sm:$0xff] }
 0x1a3   :  { %v5015_v18 = vmul.f32 %v1670_v25, %v4846_v55  ;;  %v5018_v61 = vmul.f32 %v1670_v25, %v4839_v16  ;;  %v5021_v14 = vmul.f32 %v1670_v25, %v6293_v54  ;;  %v5024_v36 = vmul.f32 %v1670_v25, %v6295_v3  ;;  %v6304_v16 = vld [vmem:[#allocation14_spill] sm:$0xff]  ;;  %v6315_v60 = vld [vmem:[#allocation29_spill] sm:$0xff]  ;;  %v6316_v54 = vld [vmem:[#allocation28_spill] sm:$0xff] }
 0x1a4   :  { %v5027_v29 = vmul.f32 %v1670_v25, %v6297_v22  ;;  %v5030_v58 = vmul.f32 %v1670_v25, %v6299_v13  ;;  %v1704_v2 = vmul.f32 %v1670_v25, %v6301_v49  ;;  %v1705_v55 = vmul.f32 %v1670_v25, %v6302_v43  ;;  %v6317_v22 = vld [vmem:[#allocation34_spill] sm:$0xff]  ;;  %v6319_v49 = vld [vmem:[#allocation35_spill] sm:$0xff] }
 0x1a5   :  { %6292 = vst [vmem:[#allocation9_spill] sm:$0xff] %v5018_v61  ;;  %v1706_v34 = vmul.f32 %v1670_v25, %v6303_v12  ;;  %v1707_v9 = vmul.f32 %v1670_v25, %v6304_v16  ;;  %v5037_v38 = vmul.f32 %v1670_v25, %v6305_v45  ;;  %v5040_v6 = vmul.f32 %v1670_v25, %v6307_v39  ;;  %v6321_v12 = vld [vmem:[#allocation37_spill] sm:$0xff]  ;;  %v6323_v45 = vld [vmem:[#allocation36_spill] sm:$0xff] }
 0x1a6   :  { %6294 = vst [vmem:[#allocation11_spill] sm:$0xff] %v5021_v14  ;;  %v5043_v42 = vmul.f32 %v1670_v25, %v6309_v5  ;;  %v5046_v26 = vmul.f32 %v1670_v25, %v6311_v7  ;;  %v1712_v8 = vmul.f32 %v1670_v25, %v6313_v30  ;;  %v1713_v10 = vmul.f32 %v1670_v25, %v6314_v33  ;;  %v6325_v5 = vld [vmem:[#allocation39_spill] sm:$0xff]  ;;  %v6327_v30 = vld [vmem:[#allocation38_spill] sm:$0xff] }
 0x1a7   :  { %6296 = vst [vmem:[#allocation10_spill] sm:$0xff] %v5024_v36  ;;  %v1714_v11 = vmul.f32 %v1670_v25, %v6315_v60  ;;  %v1715_v3 = vmul.f32 %v1670_v25, %v6316_v54  ;;  %v5053_v13 = vmul.f32 %v1670_v25, %v6317_v22  ;;  %v5056_v43 = vmul.f32 %v1670_v25, %v6319_v49  ;;  %v6329_v60 = vld [vmem:[#allocation43_spill] sm:$0xff]  ;;  %v6331_v22 = vld [vmem:[#allocation42_spill] sm:$0xff] }
 0x1a8   :  { %6298 = vst [vmem:[#allocation19_spill] sm:$0xff] %v5027_v29  ;;  %v5059_v16 = vmul.f32 %v1670_v25, %v6321_v12  ;;  %v5062_v39 = vmul.f32 %v1670_v25, %v6323_v45  ;;  %v5065_v7 = vmul.f32 %v1670_v25, %v6325_v5  ;;  %v5068_v33 = vmul.f32 %v1670_v25, %v6327_v30 }
 0x1a9   :  { %6300 = vst [vmem:[#allocation18_spill] sm:$0xff] %v5030_v58  ;;  %v5071_v54 = vmul.f32 %v1670_v25, %v6329_v60  ;;  %v5077_v49 = vmul.f32 %v1670_v25, %v4801_v31  ;;  %v5080_v12 = vmul.f32 %v1670_v25, %v4794_v17  ;;  %v5083_v45 = vmul.f32 %v1670_v25, %v4843_v19 }
 0x1aa   :  { %6306 = vst [vmem:[#allocation22_spill] sm:$0xff] %v5037_v38  ;;  %v5086_v5 = vmul.f32 %v1670_v25, %v4834_v62  ;;  %v1763_v30 = vadd.f32 %v4955_v47, %v1704_v2  ;;  %v1764_v60 = vadd.f32 %v4955_v47, %v1705_v55  ;;  %v1771_v31 = vadd.f32 %v4955_v47, %v1712_v8 }
 0x1ab   :  { %6308 = vst [vmem:[#allocation20_spill] sm:$0xff] %v5040_v6  ;;  %v1773_v17 = vadd.f32 %v4955_v47, %v1714_v11  ;;  %v1774_v19 = vadd.f32 %v4955_v47, %v1715_v3 }
 0x1ac   :  { %6310 = vst [vmem:[#allocation23_spill] sm:$0xff] %v5043_v42 }
 0x1ad   :  { %6312 = vst [vmem:[#allocation21_spill] sm:$0xff] %v5046_v26  ;;  %v1830_v55 = vmax.f32 %v1774_v19, 0.0 }
 0x1ae   :  { %6318 = vst [vmem:[#allocation31_spill] sm:$0xff] %v5053_v13  ;;  %v5074_v13 = vmul.f32 %v1670_v25, %v6331_v22  ;;  %v1766_v22 = vadd.f32 %v4955_v47, %v1707_v9 }
 0x1af   :  { %6320 = vst [vmem:[#allocation30_spill] sm:$0xff] %v5056_v43 }
 0x1b0   :  { %6322 = vst [vmem:[#allocation33_spill] sm:$0xff] %v5059_v16  ;;  %v1822_v25 = vmax.f32 %v1766_v22, 0.0 }
 0x1b1   :  { %6324 = vst [vmem:[#allocation32_spill] sm:$0xff] %v5062_v39 }
 0x1b2   :  { %6326 = vst [vmem:[#allocation40_spill] sm:$0xff] %v5065_v7 }
 0x1b3   :  { %6328 = vst [vmem:[#allocation44_spill] sm:$0xff] %v5068_v33 }
 0x1b4   :  { %6330 = vst [vmem:[#allocation41_spill] sm:$0xff] %v5071_v54  ;;  %v1765_v54 = vadd.f32 %v4955_v47, %v1706_v34 }
 0x1b5   :  { %6332 = vst [vmem:[#allocation7_spill] sm:$0xff] %v5074_v13  ;;  %v1829_v13 = vmax.f32 %v1773_v17, 0.0 }
 0x1b6   :  { %6333 = vst [vmem:[#allocation5_spill] sm:$0xff] %v5077_v49  ;;  %v1772_v49 = vadd.f32 %v4955_v47, %v1713_v10  ;;  %v1821_v62 = vmax.f32 %v1765_v54, 0.0  ;;  %v1866_v10 = vsel %vm1846_vm7, %v1822_v25, -inf }
 0x1b7   :  { %6334 = vst [vmem:[#allocation8_spill] sm:$0xff] %v5080_v12  ;;  %v1820_v12 = vmax.f32 %v1764_v60, 0.0  ;;  %v1887_v54 = vsel %vm1266_vm2, %v1829_v13, -inf }
 0x1b8   :  { %6335 = vst [vmem:[#allocation6_spill] sm:$0xff] %v5083_v45  ;;  %v1819_v45 = vmax.f32 %v1763_v30, 0.0  ;;  %v1828_v2 = vmax.f32 %v1772_v49, 0.0  ;;  %v1863_v8 = vsel %vm1266_vm2, %v1821_v62, -inf  ;;  %v1890_v49 = vsel %vm1846_vm7, %v1830_v55, -inf }
 0x1b9   :  { %6336 = vst [vmem:[#allocation13_spill] sm:$0xff] %v5086_v5  ;;  %v1827_v5 = vmax.f32 %v1771_v31, 0.0  ;;  %v1865_v9 = vsel %vm1846_vm7, %v1820_v12, -inf }
 0x1ba   :  { %v1862_v34 = vsel %vm1266_vm2, %v1819_v45, -inf  ;;  %v1889_v3 = vsel %vm1846_vm7, %v1828_v2, -inf  ;;  %v5102_v60 = vmax.f32 %v1865_v9, %v1866_v10 }
 0x1bb   :  { %v1886_v11 = vsel %vm1266_vm2, %v1827_v5, -inf  ;;  %v1864_v30 = vmax.f32 %v1862_v34, %v1863_v8  ;;  %v5106_v31 = vmax.f32 %v1889_v3, %v1890_v49 }
 0x1bc   :  { %v1888_v22 = vmax.f32 %v1886_v11, %v1887_v54 }
 0x1bd   :  { %v1985_v12 = vsel %vm1928_vm8, %v1864_v30, -inf  ;;  %v2084_v45 = vsel %vm2027_vm9, %v1864_v30, -inf  ;;  %v2183_v5 = vsel %vm2126_vm10, %v1864_v30, -inf  ;;  %v2282_v17 = vsel %vm2225_vm11, %v1864_v30, -inf }
 0x1be   :  { %v1986_v19 = vrot.slane %v1985_v12, 4  ;;  %v1999_v62 = vsel %vm1928_vm8, %v1888_v22, -inf  ;;  %v2085_v25 = vrot.slane %v2084_v45, 4  ;;  %v2098_v13 = vsel %vm2027_vm9, %v1888_v22, -inf }
 0x1bf   :  { %v2000_v2 = vrot.slane %v1999_v62, 4  ;;  %v2099_v55 = vrot.slane %v2098_v13, 4  ;;  %v2184_v34 = vrot.slane %v2183_v5, 4  ;;  %v2197_v9 = vsel %vm2126_vm10, %v1888_v22, -inf }
 0x1c0   :  { %v1987_v8 = vmax.f32 %v1985_v12, %v1986_v19  ;;  %v2086_v10 = vmax.f32 %v2084_v45, %v2085_v25  ;;  %v2198_v11 = vrot.slane %v2197_v9, 4  ;;  %v2283_v3 = vrot.slane %v2282_v17, 4 }
 0x1c1   :  { %v2001_v54 = vmax.f32 %v1999_v62, %v2000_v2  ;;  %v2100_v49 = vmax.f32 %v2098_v13, %v2099_v55  ;;  %v2185_v33 = vmax.f32 %v2183_v5, %v2184_v34  ;;  %v2296_v30 = vsel %vm2225_vm11, %v1888_v22, -inf }
 0x1c2   :  { %v1988_v7 = vrot.slane %v1987_v8, 2  ;;  %v2087_v39 = vrot.slane %v2086_v10, 2  ;;  %v2199_v16 = vmax.f32 %v2197_v9, %v2198_v11  ;;  %v2284_v43 = vmax.f32 %v2282_v17, %v2283_v3 }
 0x1c3   :  { %v2002_v26 = vrot.slane %v2001_v54, 2  ;;  %v2101_v42 = vrot.slane %v2100_v49, 2  ;;  %v2186_v6 = vrot.slane %v2185_v33, 2  ;;  %v2297_v38 = vrot.slane %v2296_v30, 4 }
 0x1c4   :  { %v1989_v58 = vmax.f32 %v1987_v8, %v1988_v7  ;;  %v2088_v29 = vmax.f32 %v2086_v10, %v2087_v39  ;;  %v2200_v36 = vrot.slane %v2199_v16, 2  ;;  %v2285_v12 = vrot.slane %v2284_v43, 2 }
 0x1c5   :  { %v2003_v45 = vmax.f32 %v2001_v54, %v2002_v26  ;;  %v2102_v19 = vmax.f32 %v2100_v49, %v2101_v42  ;;  %v2187_v25 = vmax.f32 %v2185_v33, %v2186_v6  ;;  %v2298_v62 = vmax.f32 %v2296_v30, %v2297_v38 }
 0x1c6   :  { %v1990_v13 = vrot.slane %v1989_v58, 1  ;;  %v2089_v5 = vrot.slane %v2088_v29, 1  ;;  %v2201_v2 = vmax.f32 %v2199_v16, %v2200_v36  ;;  %v2286_v22 = vmax.f32 %v2284_v43, %v2285_v12 }
 0x1c7   :  { %v2004_v55 = vrot.slane %v2003_v45, 1  ;;  %v2103_v34 = vrot.slane %v2102_v19, 1  ;;  %v2188_v9 = vrot.slane %v2187_v25, 1  ;;  %v2299_v17 = vrot.slane %v2298_v62, 2 }
 0x1c8   :  { %v1991_v11 = vmax.f32 %v1989_v58, %v1990_v13  ;;  %v2090_v3 = vmax.f32 %v2088_v29, %v2089_v5  ;;  %v2202_v14 = vrot.slane %v2201_v2, 1  ;;  %v2287_v61 = vrot.slane %v2286_v22, 1 }
 0x1c9   :  { %v2005_v7 = vmax.f32 %v2003_v45, %v2004_v55  ;;  %v2104_v39 = vmax.f32 %v2102_v19, %v2103_v34  ;;  %v2189_v8 = vmax.f32 %v2187_v25, %v2188_v9  ;;  %v2300_v10 = vmax.f32 %v2298_v62, %v2299_v17 }
 0x1ca   :  { %v2203_v26 = vmax.f32 %v2201_v2, %v2202_v14  ;;  %v2288_v42 = vmax.f32 %v2286_v22, %v2287_v61  ;;  %v2380_v38 = vsel %vm1928_vm8, %v5102_v60, -inf  ;;  %v2394_v36 = vsel %vm1928_vm8, %v5106_v31, -inf }
 0x1cb   :  { %v2301_v6 = vrot.slane %v2300_v10, 1  ;;  %v2381_v43 = vrot.slane %v2380_v38, 4  ;;  %v2395_v16 = vrot.slane %v2394_v36, 4  ;;  %v2478_v29 = vsel %vm2027_vm9, %v5102_v60, -inf }
 0x1cc   :  { %v2479_v58 = vrot.slane %v2478_v29, 4  ;;  %v2492_v33 = vsel %vm2027_vm9, %v5106_v31, -inf  ;;  %v2576_v14 = vsel %vm2126_vm10, %v5102_v60, -inf  ;;  %v2590_v61 = vsel %vm2126_vm10, %v5106_v31, -inf }
 0x1cd   :  { %v2302_v54 = vmax.f32 %v2300_v10, %v2301_v6  ;;  %v2382_v49 = vmax.f32 %v2380_v38, %v2381_v43  ;;  %v2396_v30 = vmax.f32 %v2394_v36, %v2395_v16  ;;  %v2493_v12 = vrot.slane %v2492_v33, 4 }
 0x1ce   :  { %v2480_v45 = vmax.f32 %v2478_v29, %v2479_v58  ;;  %v2577_v19 = vrot.slane %v2576_v14, 4  ;;  %v2591_v25 = vrot.slane %v2590_v61, 4  ;;  %v2627_v2 = vsel %vm2618_vm12, %v1991_v11, %v2090_v3 }
 0x1cf   :  { %v2383_v62 = vrot.slane %v2382_v49, 2  ;;  %v2397_v13 = vrot.slane %v2396_v30, 2  ;;  %v2494_v5 = vmax.f32 %v2492_v33, %v2493_v12  ;;  %v2629_v60 = vsel %vm2618_vm12, %v2005_v7, %v2104_v39 }
 0x1d0   :  { %v2481_v22 = vrot.slane %v2480_v45, 2  ;;  %v2578_v55 = vmax.f32 %v2576_v14, %v2577_v19  ;;  %v2592_v34 = vmax.f32 %v2590_v61, %v2591_v25  ;;  %v2642_v6 = vsel %vm2633_vm13, %v2627_v2, %v2189_v8 }
 0x1d1   :  { %v2384_v9 = vmax.f32 %v2382_v49, %v2383_v62  ;;  %v2398_v31 = vmax.f32 %v2396_v30, %v2397_v13  ;;  %v2495_v17 = vrot.slane %v2494_v5, 2  ;;  %v2644_v58 = vsel %vm2633_vm13, %v2629_v60, %v2203_v26 }
 0x1d2   :  { %v2482_v10 = vmax.f32 %v2480_v45, %v2481_v22  ;;  %v2579_v38 = vrot.slane %v2578_v55, 2  ;;  %v2593_v36 = vrot.slane %v2592_v34, 2  ;;  %v2657_v61 = vsel %vm2648_vm14, %v2642_v6, %v2288_v42  ;;  %v6344_v6 = vld [vmem:[#allocation22_spill] sm:$0xff] }
 0x1d3   :  { %v2385_v43 = vrot.slane %v2384_v9, 1  ;;  %v2399_v16 = vrot.slane %v2398_v31, 1  ;;  %v2496_v29 = vmax.f32 %v2494_v5, %v2495_v17  ;;  %v2659_v45 = vsel %vm2648_vm14, %v2644_v58, %v2302_v54  ;;  %v6340_v17 = vld [vmem:[#allocation11_spill] sm:$0xff] }
 0x1d4   :  { %v2483_v11 = vrot.slane %v2482_v10, 1  ;;  %v2580_v3 = vmax.f32 %v2578_v55, %v2579_v38  ;;  %v2594_v33 = vmax.f32 %v2592_v34, %v2593_v36  ;;  %v5140_v42 = vadd.f32 %v4955_v47, %v4935_v57  ;;  %v6342_v38 = vld [vmem:[#allocation19_spill] sm:$0xff]  ;;  %v6343_v36 = vld [vmem:[#allocation18_spill] sm:$0xff] }
 0x1d5   :  { %v2386_v14 = vmax.f32 %v2384_v9, %v2385_v43  ;;  %v2400_v7 = vmax.f32 %v2398_v31, %v2399_v16  ;;  %v2497_v39 = vrot.slane %v2496_v29, 1  ;;  %v5144_v54 = vadd.f32 %v4955_v47, %v4938_v32  ;;  %v6346_v16 = vld [vmem:[#allocation20_spill] sm:$0xff]  ;;  %v6348_v58 = vld [vmem:[#allocation23_spill] sm:$0xff] }
 0x1d6   :  { %v2484_v49 = vmax.f32 %v2482_v10, %v2483_v11  ;;  %v2581_v30 = vrot.slane %v2580_v3, 1  ;;  %v2595_v12 = vrot.slane %v2594_v33, 1  ;;  %v5154_v55 = vadd.f32 %v4955_v47, %v4941_v37  ;;  %v6341_v10 = vld [vmem:[#allocation10_spill] sm:$0xff] }
 0x1d7   :  { %v2498_v8 = vmax.f32 %v2496_v29, %v2497_v39  ;;  %v2672_v25 = vsel %vm2663_vm15, %v2657_v61, %v2386_v14  ;;  %v2674_v62 = vsel %vm2663_vm15, %v2659_v45, %v2400_v7  ;;  %v5158_v34 = vadd.f32 %v4955_v47, %v4944_v50  ;;  %v6352_v14 = vld [vmem:[#allocation31_spill] sm:$0xff]  ;;  %v6353_v39 = vld [vmem:[#allocation30_spill] sm:$0xff] }
 0x1d8   :  { %v2582_v19 = vmax.f32 %v2580_v3, %v2581_v30  ;;  %v2596_v26 = vmax.f32 %v2594_v33, %v2595_v12  ;;  %v2687_v13 = vsel %vm2678_vm0, %v2672_v25, %v2484_v49  ;;  %v5164_v32 = vadd.f32 %v4955_v47, %v4947_v4  ;;  %v6350_v3 = vld [vmem:[#allocation21_spill] sm:$0xff]  ;;  %v6355_v12 = vld [vmem:[#allocation32_spill] sm:$0xff] }
 0x1d9   :  { %v2689_v5 = vsel %vm2678_vm0, %v2674_v62, %v2498_v8  ;;  %v5168_v60 = vadd.f32 %v4955_v47, %v4950_v48  ;;  %v5172_v9 = vadd.f32 %v4955_v47, %v4953_v59  ;;  %v5176_v37 = vadd.f32 %v4955_v47, %v4958_v41  ;;  %v6354_v49 = vld [vmem:[#allocation33_spill] sm:$0xff]  ;;  %v6356_v8 = vld [vmem:[#allocation40_spill] sm:$0xff] }
 0x1da   :  { %v5147_v2 = vsel %vm2693_vm1, %v2687_v13, %v2582_v19  ;;  %v5150_v22 = vsel %vm2693_vm1, %v2689_v5, %v2596_v26  ;;  %v1739_v50 = vadd.f32 %v4955_v47, %v4961_v52  ;;  %v1740_v31 = vadd.f32 %v4955_v47, %v4964_v15  ;;  %v6358_v26 = vld [vmem:[#allocation44_spill] sm:$0xff]  ;;  %v6360_v62 = vld [vmem:[#allocation41_spill] sm:$0xff]  ;;  %v6362_v5 = vld [vmem:[#allocation7_spill] sm:$0xff] }
 0x1db   :  { %6337 = vst [vmem:[#allocation12_spill] sm:$0xff] %v5147_v2  ;;  %v3248_v57 = vpack.i.bf16 %v5150_v22, %v5147_v2  ;;  %v1741_v4 = vadd.f32 %v4955_v47, %v4967_v24  ;;  %v1742_v48 = vadd.f32 %v4955_v47, %v4970_v28  ;;  %v5189_v59 = vadd.f32 %v4955_v47, %v4973_v23 }
 0x1dc   :  { %6338 = vst [vmem:[#allocation16_spill] sm:$0xff] %v5150_v22  ;;  %v5193_v41 = vadd.f32 %v4955_v47, %v4976_v1  ;;  %v5197_v52 = vadd.f32 %v4955_v47, %v4979_v44  ;;  %v5201_v15 = vadd.f32 %v4955_v47, %v4982_v51  ;;  %v5205_v24 = vadd.f32 %v4955_v47, %v4985_v53 }
 0x1dd   :  { %3249 = vrot.lane.b32.xlu1 %v3248_v57, %s3373_s2  ;;  %v5209_v28 = vadd.f32 %v4955_v47, %v4988_v40  ;;  %v5213_v23 = vadd.f32 %v4955_v47, %v4991_v20  ;;  %v5217_v1 = vadd.f32 %v4955_v47, %v4994_v27  ;;  %v5221_v44 = vadd.f32 %v4955_v47, %v4997_v63 }
 0x1de   :  { %v5225_v51 = vadd.f32 %v4955_v47, %v5000_v35  ;;  %v5229_v53 = vadd.f32 %v4955_v47, %v5003_v21  ;;  %v5233_v40 = vadd.f32 %v4955_v47, %v5006_v0  ;;  %v5237_v20 = vadd.f32 %v4955_v47, %v5009_v56  ;;  %v6339_v35 = vld [vmem:[#allocation9_spill] sm:$0xff] }
 0x1df   :  { %v5241_v27 = vadd.f32 %v4955_v47, %v5012_v46  ;;  %v5245_v63 = vadd.f32 %v4955_v47, %v5015_v18  ;;  %v5249_v21 = vadd.f32 %v4955_v47, %v6339_v35  ;;  %v5253_v0 = vadd.f32 %v4955_v47, %v6340_v17  ;;  %v6364_v35 = vld [vmem:[#allocation5_spill] sm:$0xff] }
 0x1e0   :  { %v5257_v56 = vadd.f32 %v4955_v47, %v6341_v10  ;;  %v5261_v46 = vadd.f32 %v4955_v47, %v6342_v38  ;;  %v5265_v18 = vadd.f32 %v4955_v47, %v6343_v36  ;;  %v5269_v43 = vadd.f32 %v4955_v47, %v6344_v6  ;;  %v6366_v10 = vld [vmem:[#allocation8_spill] sm:$0xff]  ;;  %v6368_v36 = vld [vmem:[#allocation6_spill] sm:$0xff] }
 0x1e1   :  { %v5273_v29 = vadd.f32 %v4955_v47, %v6346_v16  ;;  %v5277_v11 = vadd.f32 %v4955_v47, %v6348_v58  ;;  %v5281_v33 = vadd.f32 %v4955_v47, %v6350_v3  ;;  %v1775_v7 = vadd.f32 %v4955_v47, %v6352_v14  ;;  %v6370_v16 = vld [vmem:[#allocation13_spill] sm:$0xff] }
 0x1e2   :  { %6345 = vst [vmem:[#allocation14_spill] sm:$0xff] %v5269_v43  ;;  %v1776_v61 = vadd.f32 %v4955_v47, %v6353_v39  ;;  %v1777_v30 = vadd.f32 %v4955_v47, %v6354_v49  ;;  %v1778_v45 = vadd.f32 %v4955_v47, %v6355_v12  ;;  %v5293_v19 = vadd.f32 %v4955_v47, %v6356_v8 }
 0x1e3   :  { %6347 = vst [vmem:[#allocation17_spill] sm:$0xff] %v5273_v29  ;;  %v5297_v25 = vadd.f32 %v4955_v47, %v6358_v26  ;;  %v5301_v13 = vadd.f32 %v4955_v47, %v6360_v62  ;;  %v5305_v57 = vadd.f32 %v4955_v47, %v6362_v5  ;;  %v5309_v17 = vadd.f32 %v4955_v47, %v6364_v35 }
 0x1e4   :  { %6349 = vst [vmem:[#allocation15_spill] sm:$0xff] %v5277_v11  ;;  %v5313_v38 = vadd.f32 %v4955_v47, %v6366_v10  ;;  %v5317_v6 = vadd.f32 %v4955_v47, %v6368_v36  ;;  %v5321_v58 = vadd.f32 %v4955_v47, %v6370_v16  ;;  %v1795_v3 = vmax.f32 %v1739_v50, 0.0 }
 0x1e5   :  { %6351 = vst [vmem:[#allocation25_spill] sm:$0xff] %v5281_v33  ;;  %v1796_v14 = vmax.f32 %v1740_v31, 0.0  ;;  %v1797_v39 = vmax.f32 %v1741_v4, 0.0  ;;  %v1798_v49 = vmax.f32 %v1742_v48, 0.0  ;;  %v1831_v12 = vmax.f32 %v1775_v7, 0.0 }
 0x1e6   :  { %6357 = vst [vmem:[#allocation24_spill] sm:$0xff] %v5293_v19  ;;  %v1832_v8 = vmax.f32 %v1776_v61, 0.0  ;;  %v1833_v26 = vmax.f32 %v1777_v30, 0.0  ;;  %v1834_v62 = vmax.f32 %v1778_v45, 0.0  ;;  %v1868_v5 = vsel %vm1266_vm2, %v1795_v3, -inf }
 0x1e7   :  { %6359 = vst [vmem:[#allocation27_spill] sm:$0xff] %v5297_v25  ;;  %v1869_v35 = vsel %vm1266_vm2, %v1797_v39, -inf  ;;  %v1871_v10 = vsel %vm1846_vm7, %v1796_v14, -inf  ;;  %v1872_v2 = vsel %vm1846_vm7, %v1798_v49, -inf  ;;  %v1898_v47 = vsel %vm1266_vm2, %v1831_v12, -inf }
 0x1e8   :  { %6361 = vst [vmem:[#allocation26_spill] sm:$0xff] %v5301_v13  ;;  %v1870_v36 = vmax.f32 %v1868_v5, %v1869_v35  ;;  %v1899_v50 = vsel %vm1266_vm2, %v1833_v26, -inf  ;;  %v5329_v31 = vmax.f32 %v1871_v10, %v1872_v2  ;;  %v1901_v48 = vsel %vm1846_vm7, %v1832_v8, -inf }
 0x1e9   :  { %6363 = vst [vmem:[#allocation29_spill] sm:$0xff] %v5305_v57  ;;  %v1900_v4 = vmax.f32 %v1898_v47, %v1899_v50  ;;  %v1902_v7 = vsel %vm1846_vm7, %v1834_v62, -inf }
 0x1ea   :  { %6365 = vst [vmem:[#allocation28_spill] sm:$0xff] %v5309_v17  ;;  %v5333_v61 = vmax.f32 %v1901_v48, %v1902_v7  ;;  %v1943_v30 = vsel %vm1928_vm8, %v1870_v36, -inf  ;;  %v2042_v45 = vsel %vm2027_vm9, %v1870_v36, -inf  ;;  %v2141_v16 = vsel %vm2126_vm10, %v1870_v36, -inf }
 0x1eb   :  { %6367 = vst [vmem:[#allocation34_spill] sm:$0xff] %v5313_v38  ;;  %v1944_v3 = vrot.slane %v1943_v30, 4  ;;  %v2006_v14 = vsel %vm1928_vm8, %v1900_v4, -inf  ;;  %v2043_v39 = vrot.slane %v2042_v45, 4  ;;  %v2105_v2 = vsel %vm2027_vm9, %v1900_v4, -inf }
 0x1ec   :  { %6369 = vst [vmem:[#allocation35_spill] sm:$0xff] %v5317_v6  ;;  %v2007_v49 = vrot.slane %v2006_v14, 4  ;;  %v2106_v12 = vrot.slane %v2105_v2, 4  ;;  %v2142_v26 = vrot.slane %v2141_v16, 4  ;;  %v2204_v8 = vsel %vm2126_vm10, %v1900_v4, -inf }
 0x1ed   :  { %6371 = vst [vmem:[#allocation37_spill] sm:$0xff] %v5321_v58  ;;  %v1945_v62 = vmax.f32 %v1943_v30, %v1944_v3  ;;  %v2044_v5 = vmax.f32 %v2042_v45, %v2043_v39  ;;  %v2205_v35 = vrot.slane %v2204_v8, 4  ;;  %v2240_v10 = vsel %vm2225_vm11, %v1870_v36, -inf }
 0x1ee   :  { %v2008_v47 = vmax.f32 %v2006_v14, %v2007_v49  ;;  %v2107_v50 = vmax.f32 %v2105_v2, %v2106_v12  ;;  %v2143_v48 = vmax.f32 %v2141_v16, %v2142_v26  ;;  %v2241_v7 = vrot.slane %v2240_v10, 4 }
 0x1ef   :  { %v1946_v22 = vrot.slane %v1945_v62, 2  ;;  %v2045_v58 = vrot.slane %v2044_v5, 2  ;;  %v2206_v6 = vmax.f32 %v2204_v8, %v2205_v35  ;;  %v2303_v38 = vsel %vm2225_vm11, %v1900_v4, -inf }
 0x1f0   :  { %v2009_v17 = vrot.slane %v2008_v47, 2  ;;  %v2108_v57 = vrot.slane %v2107_v50, 2  ;;  %v2144_v13 = vrot.slane %v2143_v48, 2  ;;  %v2242_v25 = vmax.f32 %v2240_v10, %v2241_v7 }
 0x1f1   :  { %v1947_v19 = vmax.f32 %v1945_v62, %v1946_v22  ;;  %v2046_v33 = vmax.f32 %v2044_v5, %v2045_v58  ;;  %v2207_v30 = vrot.slane %v2206_v6, 2  ;;  %v2304_v45 = vrot.slane %v2303_v38, 4 }
 0x1f2   :  { %v2010_v3 = vmax.f32 %v2008_v47, %v2009_v17  ;;  %v2109_v39 = vmax.f32 %v2107_v50, %v2108_v57  ;;  %v2145_v36 = vmax.f32 %v2143_v48, %v2144_v13  ;;  %v2243_v14 = vrot.slane %v2242_v25, 2 }
 0x1f3   :  { %v1948_v2 = vrot.slane %v1947_v19, 1  ;;  %v2047_v16 = vrot.slane %v2046_v33, 1  ;;  %v2208_v49 = vmax.f32 %v2206_v6, %v2207_v30  ;;  %v2305_v12 = vmax.f32 %v2303_v38, %v2304_v45 }
 0x1f4   :  { %v2011_v26 = vrot.slane %v2010_v3, 1  ;;  %v2110_v8 = vrot.slane %v2109_v39, 1  ;;  %v2146_v35 = vrot.slane %v2145_v36, 1  ;;  %v2244_v4 = vmax.f32 %v2242_v25, %v2243_v14 }
 0x1f5   :  { %v1949_v11 = vmax.f32 %v1947_v19, %v1948_v2  ;;  %v2048_v29 = vmax.f32 %v2046_v33, %v2047_v16  ;;  %v2209_v43 = vrot.slane %v2208_v49, 1  ;;  %v2306_v10 = vrot.slane %v2305_v12, 2 }
 0x1f6   :  { %v2012_v22 = vmax.f32 %v2010_v3, %v2011_v26  ;;  %v2111_v58 = vmax.f32 %v2109_v39, %v2110_v8  ;;  %v2147_v62 = vmax.f32 %v2145_v36, %v2146_v35  ;;  %v2245_v5 = vrot.slane %v2244_v4, 1 }
 0x1f7   :  { %v2210_v17 = vmax.f32 %v2208_v49, %v2209_v43  ;;  %v2307_v57 = vmax.f32 %v2305_v12, %v2306_v10  ;;  %v2338_v13 = vsel %vm1928_vm8, %v5329_v31, -inf  ;;  %v2401_v38 = vsel %vm1928_vm8, %v5333_v61, -inf }
 0x1f8   :  { %v2246_v6 = vmax.f32 %v2244_v4, %v2245_v5  ;;  %v2339_v47 = vrot.slane %v2338_v13, 4  ;;  %v2402_v50 = vrot.slane %v2401_v38, 4  ;;  %v2436_v33 = vsel %vm2027_vm9, %v5329_v31, -inf }
 0x1f9   :  { %v2308_v19 = vrot.slane %v2307_v57, 1  ;;  %v2437_v25 = vrot.slane %v2436_v33, 4  ;;  %v2499_v48 = vsel %vm2027_vm9, %v5333_v61, -inf  ;;  %v2534_v43 = vsel %vm2126_vm10, %v5329_v31, -inf }
 0x1fa   :  { %v2340_v7 = vmax.f32 %v2338_v13, %v2339_v47  ;;  %v2403_v30 = vmax.f32 %v2401_v38, %v2402_v50  ;;  %v2500_v45 = vrot.slane %v2499_v48, 4  ;;  %v2535_v3 = vrot.slane %v2534_v43, 4 }
 0x1fb   :  { %v2309_v39 = vmax.f32 %v2307_v57, %v2308_v19  ;;  %v2438_v36 = vmax.f32 %v2436_v33, %v2437_v25  ;;  %v2597_v14 = vsel %vm2126_vm10, %v5333_v61, -inf  ;;  %v2621_v2 = vsel %vm2618_vm12, %v1949_v11, %v2048_v29 }
 0x1fc   :  { %v2341_v16 = vrot.slane %v2340_v7, 2  ;;  %v2404_v49 = vrot.slane %v2403_v30, 2  ;;  %v2501_v12 = vmax.f32 %v2499_v48, %v2500_v45  ;;  %v2536_v26 = vmax.f32 %v2534_v43, %v2535_v3 }
 0x1fd   :  { %v2439_v8 = vrot.slane %v2438_v36, 2  ;;  %v2598_v35 = vrot.slane %v2597_v14, 4  ;;  %v2630_v4 = vsel %vm2618_vm12, %v2012_v22, %v2111_v58  ;;  %v2636_v31 = vsel %vm2633_vm13, %v2621_v2, %v2147_v62 }
 0x1fe   :  { %v2342_v10 = vmax.f32 %v2340_v7, %v2341_v16  ;;  %v2405_v5 = vmax.f32 %v2403_v30, %v2404_v49  ;;  %v2502_v13 = vrot.slane %v2501_v12, 2  ;;  %v2537_v57 = vrot.slane %v2536_v26, 2 }
 0x1ff   :  { %v2440_v38 = vmax.f32 %v2438_v36, %v2439_v8  ;;  %v2599_v47 = vmax.f32 %v2597_v14, %v2598_v35  ;;  %v2645_v61 = vsel %vm2633_vm13, %v2630_v4, %v2210_v17  ;;  %v2651_v29 = vsel %vm2648_vm14, %v2636_v31, %v2246_v6 }
 0x200   :  { %v2343_v11 = vrot.slane %v2342_v10, 1  ;;  %v2406_v50 = vrot.slane %v2405_v5, 1  ;;  %v2503_v33 = vmax.f32 %v2501_v12, %v2502_v13  ;;  %v2538_v19 = vmax.f32 %v2536_v26, %v2537_v57 }
 0x201   :  { %v2441_v25 = vrot.slane %v2440_v38, 1  ;;  %v2600_v48 = vrot.slane %v2599_v47, 2  ;;  %v2660_v22 = vsel %vm2648_vm14, %v2645_v61, %v2309_v39  ;;  %v1787_v58 = vmax.f32 %v5140_v42, 0.0 }
 0x202   :  { %v2344_v62 = vmax.f32 %v2342_v10, %v2343_v11  ;;  %v2407_v43 = vmax.f32 %v2405_v5, %v2406_v50  ;;  %v2504_v7 = vrot.slane %v2503_v33, 1  ;;  %v2539_v30 = vrot.slane %v2538_v19, 1 }
 0x203   :  { %v2442_v45 = vmax.f32 %v2440_v38, %v2441_v25  ;;  %v2601_v3 = vmax.f32 %v2599_v47, %v2600_v48  ;;  %v1791_v26 = vmax.f32 %v5164_v32, 0.0  ;;  %v1792_v4 = vmax.f32 %v5168_v60, 0.0 }
 0x204   :  { %v2505_v36 = vmax.f32 %v2503_v33, %v2504_v7  ;;  %v2540_v14 = vmax.f32 %v2538_v19, %v2539_v30  ;;  %v2666_v2 = vsel %vm2663_vm15, %v2651_v29, %v2344_v62  ;;  %v2675_v16 = vsel %vm2663_vm15, %v2660_v22, %v2407_v43  ;;  %v6381_v19 = vld [vmem:[#allocation29_spill] sm:$0xff]  ;;  %v6382_v33 = vld [vmem:[#allocation28_spill] sm:$0xff] }
 0x205   :  { %v2602_v49 = vrot.slane %v2601_v3, 1  ;;  %v2681_v39 = vsel %vm2678_vm0, %v2666_v2, %v2442_v45  ;;  %v1793_v31 = vmax.f32 %v5172_v9, 0.0  ;;  %v1794_v5 = vmax.f32 %v5176_v37, 0.0  ;;  %v6376_v2 = vld [vmem:[#allocation15_spill] sm:$0xff] }
 0x206   :  { %v2690_v8 = vsel %vm2678_vm0, %v2675_v16, %v2505_v36  ;;  %v5371_v35 = vsel %vm2693_vm1, %v2681_v39, %v2540_v14  ;;  %v1811_v25 = vmax.f32 %v5237_v20, 0.0  ;;  %v1812_v48 = vmax.f32 %v5241_v27, 0.0  ;;  %v6375_v14 = vld [vmem:[#allocation17_spill] sm:$0xff]  ;;  %v6379_v39 = vld [vmem:[#allocation27_spill] sm:$0xff] }
 0x207   :  { %6372 = vst [vmem:[#allocation36_spill] sm:$0xff] %v5371_v35  ;;  %v2603_v10 = vmax.f32 %v2601_v3, %v2602_v49  ;;  %v1813_v22 = vmax.f32 %v5245_v63, 0.0  ;;  %v1814_v62 = vmax.f32 %v5249_v21, 0.0  ;;  %v6374_v3 = vld [vmem:[#allocation14_spill] sm:$0xff]  ;;  %v6377_v16 = vld [vmem:[#allocation25_spill] sm:$0xff]  ;;  %v6378_v49 = vld [vmem:[#allocation24_spill] sm:$0xff] }
 0x208   :  { %v1856_v38 = vsel %vm1266_vm2, %v1791_v26, -inf  ;;  %v1857_v13 = vsel %vm1266_vm2, %v1793_v31, -inf  ;;  %v1859_v21 = vsel %vm1846_vm7, %v1792_v4, -inf  ;;  %v1916_v50 = vsel %vm1266_vm2, %v1811_v25, -inf }
 0x209   :  { %v5383_v29 = vsel %vm2693_vm1, %v2690_v8, %v2603_v10  ;;  %v6380_v10 = vld [vmem:[#allocation26_spill] sm:$0xff]  ;;  %v1860_v8 = vsel %vm1846_vm7, %v1794_v5, -inf  ;;  %v1858_v63 = vmax.f32 %v1856_v38, %v1857_v13  ;;  %v1917_v37 = vsel %vm1266_vm2, %v1813_v22, -inf }
 0x20a   :  { %6373 = vst [vmem:[#allocation39_spill] sm:$0xff] %v5383_v29  ;;  %v3238_v11 = vpack.i.bf16 %v5383_v29, %v5371_v35  ;;  %v1918_v61 = vmax.f32 %v1916_v50, %v1917_v37  ;;  %v1919_v47 = vsel %vm1846_vm7, %v1812_v48, -inf  ;;  %v1920_v57 = vsel %vm1846_vm7, %v1814_v62, -inf }
 0x20b   :  { %v5427_v26 = vsel %vm1266_vm2, %v1787_v58, -inf  ;;  %v5429_v4 = vmax.f32 %v1919_v47, %v1920_v57  ;;  %v1936_v31 = vsel %vm1928_vm8, %v1858_v63, -inf  ;;  %v2035_v5 = vsel %vm2027_vm9, %v1858_v63, -inf }
 0x20c   :  { %3239 = vrot.lane.b32.xlu2 %v3238_v11, %s3373_s2  ;;  %v5418_v11 = vmax.f32 %v1859_v21, %v1860_v8  ;;  %6386 = vst [vmem:[#allocation38_spill] sm:$0xff] %v5427_v26  ;;  %v2134_v13 = vsel %vm2126_vm10, %v1858_v63, -inf  ;;  %v1937_v38 = vrot.slane %v1936_v31, 4  ;;  %v1971_v37 = vsel %vm1928_vm8, %v1918_v61, -inf }
 0x20d   :  { %v2036_v50 = vrot.slane %v2035_v5, 4  ;;  %v2070_v25 = vsel %vm2027_vm9, %v1918_v61, -inf  ;;  %v1972_v48 = vrot.slane %v1971_v37, 4  ;;  %v2135_v42 = vrot.slane %v2134_v13, 4 }
 0x20e   :  { %v2071_v22 = vrot.slane %v2070_v25, 4  ;;  %v2169_v58 = vsel %vm2126_vm10, %v1918_v61, -inf  ;;  %v1938_v62 = vmax.f32 %v1936_v31, %v1937_v38  ;;  %v2233_v21 = vsel %vm2225_vm11, %v1858_v63, -inf }
 0x20f   :  { %v2037_v57 = vmax.f32 %v2035_v5, %v2036_v50  ;;  %v2170_v47 = vrot.slane %v2169_v58, 4  ;;  %v1973_v8 = vmax.f32 %v1971_v37, %v1972_v48  ;;  %v2136_v27 = vmax.f32 %v2134_v13, %v2135_v42 }
 0x210   :  { %v2072_v20 = vmax.f32 %v2070_v25, %v2071_v22  ;;  %v2234_v36 = vrot.slane %v2233_v21, 4  ;;  %v1939_v45 = vrot.slane %v1938_v62, 2  ;;  %v2268_v43 = vsel %vm2225_vm11, %v1918_v61, -inf }
 0x211   :  { %v2038_v7 = vrot.slane %v2037_v57, 2  ;;  %v2171_v30 = vmax.f32 %v2169_v58, %v2170_v47  ;;  %v1974_v12 = vrot.slane %v1973_v8, 2  ;;  %v2137_v6 = vrot.slane %v2136_v27, 2 }
 0x212   :  { %v2073_v17 = vrot.slane %v2072_v20, 2  ;;  %v2235_v29 = vmax.f32 %v2233_v21, %v2234_v36  ;;  %v1940_v35 = vmax.f32 %v1938_v62, %v1939_v45  ;;  %v2269_v5 = vrot.slane %v2268_v43, 4 }
 0x213   :  { %v2039_v26 = vmax.f32 %v2037_v57, %v2038_v7  ;;  %v2172_v31 = vrot.slane %v2171_v30, 2  ;;  %v1975_v38 = vmax.f32 %v1973_v8, %v1974_v12  ;;  %v2138_v63 = vmax.f32 %v2136_v27, %v2137_v6 }
 0x214   :  { %v2074_v50 = vmax.f32 %v2072_v20, %v2073_v17  ;;  %v2236_v37 = vrot.slane %v2235_v29, 2  ;;  %v1941_v25 = vrot.slane %v1940_v35, 1  ;;  %v2270_v22 = vmax.f32 %v2268_v43, %v2269_v5 }
 0x215   :  { %v2040_v13 = vrot.slane %v2039_v26, 1  ;;  %v2173_v48 = vmax.f32 %v2171_v30, %v2172_v31  ;;  %v1976_v42 = vrot.slane %v1975_v38, 1  ;;  %v2139_v47 = vrot.slane %v2138_v63, 1 }
 0x216   :  { %v2075_v58 = vrot.slane %v2074_v50, 1  ;;  %v2237_v61 = vmax.f32 %v2235_v29, %v2236_v37  ;;  %v1942_v32 = vmax.f32 %v1940_v35, %v1941_v25  ;;  %v2271_v36 = vrot.slane %v2270_v22, 2 }
 0x217   :  { %v2041_v9 = vmax.f32 %v2039_v26, %v2040_v13  ;;  %v2174_v60 = vrot.slane %v2173_v48, 1  ;;  %v1977_v45 = vmax.f32 %v1975_v38, %v1976_v42  ;;  %v2140_v62 = vmax.f32 %v2138_v63, %v2139_v47 }
 0x218   :  { %v2076_v7 = vmax.f32 %v2074_v50, %v2075_v58  ;;  %v2238_v57 = vrot.slane %v2237_v61, 1  ;;  %v2272_v17 = vmax.f32 %v2270_v22, %v2271_v36  ;;  %v2331_v6 = vsel %vm1928_vm8, %v5418_v11, -inf }
 0x219   :  { %v2175_v12 = vmax.f32 %v2173_v48, %v2174_v60  ;;  %v2366_v43 = vsel %vm1928_vm8, %v5429_v4, -inf  ;;  %v2332_v20 = vrot.slane %v2331_v6, 4  ;;  %v2429_v35 = vsel %vm2027_vm9, %v5418_v11, -inf }
 0x21a   :  { %v2239_v30 = vmax.f32 %v2237_v61, %v2238_v57  ;;  %v2367_v27 = vrot.slane %v2366_v43, 4  ;;  %v2273_v29 = vrot.slane %v2272_v17, 1  ;;  %v2430_v26 = vrot.slane %v2429_v35, 4 }
 0x21b   :  { %v2464_v21 = vsel %vm2027_vm9, %v5429_v4, -inf  ;;  %v2527_v60 = vsel %vm2126_vm10, %v5418_v11, -inf  ;;  %v2333_v8 = vmax.f32 %v2331_v6, %v2332_v20  ;;  %v2562_v37 = vsel %vm2126_vm10, %v5429_v4, -inf }
 0x21c   :  { %v2368_v31 = vmax.f32 %v2366_v43, %v2367_v27  ;;  %v2465_v5 = vrot.slane %v2464_v21, 4  ;;  %v2528_v38 = vrot.slane %v2527_v60, 4  ;;  %v2274_v50 = vmax.f32 %v2272_v17, %v2273_v29 }
 0x21d   :  { %v2431_v63 = vmax.f32 %v2429_v35, %v2430_v26  ;;  %v2620_v25 = vsel %vm2618_vm12, %v1942_v32, %v2041_v9  ;;  %v2334_v13 = vrot.slane %v2333_v8, 2  ;;  %v2563_v47 = vrot.slane %v2562_v37, 4 }
 0x21e   :  { %v2369_v48 = vrot.slane %v2368_v31, 2  ;;  %v2466_v22 = vmax.f32 %v2464_v21, %v2465_v5  ;;  %v2529_v42 = vmax.f32 %v2527_v60, %v2528_v38  ;;  %v2625_v61 = vsel %vm2618_vm12, %v1977_v45, %v2076_v7 }
 0x21f   :  { %v2432_v58 = vrot.slane %v2431_v63, 2  ;;  %v2635_v11 = vsel %vm2633_vm13, %v2620_v25, %v2140_v62  ;;  %v2335_v36 = vmax.f32 %v2333_v8, %v2334_v13  ;;  %v2564_v20 = vmax.f32 %v2562_v37, %v2563_v47 }
 0x220   :  { %v2370_v57 = vmax.f32 %v2368_v31, %v2369_v48  ;;  %v2467_v6 = vrot.slane %v2466_v22, 2  ;;  %v2530_v17 = vrot.slane %v2529_v42, 2  ;;  %v2640_v4 = vsel %vm2633_vm13, %v2625_v61, %v2175_v12 }
 0x221   :  { %v2433_v43 = vmax.f32 %v2431_v63, %v2432_v58  ;;  %v2650_v32 = vsel %vm2648_vm14, %v2635_v11, %v2239_v30  ;;  %v2336_v9 = vrot.slane %v2335_v36, 1  ;;  %v2565_v21 = vrot.slane %v2564_v20, 2 }
 0x222   :  { %v2371_v27 = vrot.slane %v2370_v57, 1  ;;  %v2468_v35 = vmax.f32 %v2466_v22, %v2467_v6  ;;  %v2531_v29 = vmax.f32 %v2529_v42, %v2530_v17  ;;  %v2655_v45 = vsel %vm2648_vm14, %v2640_v4, %v2274_v50 }
 0x223   :  { %v2434_v26 = vrot.slane %v2433_v43, 1  ;;  %v6387_v7 = vmax.f32 %v5154_v55, 0.0  ;;  %v2337_v60 = vmax.f32 %v2335_v36, %v2336_v9  ;;  %v2566_v12 = vmax.f32 %v2564_v20, %v2565_v21 }
 0x224   :  { %v2372_v8 = vmax.f32 %v2370_v57, %v2371_v27  ;;  %v2469_v31 = vrot.slane %v2468_v35, 1  ;;  %v2532_v5 = vrot.slane %v2531_v29, 1  ;;  %v6388_v30 = vmax.f32 %v5144_v54, 0.0 }
 0x225   :  { %v1844_v62 = vsel %vm1266_vm2, %v6387_v7, -inf  ;;  %v2435_v38 = vmax.f32 %v2433_v43, %v2434_v26  ;;  %v6389_v37 = vmax.f32 %v5158_v34, 0.0  ;;  %v2665_v13 = vsel %vm2663_vm15, %v2650_v32, %v2337_v60 }
 0x226   :  { %v5463_v63 = vsel %vm1846_vm7, %v6388_v30, -inf  ;;  %v2470_v50 = vmax.f32 %v2468_v35, %v2469_v31  ;;  %v2533_v55 = vmax.f32 %v2531_v29, %v2532_v5  ;;  %v2670_v48 = vsel %vm2663_vm15, %v2655_v45, %v2372_v8 }
 0x227   :  { %v5468_v25 = vsel %vm1846_vm7, %v6389_v37, -inf  ;;  %v2567_v22 = vrot.slane %v2566_v12, 1  ;;  %v2680_v42 = vsel %vm2678_vm0, %v2665_v13, %v2435_v38  ;;  %v6390_v58 = vmax.f32 %v5253_v0, 0.0 }
 0x228   :  { %v6391_v47 = vmax.f32 %v5261_v46, 0.0  ;;  %v2685_v61 = vsel %vm2678_vm0, %v2670_v48, %v2470_v50  ;;  %v5485_v11 = vsel %vm2693_vm1, %v2680_v42, %v2533_v55  ;;  %v6392_v36 = vmax.f32 %v5257_v56, 0.0 }
 0x229   :  { %v5476_v54 = vsel %vm1266_vm2, %v6390_v58, -inf  ;;  %v6393_v0 = vmax.f32 %v5265_v18, 0.0  ;;  %v2568_v17 = vmax.f32 %v2566_v12, %v2567_v22  ;;  %v6394_v46 = vmax.f32 %v6374_v3, 0.0  ;;  %v6415_v22 = vld [vmem:[#allocation35_spill] sm:$0xff]  ;;  %v6417_v58 = vld [vmem:[#allocation34_spill] sm:$0xff] }
 0x22a   :  { %v5481_v34 = vsel %vm1266_vm2, %v6391_v47, -inf  ;;  %v5490_v57 = vsel %vm1846_vm7, %v6392_v36, -inf  ;;  %v6395_v20 = vmax.f32 %v6376_v2, 0.0  ;;  %v6396_v56 = vmax.f32 %v6375_v14, 0.0 }
 0x22b   :  { %v5495_v6 = vsel %vm1846_vm7, %v6393_v0, -inf  ;;  %v5500_v43 = vsel %vm1266_vm2, %v6394_v46, -inf  ;;  %v6397_v18 = vmax.f32 %v6377_v16, 0.0  ;;  %v6398_v3 = vmax.f32 %v5189_v59, 0.0 }
 0x22c   :  { %v5505_v4 = vsel %vm1266_vm2, %v6395_v20, -inf  ;;  %v5510_v32 = vsel %vm1846_vm7, %v6396_v56, -inf  ;;  %v6399_v35 = vmax.f32 %v5197_v52, 0.0  ;;  %v6400_v29 = vmax.f32 %v5193_v41, 0.0  ;;  %v6421_v20 = vld [vmem:[#allocation38_spill] sm:$0xff] }
 0x22d   :  { %v5515_v9 = vsel %vm1846_vm7, %v6397_v18, -inf  ;;  %v1880_v27 = vsel %vm1266_vm2, %v6398_v3, -inf  ;;  %v5527_v26 = vsel %vm2693_vm1, %v2685_v61, %v2568_v17  ;;  %v6401_v16 = vmax.f32 %v5201_v15, 0.0  ;;  %v6419_v61 = vld [vmem:[#allocation37_spill] sm:$0xff] }
 0x22e   :  { %v1881_v2 = vsel %vm1266_vm2, %v6399_v35, -inf  ;;  %v1883_v14 = vsel %vm1846_vm7, %v6400_v29, -inf  ;;  %v6402_v45 = vmax.f32 %v5205_v24, 0.0  ;;  %v6403_v7 = vmax.f32 %v5213_v23, 0.0 }
 0x22f   :  { %v1884_v21 = vsel %vm1846_vm7, %v6401_v16, -inf  ;;  %v3243_v41 = vpack.i.bf16 %v5527_v26, %v5485_v11  ;;  %v6404_v60 = vmax.f32 %v5209_v28, 0.0  ;;  %v6405_v31 = vmax.f32 %v5217_v1, 0.0 }
 0x230   :  { %v1892_v59 = vsel %vm1266_vm2, %v6402_v45, -inf  ;;  %v1893_v52 = vsel %vm1266_vm2, %v6403_v7, -inf  ;;  %v6406_v5 = vmax.f32 %v5221_v44, 0.0  ;;  %v6407_v23 = vmax.f32 %v5229_v53, 0.0 }
 0x231   :  { %v1895_v8 = vsel %vm1846_vm7, %v6404_v60, -inf  ;;  %v1896_v15 = vsel %vm1846_vm7, %v6405_v31, -inf  ;;  %v6408_v12 = vmax.f32 %v5225_v51, 0.0  ;;  %v6409_v30 = vmax.f32 %v5233_v40, 0.0  ;;  %3244 = vrot.lane.b32.xlu0 %v3243_v41, %s3373_s2 }
 0x232   :  { %v5549_v24 = vsel %vm1266_vm2, %v6406_v5, -inf  ;;  %v5554_v38 = vsel %vm1266_vm2, %v6407_v23, -inf  ;;  %v6410_v44 = vmax.f32 %v6378_v49, 0.0  ;;  %v6411_v53 = vmax.f32 %v6380_v10, 0.0 }
 0x233   :  { %v5559_v28 = vsel %vm1846_vm7, %v6408_v12, -inf  ;;  %v5564_v1 = vsel %vm1846_vm7, %v6409_v30, -inf  ;;  %v6412_v51 = vmax.f32 %v6379_v39, 0.0  ;;  %v6413_v40 = vmax.f32 %v6381_v19, 0.0 }
 0x234   :  { %v5569_v37 = vsel %vm1266_vm2, %v6410_v44, -inf  ;;  %v5575_v50 = vsel %vm1266_vm2, %v6411_v53, -inf  ;;  %v6414_v49 = vmax.f32 %v6382_v33, 0.0  ;;  %v6416_v10 = vmax.f32 %v6415_v22, 0.0 }
 0x235   :  { %v5580_v55 = vsel %vm1846_vm7, %v6412_v51, -inf  ;;  %v5585_v13 = vsel %vm1846_vm7, %v6413_v40, -inf  ;;  %v6418_v39 = vmax.f32 %v6417_v58, 0.0  ;;  %v6420_v19 = vmax.f32 %v6419_v61, 0.0 }
 0x236   :  { %v5590_v48 = vsel %vm1266_vm2, %v6414_v49, -inf  ;;  %v5595_v42 = vsel %vm1266_vm2, %v6416_v10, -inf  ;;  %v1882_v0 = vmax.f32 %v1880_v27, %v1881_v2  ;;  %v5607_v33 = vmax.f32 %v1883_v14, %v1884_v21 }
 0x237   :  { %v5600_v47 = vsel %vm1846_vm7, %v6418_v39, -inf  ;;  %v5605_v36 = vsel %vm1846_vm7, %v6420_v19, -inf  ;;  %v1894_v17 = vmax.f32 %v1892_v59, %v1893_v52  ;;  %v5609_v46 = vmax.f32 %v1895_v8, %v1896_v15 }
 0x238   :  { %v5612_v56 = vmax.f32 %v6421_v20, %v1844_v62  ;;  %v1950_v18 = vsel %vm1928_vm8, %v1882_v0, -inf  ;;  %v2049_v3 = vsel %vm2027_vm9, %v1882_v0, -inf  ;;  %v2148_v35 = vsel %vm2126_vm10, %v1882_v0, -inf }
 0x239   :  { %v2247_v29 = vsel %vm2225_vm11, %v1882_v0, -inf  ;;  %v1951_v16 = vrot.slane %v1950_v18, 4  ;;  %v1957_v45 = vsel %vm1928_vm8, %v1894_v17, -inf  ;;  %v2050_v27 = vrot.slane %v2049_v3, 4 }
 0x23a   :  { %v2056_v2 = vsel %vm2027_vm9, %v1894_v17, -inf  ;;  %v1958_v14 = vrot.slane %v1957_v45, 4  ;;  %v2149_v59 = vrot.slane %v2148_v35, 4  ;;  %v2155_v62 = vsel %vm2126_vm10, %v1894_v17, -inf }
 0x23b   :  { %v2057_v21 = vrot.slane %v2056_v2, 4  ;;  %v1952_v7 = vmax.f32 %v1950_v18, %v1951_v16  ;;  %v2051_v52 = vmax.f32 %v2049_v3, %v2050_v27  ;;  %v2156_v41 = vrot.slane %v2155_v62, 4 }
 0x23c   :  { %v2248_v60 = vrot.slane %v2247_v29, 4  ;;  %v1959_v8 = vmax.f32 %v1957_v45, %v1958_v14  ;;  %v2150_v15 = vmax.f32 %v2148_v35, %v2149_v59  ;;  %v2254_v5 = vsel %vm2225_vm11, %v1894_v17, -inf }
 0x23d   :  { %v2058_v31 = vmax.f32 %v2056_v2, %v2057_v21  ;;  %v1953_v23 = vrot.slane %v1952_v7, 2  ;;  %v2052_v12 = vrot.slane %v2051_v52, 2  ;;  %v2157_v30 = vmax.f32 %v2155_v62, %v2156_v41 }
 0x23e   :  { %v2249_v44 = vmax.f32 %v2247_v29, %v2248_v60  ;;  %v1960_v53 = vrot.slane %v1959_v8, 2  ;;  %v2151_v40 = vrot.slane %v2150_v15, 2  ;;  %v2255_v49 = vrot.slane %v2254_v5, 4 }
 0x23f   :  { %v2059_v51 = vrot.slane %v2058_v31, 2  ;;  %v1954_v22 = vmax.f32 %v1952_v7, %v1953_v23  ;;  %v2053_v10 = vmax.f32 %v2051_v52, %v2052_v12  ;;  %v2158_v58 = vrot.slane %v2157_v30, 2 }
 0x240   :  { %v2250_v39 = vrot.slane %v2249_v44, 2  ;;  %v1961_v61 = vmax.f32 %v1959_v8, %v1960_v53  ;;  %v2152_v0 = vmax.f32 %v2150_v15, %v2151_v40  ;;  %v2256_v20 = vmax.f32 %v2254_v5, %v2255_v49 }
 0x241   :  { %v2060_v19 = vmax.f32 %v2058_v31, %v2059_v51  ;;  %v1955_v18 = vrot.slane %v1954_v22, 1  ;;  %v2054_v3 = vrot.slane %v2053_v10, 1  ;;  %v2159_v35 = vmax.f32 %v2157_v30, %v2158_v58 }
 0x242   :  { %v2251_v17 = vmax.f32 %v2249_v44, %v2250_v39  ;;  %v1962_v16 = vrot.slane %v1961_v61, 1  ;;  %v2153_v27 = vrot.slane %v2152_v0, 1  ;;  %v2257_v29 = vrot.slane %v2256_v20, 2 }
 0x243   :  { %v2061_v45 = vrot.slane %v2060_v19, 1  ;;  %v1956_v2 = vmax.f32 %v1954_v22, %v1955_v18  ;;  %v2055_v14 = vmax.f32 %v2053_v10, %v2054_v3  ;;  %v2160_v21 = vrot.slane %v2159_v35, 1 }
 0x244   :  { %v2252_v59 = vrot.slane %v2251_v17, 1  ;;  %v1963_v62 = vmax.f32 %v1961_v61, %v1962_v16  ;;  %v2154_v52 = vmax.f32 %v2152_v0, %v2153_v27  ;;  %v2258_v41 = vmax.f32 %v2256_v20, %v2257_v29 }
 0x245   :  { %v2062_v7 = vmax.f32 %v2060_v19, %v2061_v45  ;;  %v2161_v60 = vmax.f32 %v2159_v35, %v2160_v21  ;;  %v2345_v31 = vsel %vm1928_vm8, %v5607_v33, -inf  ;;  %v2352_v15 = vsel %vm1928_vm8, %v5609_v46, -inf }
 0x246   :  { %v2253_v8 = vmax.f32 %v2251_v17, %v2252_v59  ;;  %v2259_v5 = vrot.slane %v2258_v41, 1  ;;  %v2346_v23 = vrot.slane %v2345_v31, 4  ;;  %v2353_v12 = vrot.slane %v2352_v15, 4 }
 0x247   :  { %v2443_v30 = vsel %vm2027_vm9, %v5607_v33, -inf  ;;  %v2450_v53 = vsel %vm2027_vm9, %v5609_v46, -inf  ;;  %v2541_v51 = vsel %vm2126_vm10, %v5607_v33, -inf  ;;  %v2548_v40 = vsel %vm2126_vm10, %v5609_v46, -inf }
 0x248   :  { %v2444_v44 = vrot.slane %v2443_v30, 4  ;;  %v2260_v49 = vmax.f32 %v2258_v41, %v2259_v5  ;;  %v2347_v22 = vmax.f32 %v2345_v31, %v2346_v23  ;;  %v2354_v10 = vmax.f32 %v2352_v15, %v2353_v12 }
 0x249   :  { %v2451_v58 = vrot.slane %v2450_v53, 4  ;;  %v2542_v61 = vrot.slane %v2541_v51, 4  ;;  %v2549_v19 = vrot.slane %v2548_v40, 4  ;;  %v2622_v0 = vsel %vm2618_vm12, %v1956_v2, %v2055_v14 }
 0x24a   :  { %v2445_v39 = vmax.f32 %v2443_v30, %v2444_v44  ;;  %v2348_v20 = vrot.slane %v2347_v22, 2  ;;  %v2355_v18 = vrot.slane %v2354_v10, 2  ;;  %v2623_v35 = vsel %vm2618_vm12, %v1963_v62, %v2062_v7 }
 0x24b   :  { %v2452_v3 = vmax.f32 %v2450_v53, %v2451_v58  ;;  %v2543_v16 = vmax.f32 %v2541_v51, %v2542_v61  ;;  %v2550_v33 = vmax.f32 %v2548_v40, %v2549_v19  ;;  %v2637_v45 = vsel %vm2633_vm13, %v2622_v0, %v2154_v52 }
 0x24c   :  { %v2446_v17 = vrot.slane %v2445_v39, 2  ;;  %v2349_v46 = vmax.f32 %v2347_v22, %v2348_v20  ;;  %v2356_v27 = vmax.f32 %v2354_v10, %v2355_v18  ;;  %v2638_v21 = vsel %vm2633_vm13, %v2623_v35, %v2161_v60 }
 0x24d   :  { %v2453_v29 = vrot.slane %v2452_v3, 2  ;;  %v2544_v41 = vrot.slane %v2543_v16, 2  ;;  %v2551_v31 = vrot.slane %v2550_v33, 2  ;;  %v2652_v2 = vsel %vm2648_vm14, %v2637_v45, %v2253_v8 }
 0x24e   :  { %v2447_v59 = vmax.f32 %v2445_v39, %v2446_v17  ;;  %v2350_v14 = vrot.slane %v2349_v46, 1  ;;  %v2357_v15 = vrot.slane %v2356_v27, 1  ;;  %v2653_v62 = vsel %vm2648_vm14, %v2638_v21, %v2260_v49 }
 0x24f   :  { %v2454_v5 = vmax.f32 %v2452_v3, %v2453_v29  ;;  %v2545_v23 = vmax.f32 %v2543_v16, %v2544_v41  ;;  %v2552_v12 = vmax.f32 %v2550_v33, %v2551_v31  ;;  %v5642_v52 = vmax.f32 %v5463_v63, %v5468_v25 }
 0x250   :  { %v2448_v7 = vrot.slane %v2447_v59, 1  ;;  %v2351_v30 = vmax.f32 %v2349_v46, %v2350_v14  ;;  %v2358_v44 = vmax.f32 %v2356_v27, %v2357_v15  ;;  %v5646_v53 = vmax.f32 %v5476_v54, %v5481_v34 }
 0x251   :  { %v2455_v60 = vrot.slane %v2454_v5, 1  ;;  %v2546_v51 = vrot.slane %v2545_v23, 1  ;;  %v2553_v40 = vrot.slane %v2552_v12, 1  ;;  %v5650_v49 = vmax.f32 %v5490_v57, %v5495_v6 }
 0x252   :  { %v2449_v8 = vmax.f32 %v2447_v59, %v2448_v7  ;;  %v2667_v10 = vsel %vm2663_vm15, %v2652_v2, %v2351_v30  ;;  %v2668_v63 = vsel %vm2663_vm15, %v2653_v62, %v2358_v44  ;;  %v5656_v25 = vmax.f32 %v5500_v43, %v5505_v4 }
 0x253   :  { %v2456_v22 = vmax.f32 %v2454_v5, %v2455_v60  ;;  %v2547_v58 = vmax.f32 %v2545_v23, %v2546_v51  ;;  %v2554_v39 = vmax.f32 %v2552_v12, %v2553_v40  ;;  %v5661_v34 = vmax.f32 %v5510_v32, %v5515_v9 }
 0x254   :  { %v2682_v54 = vsel %vm2678_vm0, %v2667_v10, %v2449_v8  ;;  %v1906_v6 = vmax.f32 %v5549_v24, %v5554_v38  ;;  %v5668_v61 = vmax.f32 %v5559_v28, %v5564_v1  ;;  %v5672_v43 = vmax.f32 %v5569_v37, %v5575_v50  ;;  %v6422_v1 = vld [vmem:[#allocation16_spill] sm:$0xff] }
 0x255   :  { %v2683_v57 = vsel %vm2678_vm0, %v2668_v63, %v2456_v22  ;;  %v5675_v4 = vsel %vm2693_vm1, %v2682_v54, %v2547_v58  ;;  %v5682_v32 = vmax.f32 %v5580_v55, %v5585_v13  ;;  %v5686_v9 = vmax.f32 %v5590_v48, %v5595_v42 }
 0x256   :  { %v5678_v19 = vsel %vm2693_vm1, %v2683_v57, %v2554_v39  ;;  %v5692_v38 = vmax.f32 %v5600_v47, %v5605_v36  ;;  %v2721_v28 = vrot.slane %v5485_v11, 1  ;;  %v2729_v37 = vrot.slane %v6422_v1, 1 }
 0x257   :  { %v3253_v24 = vpack.i.bf16 %v5678_v19, %v5675_v4  ;;  %v1964_v50 = vsel %vm1928_vm8, %v1906_v6, -inf  ;;  %v2063_v55 = vsel %vm2027_vm9, %v1906_v6, -inf  ;;  %v1929_v13 = vsel %vm1928_vm8, %v5612_v56, -inf }
 0x258   :  { %v2028_v48 = vsel %vm2027_vm9, %v5612_v56, -inf  ;;  %v3258_v42 = vpack.i.bf16 %v2729_v37, %v2721_v28  ;;  %v1930_v47 = vrot.slane %v1929_v13, 4  ;;  %v1965_v36 = vrot.slane %v1964_v50, 4 }
 0x259   :  { %3254 = vrot.lane.b32.xlu2 %v3253_v24, %s3373_s2  ;;  %v2029_v0 = vrot.slane %v2028_v48, 4  ;;  %v2064_v20 = vrot.slane %v2063_v55, 4  ;;  %v2127_v18 = vsel %vm2126_vm10, %v5612_v56, -inf  ;;  %v2162_v3 = vsel %vm2126_vm10, %v1906_v6, -inf }
 0x25a   :  { %v2226_v35 = vsel %vm2225_vm11, %v5612_v56, -inf  ;;  %3259 = vrot.lane.b32.xlu1 %v3258_v42, %s3374_s3  ;;  %v1931_v17 = vmax.f32 %v1929_v13, %v1930_v47  ;;  %v1966_v16 = vmax.f32 %v1964_v50, %v1965_v36  ;;  %v2128_v45 = vrot.slane %v2127_v18, 4 }
 0x25b   :  { %v2030_v33 = vmax.f32 %v2028_v48, %v2029_v0  ;;  %v2065_v46 = vmax.f32 %v2063_v55, %v2064_v20  ;;  %v2163_v27 = vrot.slane %v2162_v3, 4  ;;  %v2227_v29 = vrot.slane %v2226_v35, 4 }
 0x25c   :  { %v2261_v21 = vsel %vm2225_vm11, %v1906_v6, -inf  ;;  %v1932_v59 = vrot.slane %v1931_v17, 2  ;;  %v1967_v41 = vrot.slane %v1966_v16, 2  ;;  %v2129_v2 = vmax.f32 %v2127_v18, %v2128_v45 }
 0x25d   :  { %v2031_v31 = vrot.slane %v2030_v33, 2  ;;  %v2066_v14 = vrot.slane %v2065_v46, 2  ;;  %v2164_v15 = vmax.f32 %v2162_v3, %v2163_v27  ;;  %v2228_v5 = vmax.f32 %v2226_v35, %v2227_v29 }
 0x25e   :  { %v2262_v56 = vrot.slane %v2261_v21, 4  ;;  %v1933_v62 = vmax.f32 %v1931_v17, %v1932_v59  ;;  %v1968_v7 = vmax.f32 %v1966_v16, %v1967_v41  ;;  %v2130_v12 = vrot.slane %v2129_v2, 2 }
 0x25f   :  { %v2032_v23 = vmax.f32 %v2030_v33, %v2031_v31  ;;  %v2067_v30 = vmax.f32 %v2065_v46, %v2066_v14  ;;  %v2165_v44 = vrot.slane %v2164_v15, 2  ;;  %v2229_v60 = vrot.slane %v2228_v5, 2 }
 0x260   :  { %v2263_v8 = vmax.f32 %v2261_v21, %v2262_v56  ;;  %v1934_v51 = vrot.slane %v1933_v62, 1  ;;  %v1969_v40 = vrot.slane %v1968_v7, 1  ;;  %v2131_v10 = vmax.f32 %v2129_v2, %v2130_v12 }
 0x261   :  { %v2033_v22 = vrot.slane %v2032_v23, 1  ;;  %v2068_v63 = vrot.slane %v2067_v30, 1  ;;  %v2166_v58 = vmax.f32 %v2164_v15, %v2165_v44  ;;  %v2230_v39 = vmax.f32 %v2228_v5, %v2229_v60 }
 0x262   :  { %v2264_v54 = vrot.slane %v2263_v8, 2  ;;  %v1935_v57 = vmax.f32 %v1933_v62, %v1934_v51  ;;  %v1970_v6 = vmax.f32 %v1968_v7, %v1969_v40  ;;  %v2132_v50 = vrot.slane %v2131_v10, 1 }
 0x263   :  { %v2034_v24 = vmax.f32 %v2032_v23, %v2033_v22  ;;  %v2069_v55 = vmax.f32 %v2067_v30, %v2068_v63  ;;  %v2167_v13 = vrot.slane %v2166_v58, 1  ;;  %v2231_v48 = vrot.slane %v2230_v39, 1 }
 0x264   :  { %v2265_v42 = vmax.f32 %v2263_v8, %v2264_v54  ;;  %v2133_v47 = vmax.f32 %v2131_v10, %v2132_v50  ;;  %v2324_v36 = vsel %vm1928_vm8, %v5642_v52, -inf  ;;  %v2359_v0 = vsel %vm1928_vm8, %v5668_v61, -inf }
 0x265   :  { %v2422_v20 = vsel %vm2027_vm9, %v5642_v52, -inf  ;;  %v2168_v18 = vmax.f32 %v2166_v58, %v2167_v13  ;;  %v2232_v3 = vmax.f32 %v2230_v39, %v2231_v48  ;;  %v2325_v17 = vrot.slane %v2324_v36, 4 }
 0x266   :  { %v2266_v35 = vrot.slane %v2265_v42, 1  ;;  %v2360_v16 = vrot.slane %v2359_v0, 4  ;;  %v2423_v33 = vrot.slane %v2422_v20, 4  ;;  %v2457_v45 = vsel %vm2027_vm9, %v5668_v61, -inf }
 0x267   :  { %v2520_v46 = vsel %vm2126_vm10, %v5642_v52, -inf  ;;  %v2326_v29 = vmax.f32 %v2324_v36, %v2325_v17  ;;  %v2458_v21 = vrot.slane %v2457_v45, 4  ;;  %v2555_v2 = vsel %vm2126_vm10, %v5668_v61, -inf }
 0x268   :  { %v2267_v27 = vmax.f32 %v2265_v42, %v2266_v35  ;;  %v2521_v59 = vrot.slane %v2520_v46, 4  ;;  %v2361_v41 = vmax.f32 %v2359_v0, %v2360_v16  ;;  %v2424_v31 = vmax.f32 %v2422_v20, %v2423_v33  ;;  %v6424_v0 = vld [vmem:[#allocation39_spill] sm:$0xff] }
 0x269   :  { %v2619_v14 = vsel %vm2618_vm12, %v1935_v57, %v2034_v24  ;;  %v2327_v15 = vrot.slane %v2326_v29, 2  ;;  %v2459_v5 = vmax.f32 %v2457_v45, %v2458_v21  ;;  %v2556_v62 = vrot.slane %v2555_v2, 4  ;;  %v6423_v24 = vld [vmem:[#allocation36_spill] sm:$0xff] }
 0x26a   :  { %v2522_v56 = vmax.f32 %v2520_v46, %v2521_v59  ;;  %v2362_v7 = vrot.slane %v2361_v41, 2  ;;  %v2425_v23 = vrot.slane %v2424_v31, 2  ;;  %v2624_v12 = vsel %vm2618_vm12, %v1970_v6, %v2069_v55 }
 0x26b   :  { %v2634_v52 = vsel %vm2633_vm13, %v2619_v14, %v2133_v47  ;;  %v2328_v30 = vmax.f32 %v2326_v29, %v2327_v15  ;;  %v2460_v44 = vrot.slane %v2459_v5, 2  ;;  %v2557_v8 = vmax.f32 %v2555_v2, %v2556_v62 }
 0x26c   :  { %v2523_v60 = vrot.slane %v2522_v56, 2  ;;  %v2363_v51 = vmax.f32 %v2361_v41, %v2362_v7  ;;  %v2426_v40 = vmax.f32 %v2424_v31, %v2425_v23  ;;  %v2639_v61 = vsel %vm2633_vm13, %v2624_v12, %v2168_v18 }
 0x26d   :  { %v2649_v22 = vsel %vm2648_vm14, %v2634_v52, %v2232_v3  ;;  %v2329_v10 = vrot.slane %v2328_v30, 1  ;;  %v2461_v63 = vmax.f32 %v2459_v5, %v2460_v44  ;;  %v2558_v39 = vrot.slane %v2557_v8, 2 }
 0x26e   :  { %v2524_v58 = vmax.f32 %v2522_v56, %v2523_v60  ;;  %v2364_v54 = vrot.slane %v2363_v51, 1  ;;  %v2427_v57 = vrot.slane %v2426_v40, 1  ;;  %v2654_v6 = vsel %vm2648_vm14, %v2639_v61, %v2267_v27 }
 0x26f   :  { %v2722_v50 = vrot.slane %v6423_v24, 1  ;;  %v2330_v55 = vmax.f32 %v2328_v30, %v2329_v10  ;;  %v2462_v13 = vrot.slane %v2461_v63, 1  ;;  %v2559_v42 = vmax.f32 %v2557_v8, %v2558_v39 }
 0x270   :  { %v2525_v48 = vrot.slane %v2524_v58, 1  ;;  %v2365_v47 = vmax.f32 %v2363_v51, %v2364_v54  ;;  %v2428_v36 = vmax.f32 %v2426_v40, %v2427_v57  ;;  %v2730_v20 = vrot.slane %v6424_v0, 1 }
 0x271   :  { %v1978_v18 = vsel %vm1928_vm8, %v5646_v53, -inf  ;;  %v2463_v3 = vmax.f32 %v2461_v63, %v2462_v13  ;;  %v2560_v17 = vrot.slane %v2559_v42, 1  ;;  %v2664_v16 = vsel %vm2663_vm15, %v2649_v22, %v2330_v55 }
 0x272   :  { %v2526_v35 = vmax.f32 %v2524_v58, %v2525_v48  ;;  %v2669_v33 = vsel %vm2663_vm15, %v2654_v6, %v2365_v47  ;;  %v2679_v45 = vsel %vm2678_vm0, %v2664_v16, %v2428_v36  ;;  %v3273_v46 = vpack.i.bf16 %v2730_v20, %v2722_v50 }
 0x273   :  { %v1979_v27 = vrot.slane %v1978_v18, 4  ;;  %v2561_v29 = vmax.f32 %v2559_v42, %v2560_v17  ;;  %v2684_v21 = vsel %vm2678_vm0, %v2669_v33, %v2463_v3  ;;  %v1992_v41 = vsel %vm1928_vm8, %v5656_v25, -inf }
 0x274   :  { %v5745_v59 = vsel %vm2693_vm1, %v2679_v45, %v2526_v35  ;;  %3274 = vrot.lane.b32.xlu2 %v3273_v46, %s3375_s29  ;;  %v1993_v14 = vrot.slane %v1992_v41, 4  ;;  %v2077_v15 = vsel %vm2027_vm9, %v5646_v53, -inf  ;;  %v2091_v62 = vsel %vm2027_vm9, %v5656_v25, -inf }
 0x275   :  { %v2720_v31 = vrot.slane %v5745_v59, 1  ;;  %v1980_v2 = vmax.f32 %v1978_v18, %v1979_v27  ;;  %v5754_v5 = vsel %vm2693_vm1, %v2684_v21, %v2561_v29  ;;  %v2078_v56 = vrot.slane %v2077_v15, 4 }
 0x276   :  { %v2176_v7 = vsel %vm2126_vm10, %v5646_v53, -inf  ;;  %v2725_v23 = vrot.slane %v5754_v5, 1  ;;  %v1994_v52 = vmax.f32 %v1992_v41, %v1993_v14  ;;  %v2092_v30 = vrot.slane %v2091_v62, 4 }
 0x277   :  { %v1981_v12 = vrot.slane %v1980_v2, 2  ;;  %v2079_v44 = vmax.f32 %v2077_v15, %v2078_v56  ;;  %v2177_v60 = vrot.slane %v2176_v7, 4  ;;  %v2190_v8 = vsel %vm2126_vm10, %v5656_v25, -inf }
 0x278   :  { %v2275_v51 = vsel %vm2225_vm11, %v5646_v53, -inf  ;;  %v3263_v40 = vpack.i.bf16 %v2725_v23, %v2720_v31  ;;  %v1995_v22 = vrot.slane %v1994_v52, 2  ;;  %v2093_v10 = vmax.f32 %v2091_v62, %v2092_v30 }
 0x279   :  { %v1982_v61 = vmax.f32 %v1980_v2, %v1981_v12  ;;  %v2080_v63 = vrot.slane %v2079_v44, 2  ;;  %v2178_v58 = vmax.f32 %v2176_v7, %v2177_v60  ;;  %v2191_v39 = vrot.slane %v2190_v8, 4 }
 0x27a   :  { %v2276_v54 = vrot.slane %v2275_v51, 4  ;;  %3264 = vrot.lane.b32.xlu0 %v3263_v40, %s3374_s3  ;;  %v1996_v6 = vmax.f32 %v1994_v52, %v1995_v22  ;;  %v2094_v55 = vrot.slane %v2093_v10, 2  ;;  %v2289_v13 = vsel %vm2225_vm11, %v5656_v25, -inf }
 0x27b   :  { %v1983_v57 = vrot.slane %v1982_v61, 1  ;;  %v2081_v48 = vmax.f32 %v2079_v44, %v2080_v63  ;;  %v2179_v53 = vrot.slane %v2178_v58, 2  ;;  %v2192_v42 = vmax.f32 %v2190_v8, %v2191_v39 }
 0x27c   :  { %v2277_v47 = vmax.f32 %v2275_v51, %v2276_v54  ;;  %v1997_v18 = vrot.slane %v1996_v6, 1  ;;  %v2095_v3 = vmax.f32 %v2093_v10, %v2094_v55  ;;  %v2290_v35 = vrot.slane %v2289_v13, 4 }
 0x27d   :  { %v1984_v36 = vmax.f32 %v1982_v61, %v1983_v57  ;;  %v2082_v17 = vrot.slane %v2081_v48, 1  ;;  %v2180_v16 = vmax.f32 %v2178_v58, %v2179_v53  ;;  %v2193_v33 = vrot.slane %v2192_v42, 2 }
 0x27e   :  { %v2278_v45 = vrot.slane %v2277_v47, 2  ;;  %v1998_v46 = vmax.f32 %v1996_v6, %v1997_v18  ;;  %v2096_v27 = vrot.slane %v2095_v3, 1  ;;  %v2291_v29 = vmax.f32 %v2289_v13, %v2290_v35 }
 0x27f   :  { %v2373_v21 = vsel %vm1928_vm8, %v5650_v49, -inf  ;;  %v2083_v41 = vmax.f32 %v2081_v48, %v2082_v17  ;;  %v2181_v25 = vrot.slane %v2180_v16, 1  ;;  %v2194_v31 = vmax.f32 %v2192_v42, %v2193_v33 }
 0x280   :  { %v2279_v2 = vmax.f32 %v2277_v47, %v2278_v45  ;;  %v2097_v14 = vmax.f32 %v2095_v3, %v2096_v27  ;;  %v2292_v15 = vrot.slane %v2291_v29, 2  ;;  %v2374_v56 = vrot.slane %v2373_v21, 4 }
 0x281   :  { %v2387_v62 = vsel %vm1928_vm8, %v5661_v34, -inf  ;;  %v2182_v7 = vmax.f32 %v2180_v16, %v2181_v25  ;;  %v2195_v12 = vrot.slane %v2194_v31, 1  ;;  %v2471_v8 = vsel %vm2027_vm9, %v5650_v49, -inf }
 0x282   :  { %v2280_v52 = vrot.slane %v2279_v2, 1  ;;  %v2388_v30 = vrot.slane %v2387_v62, 4  ;;  %v2293_v44 = vmax.f32 %v2291_v29, %v2292_v15  ;;  %v2375_v60 = vmax.f32 %v2373_v21, %v2374_v56 }
 0x283   :  { %v2485_v51 = vsel %vm2027_vm9, %v5661_v34, -inf  ;;  %v2196_v40 = vmax.f32 %v2194_v31, %v2195_v12  ;;  %v2472_v10 = vrot.slane %v2471_v8, 4  ;;  %v2569_v54 = vsel %vm2126_vm10, %v5650_v49, -inf }
 0x284   :  { %v2281_v61 = vmax.f32 %v2279_v2, %v2280_v52  ;;  %v2389_v22 = vmax.f32 %v2387_v62, %v2388_v30  ;;  %v2294_v63 = vrot.slane %v2293_v44, 1  ;;  %v2376_v58 = vrot.slane %v2375_v60, 2 }
 0x285   :  { %v2486_v39 = vrot.slane %v2485_v51, 4  ;;  %v2473_v6 = vmax.f32 %v2471_v8, %v2472_v10  ;;  %v2570_v55 = vrot.slane %v2569_v54, 4  ;;  %v2583_v13 = vsel %vm2126_vm10, %v5661_v34, -inf }
 0x286   :  { %v2390_v57 = vrot.slane %v2389_v22, 2  ;;  %v2295_v48 = vmax.f32 %v2293_v44, %v2294_v63  ;;  %v2377_v53 = vmax.f32 %v2375_v60, %v2376_v58  ;;  %v2584_v47 = vrot.slane %v2583_v13, 4 }
 0x287   :  { %v2487_v42 = vmax.f32 %v2485_v51, %v2486_v39  ;;  %v2474_v3 = vrot.slane %v2473_v6, 2  ;;  %v2571_v35 = vmax.f32 %v2569_v54, %v2570_v55  ;;  %v2626_v17 = vsel %vm2618_vm12, %v1984_v36, %v2083_v41 }
 0x288   :  { %v2391_v18 = vmax.f32 %v2389_v22, %v2390_v57  ;;  %v2378_v16 = vrot.slane %v2377_v53, 1  ;;  %v2585_v45 = vmax.f32 %v2583_v13, %v2584_v47  ;;  %v2628_v49 = vsel %vm2618_vm12, %v1998_v46, %v2097_v14  ;;  %v6425_v22 = vld [vmem:[#allocation12_spill] sm:$0xff] }
 0x289   :  { %v2488_v33 = vrot.slane %v2487_v42, 2  ;;  %v2475_v29 = vmax.f32 %v2473_v6, %v2474_v3  ;;  %v2572_v21 = vrot.slane %v2571_v35, 2  ;;  %v2641_v25 = vsel %vm2633_vm13, %v2626_v17, %v2182_v7 }
 0x28a   :  { %v2392_v27 = vrot.slane %v2391_v18, 1  ;;  %v2379_v34 = vmax.f32 %v2377_v53, %v2378_v16  ;;  %v2586_v2 = vrot.slane %v2585_v45, 2  ;;  %v2643_v15 = vsel %vm2633_vm13, %v2628_v49, %v2196_v40 }
 0x28b   :  { %v2489_v31 = vmax.f32 %v2487_v42, %v2488_v33  ;;  %v2476_v62 = vrot.slane %v2475_v29, 1  ;;  %v2573_v12 = vmax.f32 %v2571_v35, %v2572_v21  ;;  %v2656_v36 = vsel %vm2648_vm14, %v2641_v25, %v2281_v61 }
 0x28c   :  { %v2393_v56 = vmax.f32 %v2391_v18, %v2392_v27  ;;  %v2587_v52 = vmax.f32 %v2585_v45, %v2586_v2  ;;  %v2658_v30 = vsel %vm2648_vm14, %v2643_v15, %v2295_v48  ;;  %v2671_v46 = vsel %vm2663_vm15, %v2656_v36, %v2379_v34 }
 0x28d   :  { %v2490_v41 = vrot.slane %v2489_v31, 1  ;;  %v2477_v14 = vmax.f32 %v2475_v29, %v2476_v62  ;;  %v2574_v44 = vrot.slane %v2573_v12, 1  ;;  %v2806_v60 = vrot.slane %v5527_v26, 1 }
 0x28e   :  { %v2673_v7 = vsel %vm2663_vm15, %v2658_v30, %v2393_v56  ;;  %v2588_v51 = vrot.slane %v2587_v52, 1  ;;  %v2723_v40 = vrot.slane %v5675_v4, 1  ;;  %v2727_v10 = vrot.slane %v6425_v22, 1 }
 0x28f   :  { %v2491_v8 = vmax.f32 %v2489_v31, %v2490_v41  ;;  %v2575_v63 = vmax.f32 %v2573_v12, %v2574_v44  ;;  %v2686_v61 = vsel %vm2678_vm0, %v2671_v46, %v2477_v14  ;;  %v3288_v58 = vpack.i.bf16 %v2806_v60, %v2721_v28 }
 0x290   :  { %v2589_v39 = vmax.f32 %v2587_v52, %v2588_v51  ;;  %v3278_v57 = vpack.i.bf16 %v2723_v40, %v2722_v50  ;;  %v2724_v26 = vrot.slane %v5678_v19, 1  ;;  %v5808_v55 = vpack.i.bf16 %v2729_v37, %v2727_v10  ;;  %v2932_v51 = vld [vmem:[%s6127_s4 + $0x70] sm:$0xff] }
 0x291   :  { %v2688_v54 = vsel %vm2678_vm0, %v2673_v7, %v2491_v8  ;;  %v5801_v6 = vsel %vm2693_vm1, %v2686_v61, %v2575_v63  ;;  %3289 = vrot.lane.b32.xlu0 %v3288_v58, %s3375_s29  ;;  %v2013_v28 = vsel %vm1928_vm8, %v5672_v43, -inf  ;;  %v2112_v13 = vsel %vm2027_vm9, %v5672_v43, -inf  ;;  %v2933_v8 = vld [vmem:[%s6127_s4 + $0x78] sm:$0xff] }
 0x292   :  { %v5815_v50 = vsel %vm2693_vm1, %v2688_v54, %v2589_v39  ;;  %v2726_v48 = vrot.slane %v5801_v6, 1  ;;  %3279 = vrot.lane.b32.xlu2 %v3278_v57, %s3374_s3  ;;  %v2014_v53 = vrot.slane %v2013_v28, 4  ;;  %v2113_v42 = vrot.slane %v2112_v13, 4  ;;  %2934 = vmatpush.msra.mxu0 %v2933_v8 }
 0x293   :  { %v2728_v47 = vrot.slane %v5815_v50, 1  ;;  %v2211_v37 = vsel %vm2126_vm10, %v5672_v43, -inf  ;;  %v2310_v18 = vsel %vm2225_vm11, %v5672_v43, -inf  ;;  %v2408_v3 = vsel %vm1928_vm8, %v5682_v32, -inf  ;;  %3182 = vmatpush.msra.mxu3 %v2933_v8  ;;  %3180 = vmatpush.msra.mxu1 %v2933_v8 }
 0x294   :  { %v2015_v35 = vmax.f32 %v2013_v28, %v2014_v53  ;;  %v2114_v17 = vmax.f32 %v2112_v13, %v2113_v42  ;;  %v2212_v16 = vrot.slane %v2211_v37, 4  ;;  %v2311_v33 = vrot.slane %v2310_v18, 4  ;;  %3181 = vmatpush.msra.mxu2 %v2933_v8  ;;  %2935 = vmatpush.msra.mxu0 %v2932_v51 }
 0x295   :  { %v3268_v45 = vpack.i.bf16 %v2728_v47, %v2726_v48  ;;  %v2409_v49 = vrot.slane %v2408_v3, 4  ;;  %v2506_v27 = vsel %vm2027_vm9, %v5682_v32, -inf  ;;  %v2604_v29 = vsel %vm2126_vm10, %v5682_v32, -inf  ;;  %3185 = vmatpush.msra.mxu3 %v2932_v51  ;;  %3183 = vmatpush.msra.mxu1 %v2932_v51 }
 0x296   :  { %v2016_v21 = vrot.slane %v2015_v35, 2  ;;  %v2115_v25 = vrot.slane %v2114_v17, 2  ;;  %v2213_v43 = vmax.f32 %v2211_v37, %v2212_v16  ;;  %v2312_v34 = vmax.f32 %v2310_v18, %v2311_v33  ;;  %3184 = vmatpush.msra.mxu2 %v2932_v51 }
 0x297   :  { %3269 = vrot.lane.b32.xlu1 %v3268_v45, %s3374_s3  ;;  %v3298_v31 = vpack.i.bf16 %v2724_v26, %v2723_v40  ;;  %v2410_v2 = vmax.f32 %v2408_v3, %v2409_v49  ;;  %v2507_v15 = vrot.slane %v2506_v27, 4  ;;  %v2605_v56 = vrot.slane %v2604_v29, 4 }
 0x298   :  { %v2017_v62 = vmax.f32 %v2015_v35, %v2016_v21  ;;  %v2116_v12 = vmax.f32 %v2114_v17, %v2115_v25  ;;  %v2214_v36 = vrot.slane %v2213_v43, 2  ;;  %v2313_v41 = vrot.slane %v2312_v34, 2 }
 0x299   :  { %3299 = vrot.lane.b32.xlu0 %v3298_v31, %s3375_s29  ;;  %v2411_v52 = vrot.slane %v2410_v2, 2  ;;  %v2508_v32 = vmax.f32 %v2506_v27, %v2507_v15  ;;  %v2606_v30 = vmax.f32 %v2604_v29, %v2605_v56  ;;  %v2020_v46 = vsel %vm1928_vm8, %v5686_v9, -inf }
 0x29a   :  { %v2018_v14 = vrot.slane %v2017_v62, 1  ;;  %v2117_v44 = vrot.slane %v2116_v12, 1  ;;  %v2215_v7 = vmax.f32 %v2213_v43, %v2214_v36  ;;  %v2314_v60 = vmax.f32 %v2312_v34, %v2313_v41 }
 0x29b   :  { %v2412_v40 = vmax.f32 %v2410_v2, %v2411_v52  ;;  %v2509_v63 = vrot.slane %v2508_v32, 2  ;;  %v2607_v61 = vrot.slane %v2606_v30, 2  ;;  %v2021_v58 = vrot.slane %v2020_v46, 4 }
 0x29c   :  { %v2019_v39 = vmax.f32 %v2017_v62, %v2018_v14  ;;  %v2118_v54 = vmax.f32 %v2116_v12, %v2117_v44  ;;  %v2216_v57 = vrot.slane %v2215_v7, 1  ;;  %v2315_v28 = vrot.slane %v2314_v60, 1 }
 0x29d   :  { %v2413_v13 = vrot.slane %v2412_v40, 1  ;;  %v2510_v48 = vmax.f32 %v2508_v32, %v2509_v63  ;;  %v2608_v53 = vmax.f32 %v2606_v30, %v2607_v61  ;;  %v2022_v42 = vmax.f32 %v2020_v46, %v2021_v58 }
 0x29e   :  { %v2217_v37 = vmax.f32 %v2215_v7, %v2216_v57  ;;  %v2316_v18 = vmax.f32 %v2314_v60, %v2315_v28  ;;  %v2631_v3 = vsel %vm2618_vm12, %v2019_v39, %v2118_v54  ;;  %v2119_v35 = vsel %vm2027_vm9, %v5686_v9, -inf }
 0x29f   :  { %3294 = vrot.lane.b32.xlu1 %v5808_v55, %s3375_s29  ;;  %v2414_v17 = vmax.f32 %v2412_v40, %v2413_v13  ;;  %v2511_v16 = vrot.slane %v2510_v48, 1  ;;  %v2609_v33 = vrot.slane %v2608_v53, 1  ;;  %v2023_v45 = vrot.slane %v2022_v42, 2 }
 0x2a0   :  { %v2646_v49 = vsel %vm2633_vm13, %v2631_v3, %v2217_v37  ;;  %v2120_v27 = vrot.slane %v2119_v35, 4  ;;  %v2218_v29 = vsel %vm2126_vm10, %v5686_v9, -inf  ;;  %v2317_v21 = vsel %vm2225_vm11, %v5686_v9, -inf }
 0x2a1   :  { %v2512_v25 = vmax.f32 %v2510_v48, %v2511_v16  ;;  %v2610_v43 = vmax.f32 %v2608_v53, %v2609_v33  ;;  %v2661_v34 = vsel %vm2648_vm14, %v2646_v49, %v2316_v18  ;;  %v2024_v31 = vmax.f32 %v2022_v42, %v2023_v45 }
 0x2a2   :  { %v2676_v55 = vsel %vm2663_vm15, %v2661_v34, %v2414_v17  ;;  %v2121_v2 = vmax.f32 %v2119_v35, %v2120_v27  ;;  %v2219_v15 = vrot.slane %v2218_v29, 4  ;;  %v2318_v56 = vrot.slane %v2317_v21, 4  ;;  %v2930_v34 = vld [vmem:[%s6127_s4 + $0x60] sm:$0xff] }
 0x2a3   :  { %v2691_v62 = vsel %vm2678_vm0, %v2676_v55, %v2512_v25  ;;  %v2025_v12 = vrot.slane %v2024_v31, 1  ;;  %v2415_v36 = vsel %vm1928_vm8, %v5692_v38, -inf  ;;  %v2513_v41 = vsel %vm2027_vm9, %v5692_v38, -inf }
 0x2a4   :  { %v5862_v9 = vsel %vm2693_vm1, %v2691_v62, %v2610_v43  ;;  %v2122_v52 = vrot.slane %v2121_v2, 2  ;;  %v2220_v32 = vmax.f32 %v2218_v29, %v2219_v15  ;;  %v2319_v30 = vmax.f32 %v2317_v21, %v2318_v56  ;;  %v2931_v43 = vld [vmem:[%s6127_s4 + $0x68] sm:$0xff]  ;;  %v2928_v62 = vld [vmem:[%s6127_s4 + $0x50] sm:$0xff] }
 0x2a5   :  { %v3283_v46 = vpack.i.bf16 %v5815_v50, %v5862_v9  ;;  %v3303_v14 = vpack.i.bf16 %v2727_v10, %v2730_v20  ;;  %v2731_v44 = vrot.slane %v5862_v9, 1  ;;  %v2416_v7 = vrot.slane %v2415_v36, 4  ;;  %2936 = vmatpush.msra.mxu0 %v2931_v43  ;;  %3188 = vmatpush.msra.mxu3 %v2931_v43 }
 0x2a6   :  { %v2123_v60 = vmax.f32 %v2121_v2, %v2122_v52  ;;  %v2221_v8 = vrot.slane %v2220_v32, 2  ;;  %v2320_v51 = vrot.slane %v2319_v30, 2  ;;  %v2514_v40 = vrot.slane %v2513_v41, 4  ;;  %v2929_v2 = vld [vmem:[%s6127_s4 + $0x58] sm:$0xff]  ;;  %3186 = vmatpush.msra.mxu1 %v2931_v43  ;;  %3187 = vmatpush.msra.mxu2 %v2931_v43 }
 0x2a7   :  { %3284 = vrot.lane.b32.xlu2 %v3283_v46, %s3373_s2  ;;  %3304 = vrot.lane.b32.xlu1 %v3303_v14, %s3374_s3  ;;  %v3308_v63 = vpack.i.bf16 %v2728_v47, %v2731_v44  ;;  %v2026_v61 = vmax.f32 %v2024_v31, %v2025_v12  ;;  %v2417_v58 = vmax.f32 %v2415_v36, %v2416_v7  ;;  %v2611_v39 = vsel %vm2126_vm10, %v5692_v38, -inf  ;;  %v2925_v46 = vld [vmem:[%s6127_s4 + $0x38] sm:$0xff]  ;;  %v2923_v14 = vld [vmem:[%s6127_s4 + $0x28] sm:$0xff] }
 0x2a8   :  { %v2124_v20 = vrot.slane %v2123_v60, 1  ;;  %v2222_v10 = vmax.f32 %v2220_v32, %v2221_v8  ;;  %v2321_v54 = vmax.f32 %v2319_v30, %v2320_v51  ;;  %v2515_v57 = vmax.f32 %v2513_v41, %v2514_v40  ;;  %2937 = vmatpush.msra.mxu0 %v2930_v34  ;;  %3191 = vmatpush.msra.mxu3 %v2930_v34  ;;  %v2927_v32 = vld [vmem:[%s6127_s4 + $0x48] sm:$0xff]  ;;  %v2926_v30 = vld [vmem:[%s6127_s4 + $0x40] sm:$0xff]  ;;  %v2921_v7 = vld [vmem:[%s6127_s4 + $0x18] sm:$0xff]  ;;  %v5930_v51 = vpop.permute.xlu1 %3249 }
 0x2a9   :  { %3309 = vrot.lane.b32.xlu0 %v3308_v63, %s3375_s29  ;;  %v2418_v28 = vrot.slane %v2417_v58, 2  ;;  %v2612_v13 = vrot.slane %v2611_v39, 4  ;;  %v3313_v45 = vpack.i.bf16 %v2731_v44, %v2724_v26  ;;  %3189 = vmatpush.msra.mxu1 %v2930_v34  ;;  %v2922_v44 = vld [vmem:[%s6127_s4 + $0x20] sm:$0xff]  ;;  %v2920_v8 = vld [vmem:[%s6127_s4 + $0x10] sm:$0xff]  ;;  %v5932_v63 = vpop.permute.xlu0 %3244  ;;  %vm3097_vm8 = vcmask 519168  }
 0x2aa   :  { %v2125_v48 = vmax.f32 %v2123_v60, %v2124_v20  ;;  %v2223_v53 = vrot.slane %v2222_v10, 1  ;;  %v2322_v42 = vrot.slane %v2321_v54, 1  ;;  %v2516_v37 = vrot.slane %v2515_v57, 2  ;;  %3190 = vmatpush.msra.mxu2 %v2930_v34  ;;  %2938 = vmatpush.msra.mxu0 %v2929_v2  ;;  %v5925_v60 = vpop.permute.xlu2 %3239 }
 0x2ab   :  { %v2419_v18 = vmax.f32 %v2417_v58, %v2418_v28  ;;  %v2613_v3 = vmax.f32 %v2611_v39, %v2612_v13  ;;  %3194 = vmatpush.msra.mxu3 %v2929_v2  ;;  %3192 = vmatpush.msra.mxu1 %v2929_v2  ;;  %v2918_v58 = vld [vmem:[%s6127_s4] sm:$0xff]  ;;  %v3241_v28 = vunpack.i.l.bf16 %v5925_v60  ;;  %v3242_v43 = vunpack.i.h.bf16 %v5925_v60 }
 0x2ac   :  { %v2224_v47 = vmax.f32 %v2222_v10, %v2223_v53  ;;  %v2517_v35 = vmax.f32 %v2515_v57, %v2516_v37  ;;  %v2632_v17 = vsel %vm2618_vm12, %v2026_v61, %v2125_v48  ;;  %v2323_v16 = vmax.f32 %v2321_v54, %v2322_v42  ;;  %3193 = vmatpush.msra.mxu2 %v2929_v2  ;;  %v2919_v61 = vld [vmem:[%s6127_s4 + $0x8] sm:$0xff] }
 0x2ad   :  { %v2420_v38 = vrot.slane %v2419_v18, 1  ;;  %v2614_v33 = vrot.slane %v2613_v3, 2  ;;  %2939 = vmatpush.msra.mxu0 %v2928_v62  ;;  %3197 = vmatpush.msra.mxu3 %v2928_v62  ;;  %vm3109_vm9 = vcmask 523268   ;;  %vm3161_vm10 = vcmask 74752  }
 0x2ae   :  { %v2518_v49 = vrot.slane %v2517_v35, 1  ;;  %v2647_v27 = vsel %vm2633_vm13, %v2632_v17, %v2224_v47  ;;  %3195 = vmatpush.msra.mxu1 %v2928_v62  ;;  %3196 = vmatpush.msra.mxu2 %v2928_v62 }
 0x2af   :  { %v2421_v29 = vmax.f32 %v2419_v18, %v2420_v38  ;;  %v2615_v21 = vmax.f32 %v2613_v3, %v2614_v33  ;;  %v2662_v25 = vsel %vm2648_vm14, %v2647_v27, %v2323_v16  ;;  %3314 = vrot.lane.b32.xlu1 %v3313_v45, %s3374_s3  ;;  %2940 = vmatpush.msra.mxu0 %v2927_v32  ;;  %v3246_v3 = vunpack.i.l.bf16 %v5932_v63 }
 0x2b0   :  { %v2519_v31 = vmax.f32 %v2517_v35, %v2518_v49  ;;  %3200 = vmatpush.msra.mxu3 %v2927_v32  ;;  %3198 = vmatpush.msra.mxu1 %v2927_v32 }
 0x2b1   :  { %v2616_v26 = vrot.slane %v2615_v21, 1  ;;  %v2677_v55 = vsel %vm2663_vm15, %v2662_v25, %v2421_v29  ;;  %3199 = vmatpush.msra.mxu2 %v2927_v32  ;;  %2941 = vmatpush.msra.mxu0 %v2926_v30  ;;  %v3247_v32 = vunpack.i.h.bf16 %v5932_v63 }
 0x2b2   :  { %v2692_v15 = vsel %vm2678_vm0, %v2677_v55, %v2519_v31  ;;  %3203 = vmatpush.msra.mxu3 %v2926_v30  ;;  %3201 = vmatpush.msra.mxu1 %v2926_v30 }
 0x2b3   :  { %v2617_v56 = vmax.f32 %v2615_v21, %v2616_v26  ;;  %3202 = vmatpush.msra.mxu2 %v2926_v30  ;;  %2942 = vmatpush.msra.mxu0 %v2925_v46  ;;  %v3255_v40 = vpop.permute.xlu2 %3254 }
 0x2b4   :  { %3206 = vmatpush.msra.mxu3 %v2925_v46  ;;  %3204 = vmatpush.msra.mxu1 %v2925_v46  ;;  %v3257_v34 = vunpack.i.h.bf16 %v3255_v40  ;;  %v3256_v31 = vunpack.i.l.bf16 %v3255_v40 }
 0x2b5   :  { %v2707_v12 = vsel %vm2693_vm1, %v2692_v15, %v2617_v56  ;;  %3205 = vmatpush.msra.mxu2 %v2925_v46 }
 0x2b6   :  { %v3318_v36 = vpack.i.bf16 %v2707_v12, %v5754_v5  ;;  %v2807_v41 = vrot.slane %v2707_v12, 1 }
 0x2b8   :  { %3319 = vrot.lane.b32.xlu2 %v3318_v36, %s3373_s2  ;;  %v3323_v52 = vpack.i.bf16 %v2807_v41, %v2725_v23  ;;  %v2924_v23 = vld [vmem:[%s6127_s4 + $0x30] sm:$0xff] }
 0x2b9   :  { %2943 = vmatpush.msra.mxu0 %v2924_v23  ;;  %3209 = vmatpush.msra.mxu3 %v2924_v23 }
 0x2ba   :  { %3324 = vrot.lane.b32.xlu0 %v3323_v52, %s3375_s29  ;;  %3207 = vmatpush.msra.mxu1 %v2924_v23 }
 0x2bb   :  { %3208 = vmatpush.msra.mxu2 %v2924_v23  ;;  %2944 = vmatpush.msra.mxu0 %v2923_v14  ;;  %v3252_v23 = vunpack.i.h.bf16 %v5930_v51 }
 0x2bc   :  { %3212 = vmatpush.msra.mxu3 %v2923_v14  ;;  %3210 = vmatpush.msra.mxu1 %v2923_v14 }
 0x2bd   :  { %3211 = vmatpush.msra.mxu2 %v2923_v14  ;;  %2945 = vmatpush.msra.mxu0 %v2922_v44 }
 0x2be   :  { %3215 = vmatpush.msra.mxu3 %v2922_v44  ;;  %3213 = vmatpush.msra.mxu1 %v2922_v44 }
 0x2bf   :  { %3214 = vmatpush.msra.mxu2 %v2922_v44  ;;  %2946 = vmatpush.msra.mxu0 %v2921_v7 }
 0x2c0   :  { %3218 = vmatpush.msra.mxu3 %v2921_v7  ;;  %3216 = vmatpush.msra.mxu1 %v2921_v7 }
 0x2c1   :  { %3217 = vmatpush.msra.mxu2 %v2921_v7  ;;  %2947 = vmatpush.msra.mxu0 %v2920_v8 }
 0x2c2   :  { %3221 = vmatpush.msra.mxu3 %v2920_v8  ;;  %3219 = vmatpush.msra.mxu1 %v2920_v8 }
 0x2c3   :  { %3220 = vmatpush.msra.mxu2 %v2920_v8  ;;  %2948 = vmatpush.msra.mxu0 %v2919_v61 }
 0x2c4   :  { %3224 = vmatpush.msra.mxu3 %v2919_v61  ;;  %3222 = vmatpush.msra.mxu1 %v2919_v61 }
 0x2c5   :  { %3223 = vmatpush.msra.mxu2 %v2919_v61  ;;  %2949 = vmatpush.msra.mxu0 %v2918_v58 }
 0x2c6   :  { %3227 = vmatpush.msra.mxu3 %v2918_v58  ;;  %3225 = vmatpush.msra.mxu1 %v2918_v58 }
 0x2c7   :  { %3226 = vmatpush.msra.mxu2 %v2918_v58 }
 0x2cc   :  { %v3260_v39 = vpop.permute.xlu1 %3259 }
 0x2cd   :  { %v3261_v20 = vunpack.i.l.bf16 %v3260_v39  ;;  %v3262_v33 = vunpack.i.h.bf16 %v3260_v39 }
 0x2ce   :  { %v3275_v10 = vpop.permute.xlu2 %3274 }
 0x2cf   :  { %v2845_v57 = vsel %vm1266_vm2, %v5485_v11, %v3261_v20  ;;  %v3276_v53 = vunpack.i.l.bf16 %v3275_v10  ;;  %v2853_v21 = vsel %vm1266_vm2, %v6422_v1, %v3262_v33  ;;  %v3277_v62 = vunpack.i.h.bf16 %v3275_v10 }
 0x2d0   :  { %v2858_v48 = vsel %vm2856_vm3, %v2845_v57, %v3241_v28  ;;  %v2866_v12 = vsel %vm2856_vm3, %v2853_v21, %v3242_v43 }
 0x2d1   :  { %v2871_v37 = vsel %vm2869_vm4, %v2858_v48, %v3276_v53  ;;  %v2879_v7 = vsel %vm2869_vm4, %v2866_v12, %v3277_v62 }
 0x2d2   :  { %v2883_v17 = vrot.slane %v2871_v37, 2 }
 0x2ec   :  { %v3265_v54 = vpop.permute.xlu0 %3264  ;;  %v3280_v18 = vpop.permute.xlu2 %3279 }
 0x2ed   :  { %v3266_v13 = vunpack.i.l.bf16 %v3265_v54  ;;  %v3282_v16 = vunpack.i.h.bf16 %v3280_v18  ;;  %v3281_v38 = vunpack.i.l.bf16 %v3280_v18  ;;  %v3267_v25 = vunpack.i.h.bf16 %v3265_v54 }
 0x2ef   :  { %v2844_v42 = vsel %vm1266_vm2, %v5745_v59, %v3266_v13  ;;  %v2847_v59 = vsel %vm1266_vm2, %v5675_v4, %v3282_v16  ;;  %v2846_v29 = vsel %vm1266_vm2, %v6423_v24, %v3281_v38  ;;  %v2849_v1 = vsel %vm1266_vm2, %v5754_v5, %v3267_v25 }
 0x2f0   :  { %v2857_v11 = vsel %vm2856_vm3, %v2844_v42, %v3246_v3  ;;  %v2859_v4 = vsel %vm2856_vm3, %v2846_v29, %v3256_v31  ;;  %v2860_v24 = vsel %vm2856_vm3, %v2847_v59, %v3257_v34  ;;  %v3251_v5 = vunpack.i.l.bf16 %v5930_v51 }
 0x2f1   :  { %v2862_v63 = vsel %vm2856_vm3, %v2849_v1, %v3247_v32 }
 0x301   :  { %v3285_v48 = vpop.permute.xlu2 %3284 }
 0x302   :  { %v3287_v18 = vunpack.i.h.bf16 %v3285_v48  ;;  %v3286_v3 = vunpack.i.l.bf16 %v3285_v48 }
 0x303   :  { %v3290_v47 = vpop.permute.xlu0 %3289 }
 0x304   :  { %v3291_v35 = vunpack.i.l.bf16 %v3290_v47  ;;  %v3292_v36 = vunpack.i.h.bf16 %v3290_v47 }
 0x306   :  { %v2870_v45 = vsel %vm2869_vm4, %v2857_v11, %v3291_v35 }
 0x307   :  { %v2909_v49 = vsel %vm2693_vm1, %v2870_v45, %v2883_v17 }
 0x308   :  { %2950 = vmatmul.f32.vlgmr.msra.gmra.mxu0 %v2909_v49 }
 0x309   :  { %v3270_v27 = vpop.permute.xlu1 %3269 }
 0x30a   :  { %v3272_v55 = vunpack.i.h.bf16 %v3270_v27  ;;  %v3271_v2 = vunpack.i.l.bf16 %v3270_v27 }
 0x30b   :  { %v3300_v26 = vpop.permute.xlu0 %3299 }
 0x30c   :  { %v3302_v15 = vunpack.i.h.bf16 %v3300_v26  ;;  %v3301_v56 = vunpack.i.l.bf16 %v3300_v26  ;;  %v2852_v14 = vsel %vm1266_vm2, %v5815_v50, %v3272_v55  ;;  %v2850_v44 = vsel %vm1266_vm2, %v5801_v6, %v3271_v2 }
 0x30d   :  { %v2875_v50 = vsel %vm2869_vm4, %v2862_v63, %v3292_v36  ;;  %v2865_v39 = vsel %vm2856_vm3, %v2852_v14, %v3252_v23  ;;  %v2901_v6 = vrot.slane %v2879_v7, 2  ;;  %v2863_v20 = vsel %vm2856_vm3, %v2850_v44, %v3251_v5 }
 0x30e   :  { %v2872_v41 = vsel %vm2869_vm4, %v2859_v4, %v3301_v56  ;;  %v2873_v52 = vsel %vm2869_vm4, %v2860_v24, %v3302_v15  ;;  %v2892_v57 = vrot.slane %v2875_v50, 2 }
 0x30f   :  { %v2886_v30 = vrot.slane %v2872_v41, 4  ;;  %v2889_v46 = vrot.slane %v2873_v52, 6 }
 0x311   :  { %v3295_v60 = vpop.permute.xlu1 %3294  ;;  %v2910_v8 = vsel %vm2663_vm15, %v2883_v17, %v2886_v30  ;;  %v2911_v40 = vsel %vm2633_vm13, %v2886_v30, %v2889_v46 }
 0x312   :  { %v3297_v61 = vunpack.i.h.bf16 %v3295_v60  ;;  %v3296_v58 = vunpack.i.l.bf16 %v3295_v60  ;;  %2953 = vmatmul.f32.gmra.mxu0 %v2910_v8  ;;  %2956 = vmatmul.f32.vlgmr.msra.gmra.mxu1 %v2911_v40  ;;  %v3320_v43 = vpop.permute.xlu2 %3319 }
 0x313   :  { %v3322_v26 = vunpack.i.h.bf16 %v3320_v43  ;;  %v3321_v55 = vunpack.i.l.bf16 %v3320_v43 }
 0x314   :  { %v2878_v51 = vsel %vm2869_vm4, %v2865_v39, %v3297_v61  ;;  %v2876_v10 = vsel %vm2869_vm4, %v2863_v20, %v3296_v58  ;;  %v3376_v61 = vmov 72.0  }
 0x315   :  { %v2915_v54 = vsel %vm2693_vm1, %v2878_v51, %v2901_v6  ;;  %v2895_v28 = vrot.slane %v2876_v10, 4  ;;  %3337 = vrcp.f32 %v3376_v61 }
 0x316   :  { %2968 = vmatmul.f32.vlgmr.msra.gmra.mxu3 %v2915_v54 }
 0x317   :  { %v2913_v13 = vsel %vm2663_vm15, %v2892_v57, %v2895_v28 }
 0x318   :  { %2962 = vmatmul.f32.vlgmr.msra.gmra.mxu2 %v2913_v13 }
 0x319   :  { %v3305_v53 = vpop.permute.xlu1 %3304 }
 0x31a   :  { %v3307_v42 = vunpack.i.h.bf16 %v3305_v53  ;;  %v3306_v37 = vunpack.i.l.bf16 %v3305_v53 }
 0x31b   :  { %v3310_v47 = vpop.permute.xlu0 %3309 }
 0x31c   :  { %v2851_v35 = vsel %vm1266_vm2, %v6425_v22, %v3307_v42  ;;  %v2854_v11 = vsel %vm1266_vm2, %v6424_v0, %v3306_v37  ;;  %v3312_v17 = vunpack.i.h.bf16 %v3310_v47  ;;  %v3311_v16 = vunpack.i.l.bf16 %v3310_v47  ;;  %v3338_v42 = vpop.eup %3337 }
 0x31d   :  { %v2864_v38 = vsel %vm2856_vm3, %v2851_v35, %v3287_v18  ;;  %v2867_v33 = vsel %vm2856_vm3, %v2854_v11, %v3286_v3 }
 0x31e   :  { %v2877_v45 = vsel %vm2869_vm4, %v2864_v38, %v3312_v17  ;;  %v2880_v49 = vsel %vm2869_vm4, %v2867_v33, %v3311_v16 }
 0x31f   :  { %v2898_v27 = vrot.slane %v2877_v45, 6  ;;  %v2904_v59 = vrot.slane %v2880_v49, 4  ;;  %v3002_v45 = vmul.f32 72.0, %v3338_v42 }
 0x321   :  { %v2914_v29 = vsel %vm2633_vm13, %v2895_v28, %v2898_v27  ;;  %v2916_v21 = vsel %vm2663_vm15, %v2901_v6, %v2904_v59  ;;  %v3315_v22 = vpop.permute.xlu1 %3314 }
 0x322   :  { %2965 = vmatmul.f32.gmra.mxu2 %v2914_v29  ;;  %2971 = vmatmul.f32.gmra.mxu3 %v2916_v21  ;;  %v3317_v0 = vunpack.i.h.bf16 %v3315_v22  ;;  %v3316_v25 = vunpack.i.l.bf16 %v3315_v22 }
 0x324   :  { %v2855_v34 = vsel %vm1266_vm2, %v5862_v9, %v3317_v0  ;;  %v2848_v31 = vsel %vm1266_vm2, %v5678_v19, %v3316_v25  ;;  %vm3006_vm2 = vweird.f32 %v3338_v42 }
 0x325   :  { %v2868_v2 = vsel %vm2856_vm3, %v2855_v34, %v3322_v26  ;;  %v2861_v56 = vsel %vm2856_vm3, %v2848_v31, %v3321_v55  ;;  %v3003_v31 = vsub.f32 1.0, %v3002_v45 }
 0x32c   :  { %v3325_v15 = vpop.permute.xlu0 %3324 }
 0x32d   :  { %v3327_v62 = vunpack.i.h.bf16 %v3325_v15  ;;  %v3326_v12 = vunpack.i.l.bf16 %v3325_v15 }
 0x32f   :  { %v2881_v4 = vsel %vm2869_vm4, %v2868_v2, %v3327_v62  ;;  %v2874_v24 = vsel %vm2869_vm4, %v2861_v56, %v3326_v12  ;;  %v3004_v62 = vmul.f32 %v3338_v42, %v3003_v31 }
 0x330   :  { %v2912_v1 = vsel %vm2693_vm1, %v2874_v24, %v2892_v57  ;;  %v2907_v36 = vrot.slane %v2881_v4, 6 }
 0x331   :  { %2959 = vmatmul.f32.gmra.mxu1 %v2912_v1 }
 0x332   :  { %v2917_v9 = vsel %vm2633_vm13, %v2904_v59, %v2907_v36  ;;  %v3005_v36 = vadd.f32 %v3338_v42, %v3004_v62 }
 0x333   :  { %2974 = vmatmul.f32.gmra.mxu3 %v2917_v9 }
 0x385   :  { %v6003_v19 = vpop.f32.mrf.mxu0 }
 0x386   :  { %v3009_v23 = vmul.f32 %v6003_v19, %v6003_v19  ;;  %v2978_v44 = vsel %vm2856_vm3, %v6003_v19, 0.0 }
 0x388   :  { %v3018_v60 = vsel %vm2856_vm3, %v3009_v23, 0.0 }
 0x38f   :  { %v6005_v41 = vpop.f32.mrf.mxu0  ;;  %v6011_v30 = vpop.f32.mrf.mxu1 }
 0x390   :  { %v3010_v32 = vmul.f32 %v6005_v41, %v6005_v41  ;;  %v2979_v14 = vsel %vm2856_vm3, %v6005_v41, 0.0  ;;  %v3011_v8 = vmul.f32 %v6011_v30, %v6011_v30  ;;  %v2981_v58 = vsel %vm2856_vm3, %v6011_v30, 0.0 }
 0x391   :  { %v2980_v5 = vadd.f32 %v2979_v14, %v2978_v44  ;;  %v3007_v44 = vsel %vm3006_vm2, %v3338_v42, %v3005_v36  ;;  %v3129_v42 = vld [vmem:[%s6130_s7 + $0x18] sm:$0xff] }
 0x392   :  { %v3019_v7 = vsel %vm2856_vm3, %v3010_v32, 0.0  ;;  %v3021_v20 = vsel %vm2856_vm3, %v3011_v8, 0.0 }
 0x393   :  { %v3020_v40 = vadd.f32 %v3019_v7, %v3018_v60  ;;  %v2982_v50 = vadd.f32 %v2981_v58, %v2980_v5 }
 0x395   :  { %v3022_v57 = vadd.f32 %v3021_v20, %v3020_v40 }
 0x399   :  { %v6007_v52 = vpop.f32.mrf.mxu3 }
 0x39a   :  { %v3015_v3 = vmul.f32 %v6007_v52, %v6007_v52  ;;  %v2989_v16 = vsel %vm2856_vm3, %v6007_v52, 0.0 }
 0x39b   :  { %v6013_v46 = vpop.f32.mrf.mxu2 }
 0x39c   :  { %v3013_v51 = vmul.f32 %v6013_v46, %v6013_v46  ;;  %v2985_v13 = vsel %vm2856_vm3, %v6013_v46, 0.0  ;;  %v3029_v29 = vsel %vm2856_vm3, %v3015_v3, 0.0  ;;  %v3128_v3 = vld [vmem:[%s6130_s7 + $0x10] sm:$0xff] }
 0x39e   :  { %v3025_v47 = vsel %vm2856_vm3, %v3013_v51, 0.0 }
 0x3a5   :  { %v6025_v63 = vpop.f32.mrf.mxu3  ;;  %v6031_v6 = vpop.f32.mrf.mxu2 }
 0x3a6   :  { %v3014_v53 = vmul.f32 %v6031_v6, %v6031_v6  ;;  %v2987_v35 = vsel %vm2856_vm3, %v6031_v6, 0.0  ;;  %v3016_v33 = vmul.f32 %v6025_v63, %v6025_v63  ;;  %v2991_v21 = vsel %vm2856_vm3, %v6025_v63, 0.0 }
 0x3a8   :  { %v3027_v38 = vsel %vm2856_vm3, %v3014_v53, 0.0  ;;  %v3031_v43 = vsel %vm2856_vm3, %v3016_v33, 0.0 }
 0x3ae   :  { %v6029_v39 = vpop.f32.mrf.mxu1 }
 0x3af   :  { %v2983_v10 = vsel %vm2856_vm3, %v6029_v39, 0.0  ;;  %v3012_v54 = vmul.f32 %v6029_v39, %v6029_v39 }
 0x3b0   :  { %v2984_v28 = vadd.f32 %v2983_v10, %v2982_v50  ;;  %v3133_v10 = vld [vmem:[%s6130_s7 + $0x38] sm:$0xff] }
 0x3b1   :  { %v3023_v48 = vsel %vm2856_vm3, %v3012_v54, 0.0  ;;  %v3132_v54 = vld [vmem:[%s6130_s7 + $0x30] sm:$0xff]  ;;  %3149 = vmatpush.msrb.mxu1 %v3133_v10 }
 0x3b2   :  { %v3024_v37 = vadd.f32 %v3023_v48, %v3022_v57  ;;  %v2986_v18 = vadd.f32 %v2985_v13, %v2984_v28  ;;  %v3131_v28 = vld [vmem:[%s6130_s7 + $0x28] sm:$0xff]  ;;  %v3130_v48 = vld [vmem:[%s6130_s7 + $0x20] sm:$0xff] }
 0x3b3   :  { %3150 = vmatpush.msrb.mxu1 %v3132_v54 }
 0x3b4   :  { %v2988_v11 = vadd.f32 %v2987_v35, %v2986_v18  ;;  %v3026_v17 = vadd.f32 %v3025_v47, %v3024_v37  ;;  %v3044_v37 = vld [vmem:[%s6128_s5] sm:$0x1]  ;;  %v3127_v35 = vld [vmem:[%s6130_s7 + $0x8] sm:$0xff] }
 0x3b5   :  { %3151 = vmatpush.msrb.mxu1 %v3131_v28 }
 0x3b6   :  { %v2990_v49 = vadd.f32 %v2989_v16, %v2988_v11  ;;  %v3028_v27 = vadd.f32 %v3027_v38, %v3026_v17  ;;  %v6055_v59 = vpop.f32.mrf.mxu3  ;;  %v3057_v17 = vld [vmem:[%s6129_s6] sm:$0x1] }
 0x3b7   :  { %v3017_v22 = vmul.f32 %v6055_v59, %v6055_v59  ;;  %v2993_v34 = vsel %vm2856_vm3, %v6055_v59, 0.0  ;;  %3152 = vmatpush.msrb.mxu1 %v3130_v48  ;;  %v3126_v16 = vld [vmem:[%s6130_s7] sm:$0xff] }
 0x3b8   :  { %v3030_v0 = vadd.f32 %v3029_v29, %v3028_v27  ;;  %v2992_v25 = vadd.f32 %v2991_v21, %v2990_v49 }
 0x3b9   :  { %v3033_v2 = vsel %vm2856_vm3, %v3017_v22, 0.0  ;;  %3153 = vmatpush.msrb.mxu1 %v3129_v42 }
 0x3ba   :  { %v3032_v26 = vadd.f32 %v3031_v43, %v3030_v0  ;;  %v2994_v55 = vadd.f32 %v2993_v34, %v2992_v25 }
 0x3bb   :  { %3154 = vmatpush.msrb.mxu1 %v3128_v3 }
 0x3bc   :  { %v2995_v15 = vrot.slane %v2994_v55, 4  ;;  %v3034_v56 = vadd.f32 %v3033_v2, %v3032_v26 }
 0x3bd   :  { %3155 = vmatpush.msrb.mxu1 %v3127_v35 }
 0x3be   :  { %v2996_v12 = vadd.f32 %v2995_v15, %v2994_v55  ;;  %v3035_v4 = vrot.slane %v3034_v56, 4 }
 0x3bf   :  { %3156 = vmatpush.msrb.mxu1 %v3126_v16 }
 0x3c0   :  { %v2997_v24 = vrot.slane %v2996_v12, 2  ;;  %v3036_v1 = vadd.f32 %v3035_v4, %v3034_v56 }
 0x3c2   :  { %v2998_v9 = vadd.f32 %v2997_v24, %v2996_v12  ;;  %v3037_v32 = vrot.slane %v3036_v1, 2 }
 0x3c4   :  { %v2999_v23 = vrot.slane %v2998_v9, 1  ;;  %v3038_v14 = vadd.f32 %v3037_v32, %v3036_v1 }
 0x3c6   :  { %v3000_v7 = vadd.f32 %v2999_v23, %v2998_v9  ;;  %v3039_v5 = vrot.slane %v3038_v14, 1 }
 0x3c8   :  { %v3008_v60 = vmul.f32 %v3007_v44, %v3000_v7  ;;  %v3040_v8 = vadd.f32 %v3039_v5, %v3038_v14 }
 0x3ca   :  { %v3041_v40 = vmul.f32 %v3040_v8, %v3007_v44  ;;  %v3042_v61 = vmul.f32 %v3008_v60, %v3008_v60 }
 0x3cc   :  { %v3043_v58 = vsub.f32 %v3041_v40, %v3042_v61 }
 0x3ce   :  { %v3045_v50 = vadd.f32 1e-05, %v3043_v58 }
 0x3d0   :  { %3339 = vrsqrt.f32 %v3045_v50  ;;  %vm3052_vm6 = vweird.f32 %v3045_v50 }
 0x3d6   :  { %v3340_v20 = vpop.eup %3339 }
 0x3d7   :  { %v3047_v51 = vmul.f32 %v3340_v20, %v3045_v50  ;;  %vm3053_vm5 = vweird.f32 %v3340_v20 }
 0x3d8   :  { %vm3054_vm7 = vmor %vm3052_vm6, %vm3053_vm5 }
 0x3d9   :  { %v3048_v57 = vmul.f32 %v3340_v20, %v3047_v51 }
 0x3db   :  { %v3049_v13 = vmul.f32 0.5, %v3048_v57 }
 0x3dd   :  { %v3050_v53 = vsub.f32 1.5, %v3049_v13 }
 0x3df   :  { %v3051_v18 = vmul.f32 %v3340_v20, %v3050_v53 }
 0x3e1   :  { %v3055_v47 = vsel %vm3054_vm7, %v3340_v20, %v3051_v18 }
 0x3e2   :  { %v3056_v11 = vmul.f32 %v3055_v47, %v3044_v37 }
 0x3e4   :  { %v3058_v38 = vmul.f32 %v3056_v11, %v3008_v60  ;;  %v3061_v33 = vperm.slane %v3056_v11, 0 }
 0x3e6   :  { %v3059_v45 = vsub.f32 %v3057_v17, %v3058_v38  ;;  %v3063_v49 = vmul.f32 %v3061_v33, %v6003_v19  ;;  %v3064_v27 = vmul.f32 %v3061_v33, %v6005_v41  ;;  %v3067_v29 = vmul.f32 %v3061_v33, %v6013_v46  ;;  %v3332_v17 = vld [vmem:[%s6131_s8] ss:$0 sm:$0xff] }
 0x3e7   :  { %v3068_v21 = vmul.f32 %v3061_v33, %v6031_v6  ;;  %v3069_v0 = vmul.f32 %v3061_v33, %v6007_v52  ;;  %v3070_v25 = vmul.f32 %v3061_v33, %v6025_v63  ;;  %v3071_v43 = vmul.f32 %v3061_v33, %v6055_v59 }
 0x3e8   :  { %v3073_v22 = vperm.slane %v3059_v45, 0  ;;  %v3065_v34 = vmul.f32 %v3061_v33, %v6011_v30  ;;  %v3066_v46 = vmul.f32 %v3061_v33, %v6029_v39 }
 0x3ea   :  { %v3075_v31 = vadd.f32 %v3073_v22, %v3063_v49  ;;  %v3076_v26 = vadd.f32 %v3073_v22, %v3064_v27  ;;  %v3079_v19 = vadd.f32 %v3073_v22, %v3067_v29  ;;  %v3080_v55 = vadd.f32 %v3073_v22, %v3068_v21 }
 0x3eb   :  { %v3081_v2 = vadd.f32 %v3073_v22, %v3069_v0  ;;  %v3082_v15 = vadd.f32 %v3073_v22, %v3070_v25  ;;  %v3083_v41 = vadd.f32 %v3073_v22, %v3071_v43  ;;  %v3077_v12 = vadd.f32 %v3073_v22, %v3065_v34 }
 0x3ec   :  { %v3084_v56 = vmax.f32 %v3075_v31, 0.0  ;;  %v3085_v6 = vmax.f32 %v3076_v26, 0.0  ;;  %v3088_v62 = vmax.f32 %v3079_v19, 0.0  ;;  %v3078_v24 = vadd.f32 %v3073_v22, %v3066_v46 }
 0x3ed   :  { %v3090_v52 = vmax.f32 %v3081_v2, 0.0  ;;  %v3091_v4 = vmax.f32 %v3082_v15, 0.0  ;;  %v3092_v63 = vmax.f32 %v3083_v41, 0.0  ;;  %v3089_v59 = vmax.f32 %v3080_v55, 0.0 }
 0x3ee   :  { %v3093_v30 = vsel %vm2856_vm3, %v3084_v56, -inf  ;;  %v3098_v1 = vsel %vm3097_vm8, %v3088_v62, -inf  ;;  %v3110_v36 = vsel %vm3109_vm9, %v3088_v62, -inf  ;;  %v3094_v9 = vsel %vm2856_vm3, %v3085_v6, -inf }
 0x3ef   :  { %v3099_v32 = vmax.f32 %v3093_v30, %v3098_v1  ;;  %v3112_v39 = vsel %vm2856_vm3, %v3090_v52, -inf  ;;  %v3113_v23 = vsel %vm2856_vm3, %v3091_v4, -inf  ;;  %v3114_v14 = vsel %vm2856_vm3, %v3092_v63, -inf }
 0x3f0   :  { %v3086_v44 = vmax.f32 %v3077_v12, 0.0  ;;  %v3087_v7 = vmax.f32 %v3078_v24, 0.0  ;;  %v3115_v60 = vmax.f32 %v3110_v36, %v3114_v14  ;;  %v3111_v8 = vsel %vm2856_vm3, %v3089_v59, -inf }
 0x3f1   :  { %v3100_v5 = vmax.f32 %v3099_v32, %v3094_v9  ;;  %v3117_v50 = vmax.f32 %v3112_v39, %v3113_v23 }
 0x3f2   :  { %v3095_v40 = vsel %vm2856_vm3, %v3086_v44, -inf  ;;  %v3096_v61 = vsel %vm2856_vm3, %v3087_v7, -inf  ;;  %v3116_v58 = vmax.f32 %v3115_v60, %v3111_v8 }
 0x3f3   :  { %v3101_v20 = vmax.f32 %v3095_v40, %v3096_v61 }
 0x3f4   :  { %v3118_v51 = vmax.f32 %v3116_v58, %v3117_v50 }
 0x3f5   :  { %v3102_v10 = vmax.f32 %v3100_v5, %v3101_v20 }
 0x3f6   :  { %v3119_v54 = vrot.slane %v3118_v51, 4 }
 0x3f7   :  { %v3103_v57 = vrot.slane %v3102_v10, 4 }
 0x3f8   :  { %v3120_v13 = vmax.f32 %v3118_v51, %v3119_v54 }
 0x3f9   :  { %v3104_v28 = vmax.f32 %v3102_v10, %v3103_v57 }
 0x3fa   :  { %v3121_v53 = vrot.slane %v3120_v13, 2 }
 0x3fb   :  { %v3105_v48 = vrot.slane %v3104_v28, 2 }
 0x3fc   :  { %v3122_v37 = vmax.f32 %v3120_v13, %v3121_v53 }
 0x3fd   :  { %v3106_v42 = vmax.f32 %v3104_v28, %v3105_v48 }
 0x3fe   :  { %v3123_v3 = vrot.slane %v3122_v37, 1 }
 0x3ff   :  { %v3107_v18 = vrot.slane %v3106_v42, 1 }
 0x400   :  { %v3124_v35 = vmax.f32 %v3122_v37, %v3123_v3 }
 0x401   :  { %v3108_v47 = vmax.f32 %v3106_v42, %v3107_v18 }
 0x403   :  { %v3125_v11 = vsel %vm2618_vm12, %v3108_v47, %v3124_v35 }
 0x404   :  { %3179 = vmatmul.msk.f32.vlgmr.msrb.gmra.mxu1 %vm2856_vm3, %v3125_v11 }
 0x481   :  { %v3158_v16 = vpop.f32.mrf.mxu1 }
 0x482   :  { %v3159_v38 = vadd.f32 %v3332_v17, %v3158_v16 }
 0x484   :  { %3162 = vst.msk [vmem:[#allocation2] sm:$0x3] %vm3161_vm10, %v3159_v38 }
 0x485   :  { %3173 = dma.vmem_to_hbm [thread:$0]  %s3169_s10, 32, %s3171_s13, [#allocation3]  }
 0x486   :  { %3369 = dma.done.wait [#allocation3], 32  }
 0x487   :  { %3370 = vsyncadd [#allocation3], 4294967264 }
 0x488   :  { %3178 = vsyncpa [#allocation3], 1 }

</bundles_post_ra>
